<compile_context>
chip_gen: v6e
topology: v6e:2x2x1
jax: 0.10.0
libtpu: 0.0.40
codegen_flags: <defaults>
</compile_context>

<pallas_src>
import math
import functools

import jax
import jax.numpy as jnp
from jax.experimental import pallas as pl
from jax.experimental.pallas import tpu as pltpu

BN_EPS = 1e-5       # nn.BatchNorm1d default
NORM_EPS = 1e-6     # Norm module default
D_FF = 2048         # FeedForward default


def _const_spec(shape):
    """Full-array BlockSpec with a constant index map (1-D grid)."""
    nd = len(shape)
    return pl.BlockSpec(tuple(shape), lambda i, _nd=nd: (0,) * _nd)


# ==========================================================================
# Kernel A: fused DyConv1..4 (+ BatchNorm1d training-mode + ReLU)
#   grid iterates over S-chunks ("parallel"); BN stats are per-timestep so
#   chunking the sequence axis is exact.  All layer intermediates stay on-chip.
# ==========================================================================
def dyconv_chain_kernel(x_ref, c_ref, adj_ref,
                        w1_ref, b1_ref, g1_ref, be1_ref,
                        w2_ref, b2_ref, g2_ref, be2_ref,
                        w3_ref, b3_ref, g3_ref, be3_ref,
                        w4_ref, b4_ref, g4_ref, be4_ref,
                        o_ref):
    B, Sc, V, xf = x_ref.shape
    cf = c_ref.shape[-1]
    X = B * Sc

    x3 = x_ref[...].reshape(X, V, xf)
    c3 = c_ref[...].reshape(X, V, cf)
    adj3 = adj_ref[...].reshape(X, V, V)
    h = jnp.concatenate([x3, c3], axis=-1)            # torch.cat((x, c), dim=3)

    def layer(h, w_r, b_r, g_r, be_r):
        # DyConv: (x @ W) then (adj @ support) + bias
        support = jnp.einsum('bvf,fo->bvo', h, w_r[...],
                             preferred_element_type=jnp.float32)
        out = jnp.einsum('bvw,bwo->bvo', adj3, support,
                         preferred_element_type=jnp.float32)
        out = out + b_r[...]                          # (1, Fout) broadcast
        fout = out.shape[-1]
        # BatchNorm1d (training): per-variable stats over (batch, feature),
        # computed independently per timestep -> reduce over axes (0, 3).
        out4 = out.reshape(B, Sc, V, fout)
        mean = jnp.mean(out4, axis=(0, 3), keepdims=True)
        var = jnp.mean((out4 - mean) ** 2, axis=(0, 3), keepdims=True)
        xhat = (out4 - mean) * jax.lax.rsqrt(var + BN_EPS)
        y = xhat * g_r[...] + be_r[...]               # gamma/beta: (V, 1)
        return jnp.maximum(y, 0.0).reshape(X, V, fout)

    h = layer(h, w1_ref, b1_ref, g1_ref, be1_ref)
    h = layer(h, w2_ref, b2_ref, g2_ref, be2_ref)
    h = layer(h, w3_ref, b3_ref, g3_ref, be3_ref)
    h = layer(h, w4_ref, b4_ref, g4_ref, be4_ref)     # (X, V, 1)
    o_ref[...] = h.reshape(B, Sc, V, 1)


def dyconv_chain(x, c, adj, layers):
    B, S, V, xf = x.shape
    cf = c.shape[-1]
    ns = 2 if S % 2 == 0 else 1          # >=2 parallel grid steps (v7x: 2 TCs)
    sc = S // ns

    w_args, w_specs = [], []
    for p in layers:
        for a in (p['w'], p['b'], p['gamma'], p['beta']):
            w_args.append(a)
            w_specs.append(_const_spec(a.shape))

    return pl.pallas_call(
        dyconv_chain_kernel,
        out_shape=jax.ShapeDtypeStruct((B, S, V, 1), jnp.float32),
        grid=(ns,),
        in_specs=[
            pl.BlockSpec((B, sc, V, xf), lambda i: (0, i, 0, 0)),
            pl.BlockSpec((B, sc, V, cf), lambda i: (0, i, 0, 0)),
            pl.BlockSpec((B, sc, V, V), lambda i: (0, i, 0, 0)),
            *w_specs,
        ],
        out_specs=pl.BlockSpec((B, sc, V, 1), lambda i: (0, i, 0, 0)),
        compiler_params=pltpu.CompilerParams(
            dimension_semantics=("parallel",)),
    )(x, c, adj, *w_args)


# ==========================================================================
# Kernel B: fused Building_Block x num_block + final Norm + Linear(1->1) + tanh
#   grid over batch ("parallel"); block weights stacked on a leading axis and
#   VMEM-resident; all-heads attention via batched einsums (weights pre-split
#   per head in the wrapper, so no lane slicing / concatenate in-kernel).
# ==========================================================================
def transformer_stack_kernel(num_block, heads,
                             x_ref,
                             n1a_ref, n1b_ref, wqkv_ref, bqkv_ref, wo_ref, bo_ref,
                             w1_ref, b1_ref, w2_ref, b2_ref, n2a_ref, n2b_ref,
                             fna_ref, fnb_ref, lw_ref, lb_ref,
                             o_ref):
    x = x_ref[0]                          # (S, D)
    S, D = x.shape
    dk = D // heads
    scale = 1.0 / math.sqrt(dk)

    def norm(v, a, b):
        # torch Norm: alpha*(v-mean)/(std_unbiased+eps)+beta   (requires D>=2)
        mean = jnp.mean(v, axis=-1, keepdims=True)
        vm = v - mean
        var = jnp.sum(vm * vm, axis=-1, keepdims=True) * (1.0 / (D - 1))
        inv = pl.reciprocal(jnp.sqrt(var) + NORM_EPS, approx=True)
        return a * vm * inv + b

    for blk in range(num_block):          # static unrolled block loop
        # ---- attention branch (pre-norm, residual) ----
        x2 = norm(x, n1a_ref[blk], n1b_ref[blk])
        x2b = jnp.broadcast_to(x2[None], (3 * heads, S, D))
        # fused Q|K|V projection, head-major: (3H, S, dk)
        qkv = jnp.einsum('hsd,hde->hse', x2b, wqkv_ref[blk],
                         preferred_element_type=jnp.float32) + bqkv_ref[blk]
        q = qkv[:heads]
        k = qkv[heads:2 * heads]
        v = qkv[2 * heads:]
        scores = jnp.einsum('hqe,hke->hqk', q, k,
                            preferred_element_type=jnp.float32) * scale
        scores = scores - jnp.max(scores, axis=-1, keepdims=True)
        e = jnp.exp(scores)
        p = e * pl.reciprocal(jnp.sum(e, axis=-1, keepdims=True), approx=True)
        attn = jnp.einsum('hqk,hke->hqe', p, v,
                          preferred_element_type=jnp.float32)        # (H,S,dk)
        proj = jnp.einsum('hse,hed->hsd', attn, wo_ref[blk],
                          preferred_element_type=jnp.float32)        # (H,S,D)
        x = x + jnp.sum(proj, axis=0) + bo_ref[blk]

        # ---- feed-forward branch (pre-norm, residual) ----
        x2 = norm(x, n2a_ref[blk], n2b_ref[blk])
        h1 = jnp.maximum(
            jnp.dot(x2, w1_ref[blk], preferred_element_type=jnp.float32)
            + b1_ref[blk], 0.0)
        x = x + jnp.dot(h1, w2_ref[blk],
                        preferred_element_type=jnp.float32) + b2_ref[blk]

    # ---- final Norm + Linear(1 -> final_features=1) + tanh ----
    y = norm(x, fna_ref[...], fnb_ref[...])
    o_ref[...] = jnp.tanh(y * lw_ref[...] + lb_ref[...])[None]


def transformer_stack(x, blocks, norm_alpha, norm_beta, lin_w, lin_b, *, num_heads):
    B, S, D = x.shape
    assert D >= 2, "Norm uses the unbiased std: embed_dim must be >= 2"
    num_block = blocks['wqkv'].shape[0]
    names = ('n1a', 'n1b', 'wqkv', 'bqkv', 'wo', 'bo',
             'ffw1', 'ffb1', 'ffw2', 'ffb2', 'n2a', 'n2b')
    w_args = [blocks[n] for n in names] + [norm_alpha, norm_beta, lin_w, lin_b]
    w_specs = [_const_spec(a.shape) for a in w_args]

    kernel = functools.partial(transformer_stack_kernel, num_block, num_heads)
    return pl.pallas_call(
        kernel,
        out_shape=jax.ShapeDtypeStruct((B, S, D), jnp.float32),
        grid=(B,),
        in_specs=[pl.BlockSpec((1, S, D), lambda b: (b, 0, 0)), *w_specs],
        out_specs=pl.BlockSpec((1, S, D), lambda b: (b, 0, 0)),
        compiler_params=pltpu.CompilerParams(
            dimension_semantics=("parallel",)),
    )(x, *w_args)


# ==========================================================================
# Full Generator forward: 2 pallas_calls total (vs 8 before); the only XLA
# glue ops are degenerate-dim reshapes (layout bitcasts).
# ==========================================================================
def generator_forward(params, x, adj, c, *, num_heads):
    B, S, V, _ = x.shape
    h = dyconv_chain(x, c, adj, params['dyconv'])          # (B, S, V, 1)
    h = h.reshape(B, S, V)                                 # drop trailing 1
    y = transformer_stack(h, params['blocks'],
                          params['norm_alpha'], params['norm_beta'],
                          params['lin_w'], params['lin_b'],
                          num_heads=num_heads)             # (B, S, V)
    return y.reshape(B, S, V, 1)                           # final_features == 1


# ==========================================================================
# Deterministic parameter construction (shapes from Generator.__init__),
# laid out the way the fused kernels consume them.
# ==========================================================================
def init_params(key, input_features, hidden_features, final_features,
                num_block, num_variable, num_heads, d_ff=D_FF):
    D = num_variable * 1                     # Building_Block(hidden_features=1)
    H = num_heads
    dk = D // H
    ks = iter(jax.random.split(key, 8 * num_block + 16))

    def lin(k, fin, fout):
        bound = 1.0 / math.sqrt(fin)
        kw, kb = jax.random.split(k)
        return (jax.random.uniform(kw, (fin, fout), jnp.float32, -bound, bound),
                jax.random.uniform(kb, (fout,), jnp.float32, -bound, bound))

    def dyconv(k, fin, fout):
        stdv = 1.0 / math.sqrt(fout)
        kw, kb = jax.random.split(k)
        return {'w': jax.random.uniform(kw, (fin, fout), jnp.float32, -stdv, stdv),
                'b': jax.random.uniform(kb, (fout,), jnp.float32,
                                        -stdv, stdv).reshape(1, fout),
                'gamma': jnp.ones((num_variable, 1), jnp.float32),
                'beta': jnp.zeros((num_variable, 1), jnp.float32)}

    hf = hidden_features
    dc = [dyconv(next(ks), input_features, hf),
          dyconv(next(ks), hf, hf // 2),
          dyconv(next(ks), hf // 2, hf // 4),
          dyconv(next(ks), hf // 4, 1)]

    def heads_of(w):                         # (D, D) -> (H, D, dk) head-major
        return jnp.transpose(w.reshape(D, H, dk), (1, 0, 2))

    def hbias_of(b):                         # (D,) -> (H, 1, dk)
        return b.reshape(H, 1, dk)

    n1a, n1b, wqkv, bqkv, wo, bo = [], [], [], [], [], []
    fw1, fb1, fw2, fb2, n2a, n2b = [], [], [], [], [], []
    for _ in range(num_block):
        wq, bq = lin(next(ks), D, D)
        wk, bk = lin(next(ks), D, D)
        wv, bv = lin(next(ks), D, D)
        wo_, bo_ = lin(next(ks), D, D)
        w1, b1 = lin(next(ks), D, d_ff)
        w2, b2 = lin(next(ks), d_ff, D)
        wqkv.append(jnp.concatenate([heads_of(wq), heads_of(wk), heads_of(wv)], 0))
        bqkv.append(jnp.concatenate([hbias_of(bq), hbias_of(bk), hbias_of(bv)], 0))
        wo.append(wo_.reshape(H, dk, D))
        bo.append(bo_.reshape(1, D))
        fw1.append(w1); fb1.append(b1.reshape(1, d_ff))
        fw2.append(w2); fb2.append(b2.reshape(1, D))
        n1a.append(jnp.ones((1, D), jnp.float32))
        n1b.append(jnp.zeros((1, D), jnp.float32))
        n2a.append(jnp.ones((1, D), jnp.float32))
        n2b.append(jnp.zeros((1, D), jnp.float32))

    blocks = {
        'n1a': jnp.stack(n1a), 'n1b': jnp.stack(n1b),
        'wqkv': jnp.stack(wqkv), 'bqkv': jnp.stack(bqkv),
        'wo': jnp.stack(wo), 'bo': jnp.stack(bo),
        'ffw1': jnp.stack(fw1), 'ffb1': jnp.stack(fb1),
        'ffw2': jnp.stack(fw2), 'ffb2': jnp.stack(fb2),
        'n2a': jnp.stack(n2a), 'n2b': jnp.stack(n2b),
    }

    lw, lb = lin(next(ks), 1, final_features)
    return {
        'dyconv': dc,
        'blocks': blocks,
        'norm_alpha': jnp.ones((1, num_variable * final_features), jnp.float32),
        'norm_beta': jnp.zeros((1, num_variable * final_features), jnp.float32),
        'lin_w': lw.reshape(1, final_features),      # final_features == 1 -> (1,1)
        'lin_b': lb.reshape(1, final_features),
    }


if __name__ == "__main__":
    key = jax.random.PRNGKey(0)
    B, S, V = 2, 8, 8                 # batch, seq_len, num_variable
    xf, cf = 3, 1                     # x / condition feature widths
    input_features = xf + cf          # 4
    hidden_features = 8               # DyConv chain: 4 -> 8 -> 4 -> 2 -> 1
    final_features = 1                # required for BN/Norm shape consistency
    num_heads, num_block = 2, 2

    k0, k1, k2, k3 = jax.random.split(key, 4)
    x = jax.random.normal(k0, (B, S, V, xf), jnp.float32)
    c = jax.random.normal(k1, (B, S, V, cf), jnp.float32)
    adj = jax.random.uniform(k2, (B, S, V, V), jnp.float32)

    params = init_params(k3, input_features, hidden_features, final_features,
                         num_block, V, num_heads)

    fwd = jax.jit(functools.partial(generator_forward, num_heads=num_heads))
    out = jax.block_until_ready(fwd(params, x, adj, c))

    assert out.shape == (B, S, V, final_features)
    assert bool(jnp.all(jnp.isfinite(out)))
    assert bool(jnp.all(jnp.abs(out) <= 1.0))   # tanh output range
    print("KERNEL_OK")
</pallas_src>

<mosaic_0001>
module attributes {stable_mosaic.version = 11 : i64} {
  func.func @dyconv_chain_kernel(%arg0: i32, %arg1: memref<2x4x8x3xf32, #tpu.memory_space<vmem>>, %arg2: memref<2x4x8x1xf32, #tpu.memory_space<vmem>>, %arg3: memref<2x4x8x8xf32, #tpu.memory_space<vmem>>, %arg4: memref<4x8xf32, #tpu.memory_space<vmem>>, %arg5: memref<1x8xf32, #tpu.memory_space<vmem>>, %arg6: memref<8x1xf32, #tpu.memory_space<vmem>>, %arg7: memref<8x1xf32, #tpu.memory_space<vmem>>, %arg8: memref<8x4xf32, #tpu.memory_space<vmem>>, %arg9: memref<1x4xf32, #tpu.memory_space<vmem>>, %arg10: memref<8x1xf32, #tpu.memory_space<vmem>>, %arg11: memref<8x1xf32, #tpu.memory_space<vmem>>, %arg12: memref<4x2xf32, #tpu.memory_space<vmem>>, %arg13: memref<1x2xf32, #tpu.memory_space<vmem>>, %arg14: memref<8x1xf32, #tpu.memory_space<vmem>>, %arg15: memref<8x1xf32, #tpu.memory_space<vmem>>, %arg16: memref<2x1xf32, #tpu.memory_space<vmem>>, %arg17: memref<1x1xf32, #tpu.memory_space<vmem>>, %arg18: memref<8x1xf32, #tpu.memory_space<vmem>>, %arg19: memref<8x1xf32, #tpu.memory_space<vmem>>, %arg20: memref<2x4x8x1xf32, #tpu.memory_space<vmem>>) attributes {dimension_semantics = [#tpu.dimension_semantics<parallel>], iteration_bounds = array<i64: 2>, scalar_prefetch = 0 : i64, scratch_operands = 0 : i64, tpu.core_type = #tpu.core_type<tc>, window_params = [{transform_indices = @transform_0, window_bounds = array<i64: 2, 4, 8, 3>}, {transform_indices = @transform_1, window_bounds = array<i64: 2, 4, 8, 1>}, {transform_indices = @transform_2, window_bounds = array<i64: 2, 4, 8, 8>}, {pipeline_mode = #tpu.pipeline_mode<synchronous>, transform_indices = @transform_3, window_bounds = array<i64: 4, 8>}, {pipeline_mode = #tpu.pipeline_mode<synchronous>, transform_indices = @transform_4, window_bounds = array<i64: 1, 8>}, {pipeline_mode = #tpu.pipeline_mode<synchronous>, transform_indices = @transform_5, window_bounds = array<i64: 8, 1>}, {pipeline_mode = #tpu.pipeline_mode<synchronous>, transform_indices = @transform_6, window_bounds = array<i64: 8, 1>}, {pipeline_mode = #tpu.pipeline_mode<synchronous>, transform_indices = @transform_7, window_bounds = array<i64: 8, 4>}, {pipeline_mode = #tpu.pipeline_mode<synchronous>, transform_indices = @transform_8, window_bounds = array<i64: 1, 4>}, {pipeline_mode = #tpu.pipeline_mode<synchronous>, transform_indices = @transform_9, window_bounds = array<i64: 8, 1>}, {pipeline_mode = #tpu.pipeline_mode<synchronous>, transform_indices = @transform_10, window_bounds = array<i64: 8, 1>}, {pipeline_mode = #tpu.pipeline_mode<synchronous>, transform_indices = @transform_11, window_bounds = array<i64: 4, 2>}, {pipeline_mode = #tpu.pipeline_mode<synchronous>, transform_indices = @transform_12, window_bounds = array<i64: 1, 2>}, {pipeline_mode = #tpu.pipeline_mode<synchronous>, transform_indices = @transform_13, window_bounds = array<i64: 8, 1>}, {pipeline_mode = #tpu.pipeline_mode<synchronous>, transform_indices = @transform_14, window_bounds = array<i64: 8, 1>}, {pipeline_mode = #tpu.pipeline_mode<synchronous>, transform_indices = @transform_15, window_bounds = array<i64: 2, 1>}, {pipeline_mode = #tpu.pipeline_mode<synchronous>, transform_indices = @transform_16, window_bounds = array<i64: 1, 1>}, {pipeline_mode = #tpu.pipeline_mode<synchronous>, transform_indices = @transform_17, window_bounds = array<i64: 8, 1>}, {pipeline_mode = #tpu.pipeline_mode<synchronous>, transform_indices = @transform_18, window_bounds = array<i64: 8, 1>}, {transform_indices = @transform_19, window_bounds = array<i64: 2, 4, 8, 1>}]} {
    %c0 = arith.constant 0 : index
    %c0_0 = arith.constant 0 : index
    %c0_1 = arith.constant 0 : index
    %c0_2 = arith.constant 0 : index
    %0 = vector.load %arg1[%c0, %c0_0, %c0_1, %c0_2] : memref<2x4x8x3xf32, #tpu.memory_space<vmem>>, vector<2x4x8x3xf32>
    %1 = vector.shape_cast %0 : vector<2x4x8x3xf32> to vector<8x8x3xf32>
    %c0_3 = arith.constant 0 : index
    %c0_4 = arith.constant 0 : index
    %c0_5 = arith.constant 0 : index
    %c0_6 = arith.constant 0 : index
    %2 = vector.load %arg2[%c0_3, %c0_4, %c0_5, %c0_6] : memref<2x4x8x1xf32, #tpu.memory_space<vmem>>, vector<2x4x8x1xf32>
    %3 = vector.shape_cast %2 : vector<2x4x8x1xf32> to vector<8x8x1xf32>
    %c0_7 = arith.constant 0 : index
    %c0_8 = arith.constant 0 : index
    %c0_9 = arith.constant 0 : index
    %c0_10 = arith.constant 0 : index
    %4 = vector.load %arg3[%c0_7, %c0_8, %c0_9, %c0_10] : memref<2x4x8x8xf32, #tpu.memory_space<vmem>>, vector<2x4x8x8xf32>
    %5 = vector.shape_cast %4 : vector<2x4x8x8xf32> to vector<8x8x8xf32>
    %6 = tpu.concatenate %1, %3 in 2 : vector<8x8x3xf32>, vector<8x8x1xf32> -> vector<8x8x4xf32>
    %c0_11 = arith.constant 0 : index
    %c0_12 = arith.constant 0 : index
    %7 = vector.load %arg4[%c0_11, %c0_12] : memref<4x8xf32, #tpu.memory_space<vmem>>, vector<4x8xf32>
    "tpu.trace_start"() <{level = 10 : i32, message = "bvf,fo->bvo"}> : () -> ()
    %cst = arith.constant dense<0.000000e+00> : vector<8x8x8xf32>
    %8 = tpu.matmul %6, %7, %cst {dimension_numbers = #tpu.dot_dimension_numbers<[2], [0], [0, 1], [1], [0, 0, 0, 1, 1, 1], [], []>} : vector<8x8x4xf32>, vector<4x8xf32>, vector<8x8x8xf32> -> vector<8x8x8xf32>
    "tpu.trace_stop"() : () -> ()
    "tpu.trace_start"() <{level = 10 : i32, message = "bvw,bwo->bvo"}> : () -> ()
    %cst_13 = arith.constant dense<0.000000e+00> : vector<8x8x8xf32>
    %9 = tpu.matmul %5, %8, %cst_13 {dimension_numbers = #tpu.dot_dimension_numbers<[2], [1], [1], [2], [0, 0, 0, 1, 1, 2], [0], [0]>} : vector<8x8x8xf32>, vector<8x8x8xf32>, vector<8x8x8xf32> -> vector<8x8x8xf32>
    "tpu.trace_stop"() : () -> ()
    %c0_14 = arith.constant 0 : index
    %c0_15 = arith.constant 0 : index
    %10 = vector.load %arg5[%c0_14, %c0_15] : memref<1x8xf32, #tpu.memory_space<vmem>>, vector<1x8xf32>
    %11 = vector.shape_cast %10 : vector<1x8xf32> to vector<1x1x8xf32>
    %12 = vector.broadcast %11 : vector<1x1x8xf32> to vector<8x8x8xf32>
    %13 = arith.addf %9, %12 : vector<8x8x8xf32>
    %14 = vector.shape_cast %13 : vector<8x8x8xf32> to vector<2x4x8x8xf32>
    %cst_16 = arith.constant dense<0.000000e+00> : vector<4x8xf32>
    %15 = vector.multi_reduction <add>, %14, %cst_16 [0, 3] : vector<2x4x8x8xf32> to vector<4x8xf32>
    %16 = vector.shape_cast %15 : vector<4x8xf32> to vector<1x4x8x1xf32>
    %cst_17 = arith.constant 1.600000e+01 : f32
    %17 = vector.broadcast %cst_17 : f32 to vector<1x4x8x1xf32>
    %18 = arith.divf %16, %17 : vector<1x4x8x1xf32>
    %19 = vector.broadcast %18 : vector<1x4x8x1xf32> to vector<2x4x8x8xf32>
    %20 = arith.subf %14, %19 : vector<2x4x8x8xf32>
    %21 = arith.mulf %20, %20 : vector<2x4x8x8xf32>
    %cst_18 = arith.constant dense<0.000000e+00> : vector<4x8xf32>
    %22 = vector.multi_reduction <add>, %21, %cst_18 [0, 3] : vector<2x4x8x8xf32> to vector<4x8xf32>
    %23 = vector.shape_cast %22 : vector<4x8xf32> to vector<1x4x8x1xf32>
    %cst_19 = arith.constant 1.600000e+01 : f32
    %24 = vector.broadcast %cst_19 : f32 to vector<1x4x8x1xf32>
    %25 = arith.divf %23, %24 : vector<1x4x8x1xf32>
    %26 = vector.broadcast %18 : vector<1x4x8x1xf32> to vector<2x4x8x8xf32>
    %27 = arith.subf %14, %26 : vector<2x4x8x8xf32>
    %cst_20 = arith.constant 9.99999974E-6 : f32
    %28 = vector.broadcast %cst_20 : f32 to vector<1x4x8x1xf32>
    %29 = arith.addf %25, %28 : vector<1x4x8x1xf32>
    %30 = math.rsqrt %29 : vector<1x4x8x1xf32>
    %31 = vector.broadcast %30 : vector<1x4x8x1xf32> to vector<2x4x8x8xf32>
    %32 = arith.mulf %27, %31 : vector<2x4x8x8xf32>
    %c0_21 = arith.constant 0 : index
    %c0_22 = arith.constant 0 : index
    %33 = vector.load %arg6[%c0_21, %c0_22] : memref<8x1xf32, #tpu.memory_space<vmem>>, vector<8x1xf32>
    %34 = vector.shape_cast %33 : vector<8x1xf32> to vector<1x1x8x1xf32>
    %35 = vector.broadcast %34 : vector<1x1x8x1xf32> to vector<2x4x8x8xf32>
    %36 = arith.mulf %32, %35 : vector<2x4x8x8xf32>
    %c0_23 = arith.constant 0 : index
    %c0_24 = arith.constant 0 : index
    %37 = vector.load %arg7[%c0_23, %c0_24] : memref<8x1xf32, #tpu.memory_space<vmem>>, vector<8x1xf32>
    %38 = vector.shape_cast %37 : vector<8x1xf32> to vector<1x1x8x1xf32>
    %39 = vector.broadcast %38 : vector<1x1x8x1xf32> to vector<2x4x8x8xf32>
    %40 = arith.addf %36, %39 : vector<2x4x8x8xf32>
    %cst_25 = arith.constant 0.000000e+00 : f32
    %41 = vector.broadcast %cst_25 : f32 to vector<2x4x8x8xf32>
    %42 = arith.maximumf %40, %41 : vector<2x4x8x8xf32>
    %43 = vector.shape_cast %42 : vector<2x4x8x8xf32> to vector<8x8x8xf32>
    %c0_26 = arith.constant 0 : index
    %c0_27 = arith.constant 0 : index
    %44 = vector.load %arg8[%c0_26, %c0_27] : memref<8x4xf32, #tpu.memory_space<vmem>>, vector<8x4xf32>
    "tpu.trace_start"() <{level = 10 : i32, message = "bvf,fo->bvo"}> : () -> ()
    %cst_28 = arith.constant dense<0.000000e+00> : vector<8x8x4xf32>
    %45 = tpu.matmul %43, %44, %cst_28 {dimension_numbers = #tpu.dot_dimension_numbers<[2], [0], [0, 1], [1], [0, 0, 0, 1, 1, 1], [], []>} : vector<8x8x8xf32>, vector<8x4xf32>, vector<8x8x4xf32> -> vector<8x8x4xf32>
    "tpu.trace_stop"() : () -> ()
    "tpu.trace_start"() <{level = 10 : i32, message = "bvw,bwo->bvo"}> : () -> ()
    %cst_29 = arith.constant dense<0.000000e+00> : vector<8x8x4xf32>
    %46 = tpu.matmul %5, %45, %cst_29 {dimension_numbers = #tpu.dot_dimension_numbers<[2], [1], [1], [2], [0, 0, 0, 1, 1, 2], [0], [0]>} : vector<8x8x8xf32>, vector<8x8x4xf32>, vector<8x8x4xf32> -> vector<8x8x4xf32>
    "tpu.trace_stop"() : () -> ()
    %c0_30 = arith.constant 0 : index
    %c0_31 = arith.constant 0 : index
    %47 = vector.load %arg9[%c0_30, %c0_31] : memref<1x4xf32, #tpu.memory_space<vmem>>, vector<1x4xf32>
    %48 = vector.shape_cast %47 : vector<1x4xf32> to vector<1x1x4xf32>
    %49 = vector.broadcast %48 : vector<1x1x4xf32> to vector<8x8x4xf32>
    %50 = arith.addf %46, %49 : vector<8x8x4xf32>
    %51 = vector.shape_cast %50 : vector<8x8x4xf32> to vector<2x4x8x4xf32>
    %cst_32 = arith.constant dense<0.000000e+00> : vector<4x8xf32>
    %52 = vector.multi_reduction <add>, %51, %cst_32 [0, 3] : vector<2x4x8x4xf32> to vector<4x8xf32>
    %53 = vector.shape_cast %52 : vector<4x8xf32> to vector<1x4x8x1xf32>
    %cst_33 = arith.constant 8.000000e+00 : f32
    %54 = vector.broadcast %cst_33 : f32 to vector<1x4x8x1xf32>
    %55 = arith.divf %53, %54 : vector<1x4x8x1xf32>
    %56 = vector.broadcast %55 : vector<1x4x8x1xf32> to vector<2x4x8x4xf32>
    %57 = arith.subf %51, %56 : vector<2x4x8x4xf32>
    %58 = arith.mulf %57, %57 : vector<2x4x8x4xf32>
    %cst_34 = arith.constant dense<0.000000e+00> : vector<4x8xf32>
    %59 = vector.multi_reduction <add>, %58, %cst_34 [0, 3] : vector<2x4x8x4xf32> to vector<4x8xf32>
    %60 = vector.shape_cast %59 : vector<4x8xf32> to vector<1x4x8x1xf32>
    %cst_35 = arith.constant 8.000000e+00 : f32
    %61 = vector.broadcast %cst_35 : f32 to vector<1x4x8x1xf32>
    %62 = arith.divf %60, %61 : vector<1x4x8x1xf32>
    %63 = vector.broadcast %55 : vector<1x4x8x1xf32> to vector<2x4x8x4xf32>
    %64 = arith.subf %51, %63 : vector<2x4x8x4xf32>
    %cst_36 = arith.constant 9.99999974E-6 : f32
    %65 = vector.broadcast %cst_36 : f32 to vector<1x4x8x1xf32>
    %66 = arith.addf %62, %65 : vector<1x4x8x1xf32>
    %67 = math.rsqrt %66 : vector<1x4x8x1xf32>
    %68 = vector.broadcast %67 : vector<1x4x8x1xf32> to vector<2x4x8x4xf32>
    %69 = arith.mulf %64, %68 : vector<2x4x8x4xf32>
    %c0_37 = arith.constant 0 : index
    %c0_38 = arith.constant 0 : index
    %70 = vector.load %arg10[%c0_37, %c0_38] : memref<8x1xf32, #tpu.memory_space<vmem>>, vector<8x1xf32>
    %71 = vector.shape_cast %70 : vector<8x1xf32> to vector<1x1x8x1xf32>
    %72 = vector.broadcast %71 : vector<1x1x8x1xf32> to vector<2x4x8x4xf32>
    %73 = arith.mulf %69, %72 : vector<2x4x8x4xf32>
    %c0_39 = arith.constant 0 : index
    %c0_40 = arith.constant 0 : index
    %74 = vector.load %arg11[%c0_39, %c0_40] : memref<8x1xf32, #tpu.memory_space<vmem>>, vector<8x1xf32>
    %75 = vector.shape_cast %74 : vector<8x1xf32> to vector<1x1x8x1xf32>
    %76 = vector.broadcast %75 : vector<1x1x8x1xf32> to vector<2x4x8x4xf32>
    %77 = arith.addf %73, %76 : vector<2x4x8x4xf32>
    %cst_41 = arith.constant 0.000000e+00 : f32
    %78 = vector.broadcast %cst_41 : f32 to vector<2x4x8x4xf32>
    %79 = arith.maximumf %77, %78 : vector<2x4x8x4xf32>
    %80 = vector.shape_cast %79 : vector<2x4x8x4xf32> to vector<8x8x4xf32>
    %c0_42 = arith.constant 0 : index
    %c0_43 = arith.constant 0 : index
    %81 = vector.load %arg12[%c0_42, %c0_43] : memref<4x2xf32, #tpu.memory_space<vmem>>, vector<4x2xf32>
    "tpu.trace_start"() <{level = 10 : i32, message = "bvf,fo->bvo"}> : () -> ()
    %cst_44 = arith.constant dense<0.000000e+00> : vector<8x8x2xf32>
    %82 = tpu.matmul %80, %81, %cst_44 {dimension_numbers = #tpu.dot_dimension_numbers<[2], [0], [0, 1], [1], [0, 0, 0, 1, 1, 1], [], []>} : vector<8x8x4xf32>, vector<4x2xf32>, vector<8x8x2xf32> -> vector<8x8x2xf32>
    "tpu.trace_stop"() : () -> ()
    "tpu.trace_start"() <{level = 10 : i32, message = "bvw,bwo->bvo"}> : () -> ()
    %cst_45 = arith.constant dense<0.000000e+00> : vector<8x8x2xf32>
    %83 = tpu.matmul %5, %82, %cst_45 {dimension_numbers = #tpu.dot_dimension_numbers<[2], [1], [1], [2], [0, 0, 0, 1, 1, 2], [0], [0]>} : vector<8x8x8xf32>, vector<8x8x2xf32>, vector<8x8x2xf32> -> vector<8x8x2xf32>
    "tpu.trace_stop"() : () -> ()
    %c0_46 = arith.constant 0 : index
    %c0_47 = arith.constant 0 : index
    %84 = vector.load %arg13[%c0_46, %c0_47] : memref<1x2xf32, #tpu.memory_space<vmem>>, vector<1x2xf32>
    %85 = vector.shape_cast %84 : vector<1x2xf32> to vector<1x1x2xf32>
    %86 = vector.broadcast %85 : vector<1x1x2xf32> to vector<8x8x2xf32>
    %87 = arith.addf %83, %86 : vector<8x8x2xf32>
    %88 = vector.shape_cast %87 : vector<8x8x2xf32> to vector<2x4x8x2xf32>
    %cst_48 = arith.constant dense<0.000000e+00> : vector<4x8xf32>
    %89 = vector.multi_reduction <add>, %88, %cst_48 [0, 3] : vector<2x4x8x2xf32> to vector<4x8xf32>
    %90 = vector.shape_cast %89 : vector<4x8xf32> to vector<1x4x8x1xf32>
    %cst_49 = arith.constant 4.000000e+00 : f32
    %91 = vector.broadcast %cst_49 : f32 to vector<1x4x8x1xf32>
    %92 = arith.divf %90, %91 : vector<1x4x8x1xf32>
    %93 = vector.broadcast %92 : vector<1x4x8x1xf32> to vector<2x4x8x2xf32>
    %94 = arith.subf %88, %93 : vector<2x4x8x2xf32>
    %95 = arith.mulf %94, %94 : vector<2x4x8x2xf32>
    %cst_50 = arith.constant dense<0.000000e+00> : vector<4x8xf32>
    %96 = vector.multi_reduction <add>, %95, %cst_50 [0, 3] : vector<2x4x8x2xf32> to vector<4x8xf32>
    %97 = vector.shape_cast %96 : vector<4x8xf32> to vector<1x4x8x1xf32>
    %cst_51 = arith.constant 4.000000e+00 : f32
    %98 = vector.broadcast %cst_51 : f32 to vector<1x4x8x1xf32>
    %99 = arith.divf %97, %98 : vector<1x4x8x1xf32>
    %100 = vector.broadcast %92 : vector<1x4x8x1xf32> to vector<2x4x8x2xf32>
    %101 = arith.subf %88, %100 : vector<2x4x8x2xf32>
    %cst_52 = arith.constant 9.99999974E-6 : f32
    %102 = vector.broadcast %cst_52 : f32 to vector<1x4x8x1xf32>
    %103 = arith.addf %99, %102 : vector<1x4x8x1xf32>
    %104 = math.rsqrt %103 : vector<1x4x8x1xf32>
    %105 = vector.broadcast %104 : vector<1x4x8x1xf32> to vector<2x4x8x2xf32>
    %106 = arith.mulf %101, %105 : vector<2x4x8x2xf32>
    %c0_53 = arith.constant 0 : index
    %c0_54 = arith.constant 0 : index
    %107 = vector.load %arg14[%c0_53, %c0_54] : memref<8x1xf32, #tpu.memory_space<vmem>>, vector<8x1xf32>
    %108 = vector.shape_cast %107 : vector<8x1xf32> to vector<1x1x8x1xf32>
    %109 = vector.broadcast %108 : vector<1x1x8x1xf32> to vector<2x4x8x2xf32>
    %110 = arith.mulf %106, %109 : vector<2x4x8x2xf32>
    %c0_55 = arith.constant 0 : index
    %c0_56 = arith.constant 0 : index
    %111 = vector.load %arg15[%c0_55, %c0_56] : memref<8x1xf32, #tpu.memory_space<vmem>>, vector<8x1xf32>
    %112 = vector.shape_cast %111 : vector<8x1xf32> to vector<1x1x8x1xf32>
    %113 = vector.broadcast %112 : vector<1x1x8x1xf32> to vector<2x4x8x2xf32>
    %114 = arith.addf %110, %113 : vector<2x4x8x2xf32>
    %cst_57 = arith.constant 0.000000e+00 : f32
    %115 = vector.broadcast %cst_57 : f32 to vector<2x4x8x2xf32>
    %116 = arith.maximumf %114, %115 : vector<2x4x8x2xf32>
    %117 = vector.shape_cast %116 : vector<2x4x8x2xf32> to vector<8x8x2xf32>
    %c0_58 = arith.constant 0 : index
    %c0_59 = arith.constant 0 : index
    %118 = vector.load %arg16[%c0_58, %c0_59] : memref<2x1xf32, #tpu.memory_space<vmem>>, vector<2x1xf32>
    "tpu.trace_start"() <{level = 10 : i32, message = "bvf,fo->bvo"}> : () -> ()
    %cst_60 = arith.constant dense<0.000000e+00> : vector<8x8x1xf32>
    %119 = tpu.matmul %117, %118, %cst_60 {dimension_numbers = #tpu.dot_dimension_numbers<[2], [0], [0, 1], [1], [0, 0, 0, 1, 1, 1], [], []>} : vector<8x8x2xf32>, vector<2x1xf32>, vector<8x8x1xf32> -> vector<8x8x1xf32>
    "tpu.trace_stop"() : () -> ()
    "tpu.trace_start"() <{level = 10 : i32, message = "bvw,bwo->bvo"}> : () -> ()
    %cst_61 = arith.constant dense<0.000000e+00> : vector<8x8x1xf32>
    %120 = tpu.matmul %5, %119, %cst_61 {dimension_numbers = #tpu.dot_dimension_numbers<[2], [1], [1], [2], [0, 0, 0, 1, 1, 2], [0], [0]>} : vector<8x8x8xf32>, vector<8x8x1xf32>, vector<8x8x1xf32> -> vector<8x8x1xf32>
    "tpu.trace_stop"() : () -> ()
    %c0_62 = arith.constant 0 : index
    %c0_63 = arith.constant 0 : index
    %121 = vector.load %arg17[%c0_62, %c0_63] : memref<1x1xf32, #tpu.memory_space<vmem>>, vector<1x1xf32>
    %122 = vector.shape_cast %121 : vector<1x1xf32> to vector<1x1x1xf32>
    %123 = vector.broadcast %122 : vector<1x1x1xf32> to vector<8x8x1xf32>
    %124 = arith.addf %120, %123 : vector<8x8x1xf32>
    %125 = vector.shape_cast %124 : vector<8x8x1xf32> to vector<2x4x8x1xf32>
    %cst_64 = arith.constant dense<0.000000e+00> : vector<4x8xf32>
    %126 = vector.multi_reduction <add>, %125, %cst_64 [0, 3] : vector<2x4x8x1xf32> to vector<4x8xf32>
    %127 = vector.shape_cast %126 : vector<4x8xf32> to vector<1x4x8x1xf32>
    %cst_65 = arith.constant 2.000000e+00 : f32
    %128 = vector.broadcast %cst_65 : f32 to vector<1x4x8x1xf32>
    %129 = arith.divf %127, %128 : vector<1x4x8x1xf32>
    %130 = vector.broadcast %129 : vector<1x4x8x1xf32> to vector<2x4x8x1xf32>
    %131 = arith.subf %125, %130 : vector<2x4x8x1xf32>
    %132 = arith.mulf %131, %131 : vector<2x4x8x1xf32>
    %cst_66 = arith.constant dense<0.000000e+00> : vector<4x8xf32>
    %133 = vector.multi_reduction <add>, %132, %cst_66 [0, 3] : vector<2x4x8x1xf32> to vector<4x8xf32>
    %134 = vector.shape_cast %133 : vector<4x8xf32> to vector<1x4x8x1xf32>
    %cst_67 = arith.constant 2.000000e+00 : f32
    %135 = vector.broadcast %cst_67 : f32 to vector<1x4x8x1xf32>
    %136 = arith.divf %134, %135 : vector<1x4x8x1xf32>
    %137 = vector.broadcast %129 : vector<1x4x8x1xf32> to vector<2x4x8x1xf32>
    %138 = arith.subf %125, %137 : vector<2x4x8x1xf32>
    %cst_68 = arith.constant 9.99999974E-6 : f32
    %139 = vector.broadcast %cst_68 : f32 to vector<1x4x8x1xf32>
    %140 = arith.addf %136, %139 : vector<1x4x8x1xf32>
    %141 = math.rsqrt %140 : vector<1x4x8x1xf32>
    %142 = vector.broadcast %141 : vector<1x4x8x1xf32> to vector<2x4x8x1xf32>
    %143 = arith.mulf %138, %142 : vector<2x4x8x1xf32>
    %c0_69 = arith.constant 0 : index
    %c0_70 = arith.constant 0 : index
    %144 = vector.load %arg18[%c0_69, %c0_70] : memref<8x1xf32, #tpu.memory_space<vmem>>, vector<8x1xf32>
    %145 = vector.shape_cast %144 : vector<8x1xf32> to vector<1x1x8x1xf32>
    %146 = vector.broadcast %145 : vector<1x1x8x1xf32> to vector<2x4x8x1xf32>
    %147 = arith.mulf %143, %146 : vector<2x4x8x1xf32>
    %c0_71 = arith.constant 0 : index
    %c0_72 = arith.constant 0 : index
    %148 = vector.load %arg19[%c0_71, %c0_72] : memref<8x1xf32, #tpu.memory_space<vmem>>, vector<8x1xf32>
    %149 = vector.shape_cast %148 : vector<8x1xf32> to vector<1x1x8x1xf32>
    %150 = vector.broadcast %149 : vector<1x1x8x1xf32> to vector<2x4x8x1xf32>
    %151 = arith.addf %147, %150 : vector<2x4x8x1xf32>
    %cst_73 = arith.constant 0.000000e+00 : f32
    %152 = vector.broadcast %cst_73 : f32 to vector<2x4x8x1xf32>
    %153 = arith.maximumf %151, %152 : vector<2x4x8x1xf32>
    %154 = vector.shape_cast %153 : vector<2x4x8x1xf32> to vector<8x8x1xf32>
    %155 = vector.shape_cast %154 : vector<8x8x1xf32> to vector<2x4x8x1xf32>
    %c0_74 = arith.constant 0 : index
    %c0_75 = arith.constant 0 : index
    %c0_76 = arith.constant 0 : index
    %c0_77 = arith.constant 0 : index
    %156 = vector.load %arg20[%c0_74, %c0_75, %c0_76, %c0_77] : memref<2x4x8x1xf32, #tpu.memory_space<vmem>>, vector<2x4x8x1xf32>
    tpu.vector_store %arg20[%c0_74, %c0_75, %c0_76, %c0_77], %155 {strides = array<i32>} : memref<2x4x8x1xf32, #tpu.memory_space<vmem>>, vector<2x4x8x1xf32>,
    return
  }
  func.func @transform_0(%arg0: i32) -> (i32, i32, i32, i32) {
    %c0_i32 = arith.constant 0 : i32
    %c0_i32_0 = arith.constant 0 : i32
    %c0_i32_1 = arith.constant 0 : i32
    %c0_i32_2 = arith.constant 0 : i32
    return %c0_i32, %arg0, %c0_i32_0, %c0_i32_1 : i32, i32, i32, i32
  }
  func.func @transform_1(%arg0: i32) -> (i32, i32, i32, i32) {
    %c0_i32 = arith.constant 0 : i32
    %c0_i32_0 = arith.constant 0 : i32
    %c0_i32_1 = arith.constant 0 : i32
    %c0_i32_2 = arith.constant 0 : i32
    return %c0_i32, %arg0, %c0_i32_0, %c0_i32_1 : i32, i32, i32, i32
  }
  func.func @transform_2(%arg0: i32) -> (i32, i32, i32, i32) {
    %c0_i32 = arith.constant 0 : i32
    %c0_i32_0 = arith.constant 0 : i32
    %c0_i32_1 = arith.constant 0 : i32
    %c0_i32_2 = arith.constant 0 : i32
    return %c0_i32, %arg0, %c0_i32_0, %c0_i32_1 : i32, i32, i32, i32
  }
  func.func @transform_3(%arg0: i32) -> (i32, i32) {
    %c0_i32 = arith.constant 0 : i32
    %c0_i32_0 = arith.constant 0 : i32
    %c0_i32_1 = arith.constant 0 : i32
    return %c0_i32, %c0_i32_0 : i32, i32
  }
  func.func @transform_4(%arg0: i32) -> (i32, i32) {
    %c0_i32 = arith.constant 0 : i32
    %c0_i32_0 = arith.constant 0 : i32
    %c0_i32_1 = arith.constant 0 : i32
    return %c0_i32, %c0_i32_0 : i32, i32
  }
  func.func @transform_5(%arg0: i32) -> (i32, i32) {
    %c0_i32 = arith.constant 0 : i32
    %c0_i32_0 = arith.constant 0 : i32
    %c0_i32_1 = arith.constant 0 : i32
    return %c0_i32, %c0_i32_0 : i32, i32
  }
  func.func @transform_6(%arg0: i32) -> (i32, i32) {
    %c0_i32 = arith.constant 0 : i32
    %c0_i32_0 = arith.constant 0 : i32
    %c0_i32_1 = arith.constant 0 : i32
    return %c0_i32, %c0_i32_0 : i32, i32
  }
  func.func @transform_7(%arg0: i32) -> (i32, i32) {
    %c0_i32 = arith.constant 0 : i32
    %c0_i32_0 = arith.constant 0 : i32
    %c0_i32_1 = arith.constant 0 : i32
    return %c0_i32, %c0_i32_0 : i32, i32
  }
  func.func @transform_8(%arg0: i32) -> (i32, i32) {
    %c0_i32 = arith.constant 0 : i32
    %c0_i32_0 = arith.constant 0 : i32
    %c0_i32_1 = arith.constant 0 : i32
    return %c0_i32, %c0_i32_0 : i32, i32
  }
  func.func @transform_9(%arg0: i32) -> (i32, i32) {
    %c0_i32 = arith.constant 0 : i32
    %c0_i32_0 = arith.constant 0 : i32
    %c0_i32_1 = arith.constant 0 : i32
    return %c0_i32, %c0_i32_0 : i32, i32
  }
  func.func @transform_10(%arg0: i32) -> (i32, i32) {
    %c0_i32 = arith.constant 0 : i32
    %c0_i32_0 = arith.constant 0 : i32
    %c0_i32_1 = arith.constant 0 : i32
    return %c0_i32, %c0_i32_0 : i32, i32
  }
  func.func @transform_11(%arg0: i32) -> (i32, i32) {
    %c0_i32 = arith.constant 0 : i32
    %c0_i32_0 = arith.constant 0 : i32
    %c0_i32_1 = arith.constant 0 : i32
    return %c0_i32, %c0_i32_0 : i32, i32
  }
  func.func @transform_12(%arg0: i32) -> (i32, i32) {
    %c0_i32 = arith.constant 0 : i32
    %c0_i32_0 = arith.constant 0 : i32
    %c0_i32_1 = arith.constant 0 : i32
    return %c0_i32, %c0_i32_0 : i32, i32
  }
  func.func @transform_13(%arg0: i32) -> (i32, i32) {
    %c0_i32 = arith.constant 0 : i32
    %c0_i32_0 = arith.constant 0 : i32
    %c0_i32_1 = arith.constant 0 : i32
    return %c0_i32, %c0_i32_0 : i32, i32
  }
  func.func @transform_14(%arg0: i32) -> (i32, i32) {
    %c0_i32 = arith.constant 0 : i32
    %c0_i32_0 = arith.constant 0 : i32
    %c0_i32_1 = arith.constant 0 : i32
    return %c0_i32, %c0_i32_0 : i32, i32
  }
  func.func @transform_15(%arg0: i32) -> (i32, i32) {
    %c0_i32 = arith.constant 0 : i32
    %c0_i32_0 = arith.constant 0 : i32
    %c0_i32_1 = arith.constant 0 : i32
    return %c0_i32, %c0_i32_0 : i32, i32
  }
  func.func @transform_16(%arg0: i32) -> (i32, i32) {
    %c0_i32 = arith.constant 0 : i32
    %c0_i32_0 = arith.constant 0 : i32
    %c0_i32_1 = arith.constant 0 : i32
    return %c0_i32, %c0_i32_0 : i32, i32
  }
  func.func @transform_17(%arg0: i32) -> (i32, i32) {
    %c0_i32 = arith.constant 0 : i32
    %c0_i32_0 = arith.constant 0 : i32
    %c0_i32_1 = arith.constant 0 : i32
    return %c0_i32, %c0_i32_0 : i32, i32
  }
  func.func @transform_18(%arg0: i32) -> (i32, i32) {
    %c0_i32 = arith.constant 0 : i32
    %c0_i32_0 = arith.constant 0 : i32
    %c0_i32_1 = arith.constant 0 : i32
    return %c0_i32, %c0_i32_0 : i32, i32
  }
  func.func @transform_19(%arg0: i32) -> (i32, i32, i32, i32) {
    %c0_i32 = arith.constant 0 : i32
    %c0_i32_0 = arith.constant 0 : i32
    %c0_i32_1 = arith.constant 0 : i32
    %c0_i32_2 = arith.constant 0 : i32
    return %c0_i32, %arg0, %c0_i32_0, %c0_i32_1 : i32, i32, i32, i32
  }
}

module attributes {stable_mosaic.version = 11 : i64} {
  func.func @transformer_stack_kernel(%arg0: i32, %arg1: memref<1x8x8xf32, #tpu.memory_space<vmem>>, %arg2: memref<2x1x8xf32, #tpu.memory_space<vmem>>, %arg3: memref<2x1x8xf32, #tpu.memory_space<vmem>>, %arg4: memref<2x6x8x4xf32, #tpu.memory_space<vmem>>, %arg5: memref<2x6x1x4xf32, #tpu.memory_space<vmem>>, %arg6: memref<2x2x4x8xf32, #tpu.memory_space<vmem>>, %arg7: memref<2x1x8xf32, #tpu.memory_space<vmem>>, %arg8: memref<2x8x2048xf32, #tpu.memory_space<vmem>>, %arg9: memref<2x1x2048xf32, #tpu.memory_space<vmem>>, %arg10: memref<2x2048x8xf32, #tpu.memory_space<vmem>>, %arg11: memref<2x1x8xf32, #tpu.memory_space<vmem>>, %arg12: memref<2x1x8xf32, #tpu.memory_space<vmem>>, %arg13: memref<2x1x8xf32, #tpu.memory_space<vmem>>, %arg14: memref<1x8xf32, #tpu.memory_space<vmem>>, %arg15: memref<1x8xf32, #tpu.memory_space<vmem>>, %arg16: memref<1x1xf32, #tpu.memory_space<vmem>>, %arg17: memref<1x1xf32, #tpu.memory_space<vmem>>, %arg18: memref<1x8x8xf32, #tpu.memory_space<vmem>>) attributes {dimension_semantics = [#tpu.dimension_semantics<parallel>], iteration_bounds = array<i64: 2>, scalar_prefetch = 0 : i64, scratch_operands = 0 : i64, tpu.core_type = #tpu.core_type<tc>, window_params = [{transform_indices = @transform_0, window_bounds = array<i64: 1, 8, 8>}, {pipeline_mode = #tpu.pipeline_mode<synchronous>, transform_indices = @transform_1, window_bounds = array<i64: 2, 1, 8>}, {pipeline_mode = #tpu.pipeline_mode<synchronous>, transform_indices = @transform_2, window_bounds = array<i64: 2, 1, 8>}, {pipeline_mode = #tpu.pipeline_mode<synchronous>, transform_indices = @transform_3, window_bounds = array<i64: 2, 6, 8, 4>}, {pipeline_mode = #tpu.pipeline_mode<synchronous>, transform_indices = @transform_4, window_bounds = array<i64: 2, 6, 1, 4>}, {pipeline_mode = #tpu.pipeline_mode<synchronous>, transform_indices = @transform_5, window_bounds = array<i64: 2, 2, 4, 8>}, {pipeline_mode = #tpu.pipeline_mode<synchronous>, transform_indices = @transform_6, window_bounds = array<i64: 2, 1, 8>}, {pipeline_mode = #tpu.pipeline_mode<synchronous>, transform_indices = @transform_7, window_bounds = array<i64: 2, 8, 2048>}, {pipeline_mode = #tpu.pipeline_mode<synchronous>, transform_indices = @transform_8, window_bounds = array<i64: 2, 1, 2048>}, {pipeline_mode = #tpu.pipeline_mode<synchronous>, transform_indices = @transform_9, window_bounds = array<i64: 2, 2048, 8>}, {pipeline_mode = #tpu.pipeline_mode<synchronous>, transform_indices = @transform_10, window_bounds = array<i64: 2, 1, 8>}, {pipeline_mode = #tpu.pipeline_mode<synchronous>, transform_indices = @transform_11, window_bounds = array<i64: 2, 1, 8>}, {pipeline_mode = #tpu.pipeline_mode<synchronous>, transform_indices = @transform_12, window_bounds = array<i64: 2, 1, 8>}, {pipeline_mode = #tpu.pipeline_mode<synchronous>, transform_indices = @transform_13, window_bounds = array<i64: 1, 8>}, {pipeline_mode = #tpu.pipeline_mode<synchronous>, transform_indices = @transform_14, window_bounds = array<i64: 1, 8>}, {pipeline_mode = #tpu.pipeline_mode<synchronous>, transform_indices = @transform_15, window_bounds = array<i64: 1, 1>}, {pipeline_mode = #tpu.pipeline_mode<synchronous>, transform_indices = @transform_16, window_bounds = array<i64: 1, 1>}, {transform_indices = @transform_17, window_bounds = array<i64: 1, 8, 8>}]} {
    %c0 = arith.constant 0 : index
    %c0_0 = arith.constant 0 : index
    %c0_1 = arith.constant 0 : index
    %0 = vector.load %arg1[%c0, %c0_0, %c0_1] : memref<1x8x8xf32, #tpu.memory_space<vmem>>, vector<1x8x8xf32>
    %1 = vector.shape_cast %0 : vector<1x8x8xf32> to vector<8x8xf32>
    %c0_2 = arith.constant 0 : index
    %c0_3 = arith.constant 0 : index
    %c0_4 = arith.constant 0 : index
    %2 = vector.load %arg2[%c0_2, %c0_3, %c0_4] : memref<2x1x8xf32, #tpu.memory_space<vmem>>, vector<1x1x8xf32>
    %3 = vector.shape_cast %2 : vector<1x1x8xf32> to vector<1x8xf32>
    %c0_5 = arith.constant 0 : index
    %c0_6 = arith.constant 0 : index
    %c0_7 = arith.constant 0 : index
    %4 = vector.load %arg3[%c0_5, %c0_6, %c0_7] : memref<2x1x8xf32, #tpu.memory_space<vmem>>, vector<1x1x8xf32>
    %5 = vector.shape_cast %4 : vector<1x1x8xf32> to vector<1x8xf32>
    %cst = arith.constant dense<0.000000e+00> : vector<8xf32>
    %6 = vector.multi_reduction <add>, %1, %cst [1] : vector<8x8xf32> to vector<8xf32>
    %7 = vector.shape_cast %6 : vector<8xf32> to vector<8x1xf32>
    %cst_8 = arith.constant 8.000000e+00 : f32
    %8 = vector.broadcast %cst_8 : f32 to vector<8x1xf32>
    %9 = arith.divf %7, %8 : vector<8x1xf32>
    %10 = vector.broadcast %9 : vector<8x1xf32> to vector<8x8xf32>
    %11 = arith.subf %1, %10 : vector<8x8xf32>
    %12 = arith.mulf %11, %11 : vector<8x8xf32>
    %cst_9 = arith.constant dense<0.000000e+00> : vector<8xf32>
    %13 = vector.multi_reduction <add>, %12, %cst_9 [1] : vector<8x8xf32> to vector<8xf32>
    %14 = vector.shape_cast %13 : vector<8xf32> to vector<8x1xf32>
    %cst_10 = arith.constant 0.142857149 : f32
    %15 = vector.broadcast %cst_10 : f32 to vector<8x1xf32>
    %16 = arith.mulf %14, %15 : vector<8x1xf32>
    %17 = math.sqrt %16 : vector<8x1xf32>
    %cst_11 = arith.constant 9.99999997E-7 : f32
    %18 = vector.broadcast %cst_11 : f32 to vector<8x1xf32>
    %19 = arith.addf %17, %18 : vector<8x1xf32>
    %20 = tpu.reciprocal %19 {approx = true} : vector<8x1xf32> -> vector<8x1xf32>
    %21 = vector.broadcast %3 : vector<1x8xf32> to vector<8x8xf32>
    %22 = arith.mulf %21, %11 : vector<8x8xf32>
    %23 = vector.broadcast %20 : vector<8x1xf32> to vector<8x8xf32>
    %24 = arith.mulf %22, %23 : vector<8x8xf32>
    %25 = vector.broadcast %5 : vector<1x8xf32> to vector<8x8xf32>
    %26 = arith.addf %24, %25 : vector<8x8xf32>
    %27 = vector.shape_cast %26 : vector<8x8xf32> to vector<1x8x8xf32>
    %28 = vector.shape_cast %27 : vector<1x8x8xf32> to vector<1x8x8xf32>
    %29 = vector.broadcast %28 : vector<1x8x8xf32> to vector<6x8x8xf32>
    %c0_12 = arith.constant 0 : index
    %c0_13 = arith.constant 0 : index
    %c0_14 = arith.constant 0 : index
    %c0_15 = arith.constant 0 : index
    %30 = vector.load %arg4[%c0_12, %c0_13, %c0_14, %c0_15] : memref<2x6x8x4xf32, #tpu.memory_space<vmem>>, vector<1x6x8x4xf32>
    %31 = vector.shape_cast %30 : vector<1x6x8x4xf32> to vector<6x8x4xf32>
    "tpu.trace_start"() <{level = 10 : i32, message = "hsd,hde->hse"}> : () -> ()
    %cst_16 = arith.constant dense<0.000000e+00> : vector<6x8x4xf32>
    %32 = tpu.matmul %29, %31, %cst_16 {dimension_numbers = #tpu.dot_dimension_numbers<[2], [1], [1], [2], [0, 0, 0, 1, 1, 2], [0], [0]>} : vector<6x8x8xf32>, vector<6x8x4xf32>, vector<6x8x4xf32> -> vector<6x8x4xf32>
    "tpu.trace_stop"() : () -> ()
    %c0_17 = arith.constant 0 : index
    %c0_18 = arith.constant 0 : index
    %c0_19 = arith.constant 0 : index
    %c0_20 = arith.constant 0 : index
    %33 = vector.load %arg5[%c0_17, %c0_18, %c0_19, %c0_20] : memref<2x6x1x4xf32, #tpu.memory_space<vmem>>, vector<1x6x1x4xf32>
    %34 = vector.shape_cast %33 : vector<1x6x1x4xf32> to vector<6x1x4xf32>
    %35 = vector.broadcast %34 : vector<6x1x4xf32> to vector<6x8x4xf32>
    %36 = arith.addf %32, %35 : vector<6x8x4xf32>
    %37 = vector.extract_strided_slice %36 {offsets = [0, 0, 0], sizes = [2, 8, 4], strides = [1, 1, 1]} : vector<6x8x4xf32> to vector<2x8x4xf32>
    %38 = vector.extract_strided_slice %36 {offsets = [2, 0, 0], sizes = [2, 8, 4], strides = [1, 1, 1]} : vector<6x8x4xf32> to vector<2x8x4xf32>
    %39 = vector.extract_strided_slice %36 {offsets = [4, 0, 0], sizes = [2, 8, 4], strides = [1, 1, 1]} : vector<6x8x4xf32> to vector<2x8x4xf32>
    "tpu.trace_start"() <{level = 10 : i32, message = "hqe,hke->hqk"}> : () -> ()
    %cst_21 = arith.constant dense<0.000000e+00> : vector<2x8x8xf32>
    %40 = tpu.matmul %37, %38, %cst_21 {dimension_numbers = #tpu.dot_dimension_numbers<[2], [2], [1], [1], [0, 0, 0, 1, 1, 1], [0], [0]>} : vector<2x8x4xf32>, vector<2x8x4xf32>, vector<2x8x8xf32> -> vector<2x8x8xf32>
    "tpu.trace_stop"() : () -> ()
    %cst_22 = arith.constant 5.000000e-01 : f32
    %41 = vector.broadcast %cst_22 : f32 to vector<2x8x8xf32>
    %42 = arith.mulf %40, %41 : vector<2x8x8xf32>
    %cst_23 = arith.constant dense<0xFF800000> : vector<2x8xf32>
    %43 = vector.multi_reduction <maximumf>, %42, %cst_23 [2] : vector<2x8x8xf32> to vector<2x8xf32>
    %44 = vector.shape_cast %43 : vector<2x8xf32> to vector<2x8x1xf32>
    %45 = vector.broadcast %44 : vector<2x8x1xf32> to vector<2x8x8xf32>
    %46 = arith.subf %42, %45 : vector<2x8x8xf32>
    %47 = math.exp %46 : vector<2x8x8xf32>
    %cst_24 = arith.constant dense<0.000000e+00> : vector<2x8xf32>
    %48 = vector.multi_reduction <add>, %47, %cst_24 [2] : vector<2x8x8xf32> to vector<2x8xf32>
    %49 = vector.shape_cast %48 : vector<2x8xf32> to vector<2x8x1xf32>
    %50 = tpu.reciprocal %49 {approx = true} : vector<2x8x1xf32> -> vector<2x8x1xf32>
    %51 = vector.broadcast %50 : vector<2x8x1xf32> to vector<2x8x8xf32>
    %52 = arith.mulf %47, %51 : vector<2x8x8xf32>
    "tpu.trace_start"() <{level = 10 : i32, message = "hqk,hke->hqe"}> : () -> ()
    %cst_25 = arith.constant dense<0.000000e+00> : vector<2x8x4xf32>
    %53 = tpu.matmul %52, %39, %cst_25 {dimension_numbers = #tpu.dot_dimension_numbers<[2], [1], [1], [2], [0, 0, 0, 1, 1, 2], [0], [0]>} : vector<2x8x8xf32>, vector<2x8x4xf32>, vector<2x8x4xf32> -> vector<2x8x4xf32>
    "tpu.trace_stop"() : () -> ()
    %c0_26 = arith.constant 0 : index
    %c0_27 = arith.constant 0 : index
    %c0_28 = arith.constant 0 : index
    %c0_29 = arith.constant 0 : index
    %54 = vector.load %arg6[%c0_26, %c0_27, %c0_28, %c0_29] : memref<2x2x4x8xf32, #tpu.memory_space<vmem>>, vector<1x2x4x8xf32>
    %55 = vector.shape_cast %54 : vector<1x2x4x8xf32> to vector<2x4x8xf32>
    "tpu.trace_start"() <{level = 10 : i32, message = "hse,hed->hsd"}> : () -> ()
    %cst_30 = arith.constant dense<0.000000e+00> : vector<2x8x8xf32>
    %56 = tpu.matmul %53, %55, %cst_30 {dimension_numbers = #tpu.dot_dimension_numbers<[2], [1], [1], [2], [0, 0, 0, 1, 1, 2], [0], [0]>} : vector<2x8x4xf32>, vector<2x4x8xf32>, vector<2x8x8xf32> -> vector<2x8x8xf32>
    "tpu.trace_stop"() : () -> ()
    %cst_31 = arith.constant dense<0.000000e+00> : vector<8x8xf32>
    %57 = vector.multi_reduction <add>, %56, %cst_31 [0] : vector<2x8x8xf32> to vector<8x8xf32>
    %58 = arith.addf %1, %57 : vector<8x8xf32>
    %c0_32 = arith.constant 0 : index
    %c0_33 = arith.constant 0 : index
    %c0_34 = arith.constant 0 : index
    %59 = vector.load %arg7[%c0_32, %c0_33, %c0_34] : memref<2x1x8xf32, #tpu.memory_space<vmem>>, vector<1x1x8xf32>
    %60 = vector.shape_cast %59 : vector<1x1x8xf32> to vector<1x8xf32>
    %61 = vector.broadcast %60 : vector<1x8xf32> to vector<8x8xf32>
    %62 = arith.addf %58, %61 : vector<8x8xf32>
    %c0_35 = arith.constant 0 : index
    %c0_36 = arith.constant 0 : index
    %c0_37 = arith.constant 0 : index
    %63 = vector.load %arg12[%c0_35, %c0_36, %c0_37] : memref<2x1x8xf32, #tpu.memory_space<vmem>>, vector<1x1x8xf32>
    %64 = vector.shape_cast %63 : vector<1x1x8xf32> to vector<1x8xf32>
    %c0_38 = arith.constant 0 : index
    %c0_39 = arith.constant 0 : index
    %c0_40 = arith.constant 0 : index
    %65 = vector.load %arg13[%c0_38, %c0_39, %c0_40] : memref<2x1x8xf32, #tpu.memory_space<vmem>>, vector<1x1x8xf32>
    %66 = vector.shape_cast %65 : vector<1x1x8xf32> to vector<1x8xf32>
    %cst_41 = arith.constant dense<0.000000e+00> : vector<8xf32>
    %67 = vector.multi_reduction <add>, %62, %cst_41 [1] : vector<8x8xf32> to vector<8xf32>
    %68 = vector.shape_cast %67 : vector<8xf32> to vector<8x1xf32>
    %cst_42 = arith.constant 8.000000e+00 : f32
    %69 = vector.broadcast %cst_42 : f32 to vector<8x1xf32>
    %70 = arith.divf %68, %69 : vector<8x1xf32>
    %71 = vector.broadcast %70 : vector<8x1xf32> to vector<8x8xf32>
    %72 = arith.subf %62, %71 : vector<8x8xf32>
    %73 = arith.mulf %72, %72 : vector<8x8xf32>
    %cst_43 = arith.constant dense<0.000000e+00> : vector<8xf32>
    %74 = vector.multi_reduction <add>, %73, %cst_43 [1] : vector<8x8xf32> to vector<8xf32>
    %75 = vector.shape_cast %74 : vector<8xf32> to vector<8x1xf32>
    %cst_44 = arith.constant 0.142857149 : f32
    %76 = vector.broadcast %cst_44 : f32 to vector<8x1xf32>
    %77 = arith.mulf %75, %76 : vector<8x1xf32>
    %78 = math.sqrt %77 : vector<8x1xf32>
    %cst_45 = arith.constant 9.99999997E-7 : f32
    %79 = vector.broadcast %cst_45 : f32 to vector<8x1xf32>
    %80 = arith.addf %78, %79 : vector<8x1xf32>
    %81 = tpu.reciprocal %80 {approx = true} : vector<8x1xf32> -> vector<8x1xf32>
    %82 = vector.broadcast %64 : vector<1x8xf32> to vector<8x8xf32>
    %83 = arith.mulf %82, %72 : vector<8x8xf32>
    %84 = vector.broadcast %81 : vector<8x1xf32> to vector<8x8xf32>
    %85 = arith.mulf %83, %84 : vector<8x8xf32>
    %86 = vector.broadcast %66 : vector<1x8xf32> to vector<8x8xf32>
    %87 = arith.addf %85, %86 : vector<8x8xf32>
    %c0_46 = arith.constant 0 : index
    %c0_47 = arith.constant 0 : index
    %c0_48 = arith.constant 0 : index
    %88 = vector.load %arg8[%c0_46, %c0_47, %c0_48] : memref<2x8x2048xf32, #tpu.memory_space<vmem>>, vector<1x8x2048xf32>
    %89 = vector.shape_cast %88 : vector<1x8x2048xf32> to vector<8x2048xf32>
    %cst_49 = arith.constant dense<0.000000e+00> : vector<8x2048xf32>
    %90 = tpu.matmul %87, %89, %cst_49 {dimension_numbers = #tpu.dot_dimension_numbers<[1], [0], [0], [1], [0, 0, 1, 1], [], []>} : vector<8x8xf32>, vector<8x2048xf32>, vector<8x2048xf32> -> vector<8x2048xf32>
    %c0_50 = arith.constant 0 : index
    %c0_51 = arith.constant 0 : index
    %c0_52 = arith.constant 0 : index
    %91 = vector.load %arg9[%c0_50, %c0_51, %c0_52] : memref<2x1x2048xf32, #tpu.memory_space<vmem>>, vector<1x1x2048xf32>
    %92 = vector.shape_cast %91 : vector<1x1x2048xf32> to vector<1x2048xf32>
    %93 = vector.broadcast %92 : vector<1x2048xf32> to vector<8x2048xf32>
    %94 = arith.addf %90, %93 : vector<8x2048xf32>
    %cst_53 = arith.constant 0.000000e+00 : f32
    %95 = vector.broadcast %cst_53 : f32 to vector<8x2048xf32>
    %96 = arith.maximumf %94, %95 : vector<8x2048xf32>
    %c0_54 = arith.constant 0 : index
    %c0_55 = arith.constant 0 : index
    %c0_56 = arith.constant 0 : index
    %97 = vector.load %arg10[%c0_54, %c0_55, %c0_56] : memref<2x2048x8xf32, #tpu.memory_space<vmem>>, vector<1x2048x8xf32>
    %98 = vector.shape_cast %97 : vector<1x2048x8xf32> to vector<2048x8xf32>
    %cst_57 = arith.constant dense<0.000000e+00> : vector<8x8xf32>
    %99 = tpu.matmul %96, %98, %cst_57 {dimension_numbers = #tpu.dot_dimension_numbers<[1], [0], [0], [1], [0, 0, 1, 1], [], []>} : vector<8x2048xf32>, vector<2048x8xf32>, vector<8x8xf32> -> vector<8x8xf32>
    %100 = arith.addf %62, %99 : vector<8x8xf32>
    %c0_58 = arith.constant 0 : index
    %c0_59 = arith.constant 0 : index
    %c0_60 = arith.constant 0 : index
    %101 = vector.load %arg11[%c0_58, %c0_59, %c0_60] : memref<2x1x8xf32, #tpu.memory_space<vmem>>, vector<1x1x8xf32>
    %102 = vector.shape_cast %101 : vector<1x1x8xf32> to vector<1x8xf32>
    %103 = vector.broadcast %102 : vector<1x8xf32> to vector<8x8xf32>
    %104 = arith.addf %100, %103 : vector<8x8xf32>
    %c1 = arith.constant 1 : index
    %c0_61 = arith.constant 0 : index
    %c0_62 = arith.constant 0 : index
    %105 = vector.load %arg2[%c1, %c0_61, %c0_62] : memref<2x1x8xf32, #tpu.memory_space<vmem>>, vector<1x1x8xf32>
    %106 = vector.shape_cast %105 : vector<1x1x8xf32> to vector<1x8xf32>
    %c1_63 = arith.constant 1 : index
    %c0_64 = arith.constant 0 : index
    %c0_65 = arith.constant 0 : index
    %107 = vector.load %arg3[%c1_63, %c0_64, %c0_65] : memref<2x1x8xf32, #tpu.memory_space<vmem>>, vector<1x1x8xf32>
    %108 = vector.shape_cast %107 : vector<1x1x8xf32> to vector<1x8xf32>
    %cst_66 = arith.constant dense<0.000000e+00> : vector<8xf32>
    %109 = vector.multi_reduction <add>, %104, %cst_66 [1] : vector<8x8xf32> to vector<8xf32>
    %110 = vector.shape_cast %109 : vector<8xf32> to vector<8x1xf32>
    %cst_67 = arith.constant 8.000000e+00 : f32
    %111 = vector.broadcast %cst_67 : f32 to vector<8x1xf32>
    %112 = arith.divf %110, %111 : vector<8x1xf32>
    %113 = vector.broadcast %112 : vector<8x1xf32> to vector<8x8xf32>
    %114 = arith.subf %104, %113 : vector<8x8xf32>
    %115 = arith.mulf %114, %114 : vector<8x8xf32>
    %cst_68 = arith.constant dense<0.000000e+00> : vector<8xf32>
    %116 = vector.multi_reduction <add>, %115, %cst_68 [1] : vector<8x8xf32> to vector<8xf32>
    %117 = vector.shape_cast %116 : vector<8xf32> to vector<8x1xf32>
    %cst_69 = arith.constant 0.142857149 : f32
    %118 = vector.broadcast %cst_69 : f32 to vector<8x1xf32>
    %119 = arith.mulf %117, %118 : vector<8x1xf32>
    %120 = math.sqrt %119 : vector<8x1xf32>
    %cst_70 = arith.constant 9.99999997E-7 : f32
    %121 = vector.broadcast %cst_70 : f32 to vector<8x1xf32>
    %122 = arith.addf %120, %121 : vector<8x1xf32>
    %123 = tpu.reciprocal %122 {approx = true} : vector<8x1xf32> -> vector<8x1xf32>
    %124 = vector.broadcast %106 : vector<1x8xf32> to vector<8x8xf32>
    %125 = arith.mulf %124, %114 : vector<8x8xf32>
    %126 = vector.broadcast %123 : vector<8x1xf32> to vector<8x8xf32>
    %127 = arith.mulf %125, %126 : vector<8x8xf32>
    %128 = vector.broadcast %108 : vector<1x8xf32> to vector<8x8xf32>
    %129 = arith.addf %127, %128 : vector<8x8xf32>
    %130 = vector.shape_cast %129 : vector<8x8xf32> to vector<1x8x8xf32>
    %131 = vector.shape_cast %130 : vector<1x8x8xf32> to vector<1x8x8xf32>
    %132 = vector.broadcast %131 : vector<1x8x8xf32> to vector<6x8x8xf32>
    %c1_71 = arith.constant 1 : index
    %c0_72 = arith.constant 0 : index
    %c0_73 = arith.constant 0 : index
    %c0_74 = arith.constant 0 : index
    %133 = vector.load %arg4[%c1_71, %c0_72, %c0_73, %c0_74] : memref<2x6x8x4xf32, #tpu.memory_space<vmem>>, vector<1x6x8x4xf32>
    %134 = vector.shape_cast %133 : vector<1x6x8x4xf32> to vector<6x8x4xf32>
    "tpu.trace_start"() <{level = 10 : i32, message = "hsd,hde->hse"}> : () -> ()
    %cst_75 = arith.constant dense<0.000000e+00> : vector<6x8x4xf32>
    %135 = tpu.matmul %132, %134, %cst_75 {dimension_numbers = #tpu.dot_dimension_numbers<[2], [1], [1], [2], [0, 0, 0, 1, 1, 2], [0], [0]>} : vector<6x8x8xf32>, vector<6x8x4xf32>, vector<6x8x4xf32> -> vector<6x8x4xf32>
    "tpu.trace_stop"() : () -> ()
    %c1_76 = arith.constant 1 : index
    %c0_77 = arith.constant 0 : index
    %c0_78 = arith.constant 0 : index
    %c0_79 = arith.constant 0 : index
    %136 = vector.load %arg5[%c1_76, %c0_77, %c0_78, %c0_79] : memref<2x6x1x4xf32, #tpu.memory_space<vmem>>, vector<1x6x1x4xf32>
    %137 = vector.shape_cast %136 : vector<1x6x1x4xf32> to vector<6x1x4xf32>
    %138 = vector.broadcast %137 : vector<6x1x4xf32> to vector<6x8x4xf32>
    %139 = arith.addf %135, %138 : vector<6x8x4xf32>
    %140 = vector.extract_strided_slice %139 {offsets = [0, 0, 0], sizes = [2, 8, 4], strides = [1, 1, 1]} : vector<6x8x4xf32> to vector<2x8x4xf32>
    %141 = vector.extract_strided_slice %139 {offsets = [2, 0, 0], sizes = [2, 8, 4], strides = [1, 1, 1]} : vector<6x8x4xf32> to vector<2x8x4xf32>
    %142 = vector.extract_strided_slice %139 {offsets = [4, 0, 0], sizes = [2, 8, 4], strides = [1, 1, 1]} : vector<6x8x4xf32> to vector<2x8x4xf32>
    "tpu.trace_start"() <{level = 10 : i32, message = "hqe,hke->hqk"}> : () -> ()
    %cst_80 = arith.constant dense<0.000000e+00> : vector<2x8x8xf32>
    %143 = tpu.matmul %140, %141, %cst_80 {dimension_numbers = #tpu.dot_dimension_numbers<[2], [2], [1], [1], [0, 0, 0, 1, 1, 1], [0], [0]>} : vector<2x8x4xf32>, vector<2x8x4xf32>, vector<2x8x8xf32> -> vector<2x8x8xf32>
    "tpu.trace_stop"() : () -> ()
    %cst_81 = arith.constant 5.000000e-01 : f32
    %144 = vector.broadcast %cst_81 : f32 to vector<2x8x8xf32>
    %145 = arith.mulf %143, %144 : vector<2x8x8xf32>
    %cst_82 = arith.constant dense<0xFF800000> : vector<2x8xf32>
    %146 = vector.multi_reduction <maximumf>, %145, %cst_82 [2] : vector<2x8x8xf32> to vector<2x8xf32>
    %147 = vector.shape_cast %146 : vector<2x8xf32> to vector<2x8x1xf32>
    %148 = vector.broadcast %147 : vector<2x8x1xf32> to vector<2x8x8xf32>
    %149 = arith.subf %145, %148 : vector<2x8x8xf32>
    %150 = math.exp %149 : vector<2x8x8xf32>
    %cst_83 = arith.constant dense<0.000000e+00> : vector<2x8xf32>
    %151 = vector.multi_reduction <add>, %150, %cst_83 [2] : vector<2x8x8xf32> to vector<2x8xf32>
    %152 = vector.shape_cast %151 : vector<2x8xf32> to vector<2x8x1xf32>
    %153 = tpu.reciprocal %152 {approx = true} : vector<2x8x1xf32> -> vector<2x8x1xf32>
    %154 = vector.broadcast %153 : vector<2x8x1xf32> to vector<2x8x8xf32>
    %155 = arith.mulf %150, %154 : vector<2x8x8xf32>
    "tpu.trace_start"() <{level = 10 : i32, message = "hqk,hke->hqe"}> : () -> ()
    %cst_84 = arith.constant dense<0.000000e+00> : vector<2x8x4xf32>
    %156 = tpu.matmul %155, %142, %cst_84 {dimension_numbers = #tpu.dot_dimension_numbers<[2], [1], [1], [2], [0, 0, 0, 1, 1, 2], [0], [0]>} : vector<2x8x8xf32>, vector<2x8x4xf32>, vector<2x8x4xf32> -> vector<2x8x4xf32>
    "tpu.trace_stop"() : () -> ()
    %c1_85 = arith.constant 1 : index
    %c0_86 = arith.constant 0 : index
    %c0_87 = arith.constant 0 : index
    %c0_88 = arith.constant 0 : index
    %157 = vector.load %arg6[%c1_85, %c0_86, %c0_87, %c0_88] : memref<2x2x4x8xf32, #tpu.memory_space<vmem>>, vector<1x2x4x8xf32>
    %158 = vector.shape_cast %157 : vector<1x2x4x8xf32> to vector<2x4x8xf32>
    "tpu.trace_start"() <{level = 10 : i32, message = "hse,hed->hsd"}> : () -> ()
    %cst_89 = arith.constant dense<0.000000e+00> : vector<2x8x8xf32>
    %159 = tpu.matmul %156, %158, %cst_89 {dimension_numbers = #tpu.dot_dimension_numbers<[2], [1], [1], [2], [0, 0, 0, 1, 1, 2], [0], [0]>} : vector<2x8x4xf32>, vector<2x4x8xf32>, vector<2x8x8xf32> -> vector<2x8x8xf32>
    "tpu.trace_stop"() : () -> ()
    %cst_90 = arith.constant dense<0.000000e+00> : vector<8x8xf32>
    %160 = vector.multi_reduction <add>, %159, %cst_90 [0] : vector<2x8x8xf32> to vector<8x8xf32>
    %161 = arith.addf %104, %160 : vector<8x8xf32>
    %c1_91 = arith.constant 1 : index
    %c0_92 = arith.constant 0 : index
    %c0_93 = arith.constant 0 : index
    %162 = vector.load %arg7[%c1_91, %c0_92, %c0_93] : memref<2x1x8xf32, #tpu.memory_space<vmem>>, vector<1x1x8xf32>
    %163 = vector.shape_cast %162 : vector<1x1x8xf32> to vector<1x8xf32>
    %164 = vector.broadcast %163 : vector<1x8xf32> to vector<8x8xf32>
    %165 = arith.addf %161, %164 : vector<8x8xf32>
    %c1_94 = arith.constant 1 : index
    %c0_95 = arith.constant 0 : index
    %c0_96 = arith.constant 0 : index
    %166 = vector.load %arg12[%c1_94, %c0_95, %c0_96] : memref<2x1x8xf32, #tpu.memory_space<vmem>>, vector<1x1x8xf32>
    %167 = vector.shape_cast %166 : vector<1x1x8xf32> to vector<1x8xf32>
    %c1_97 = arith.constant 1 : index
    %c0_98 = arith.constant 0 : index
    %c0_99 = arith.constant 0 : index
    %168 = vector.load %arg13[%c1_97, %c0_98, %c0_99] : memref<2x1x8xf32, #tpu.memory_space<vmem>>, vector<1x1x8xf32>
    %169 = vector.shape_cast %168 : vector<1x1x8xf32> to vector<1x8xf32>
    %cst_100 = arith.constant dense<0.000000e+00> : vector<8xf32>
    %170 = vector.multi_reduction <add>, %165, %cst_100 [1] : vector<8x8xf32> to vector<8xf32>
    %171 = vector.shape_cast %170 : vector<8xf32> to vector<8x1xf32>
    %cst_101 = arith.constant 8.000000e+00 : f32
    %172 = vector.broadcast %cst_101 : f32 to vector<8x1xf32>
    %173 = arith.divf %171, %172 : vector<8x1xf32>
    %174 = vector.broadcast %173 : vector<8x1xf32> to vector<8x8xf32>
    %175 = arith.subf %165, %174 : vector<8x8xf32>
    %176 = arith.mulf %175, %175 : vector<8x8xf32>
    %cst_102 = arith.constant dense<0.000000e+00> : vector<8xf32>
    %177 = vector.multi_reduction <add>, %176, %cst_102 [1] : vector<8x8xf32> to vector<8xf32>
    %178 = vector.shape_cast %177 : vector<8xf32> to vector<8x1xf32>
    %cst_103 = arith.constant 0.142857149 : f32
    %179 = vector.broadcast %cst_103 : f32 to vector<8x1xf32>
    %180 = arith.mulf %178, %179 : vector<8x1xf32>
    %181 = math.sqrt %180 : vector<8x1xf32>
    %cst_104 = arith.constant 9.99999997E-7 : f32
    %182 = vector.broadcast %cst_104 : f32 to vector<8x1xf32>
    %183 = arith.addf %181, %182 : vector<8x1xf32>
    %184 = tpu.reciprocal %183 {approx = true} : vector<8x1xf32> -> vector<8x1xf32>
    %185 = vector.broadcast %167 : vector<1x8xf32> to vector<8x8xf32>
    %186 = arith.mulf %185, %175 : vector<8x8xf32>
    %187 = vector.broadcast %184 : vector<8x1xf32> to vector<8x8xf32>
    %188 = arith.mulf %186, %187 : vector<8x8xf32>
    %189 = vector.broadcast %169 : vector<1x8xf32> to vector<8x8xf32>
    %190 = arith.addf %188, %189 : vector<8x8xf32>
    %c1_105 = arith.constant 1 : index
    %c0_106 = arith.constant 0 : index
    %c0_107 = arith.constant 0 : index
    %191 = vector.load %arg8[%c1_105, %c0_106, %c0_107] : memref<2x8x2048xf32, #tpu.memory_space<vmem>>, vector<1x8x2048xf32>
    %192 = vector.shape_cast %191 : vector<1x8x2048xf32> to vector<8x2048xf32>
    %cst_108 = arith.constant dense<0.000000e+00> : vector<8x2048xf32>
    %193 = tpu.matmul %190, %192, %cst_108 {dimension_numbers = #tpu.dot_dimension_numbers<[1], [0], [0], [1], [0, 0, 1, 1], [], []>} : vector<8x8xf32>, vector<8x2048xf32>, vector<8x2048xf32> -> vector<8x2048xf32>
    %c1_109 = arith.constant 1 : index
    %c0_110 = arith.constant 0 : index
    %c0_111 = arith.constant 0 : index
    %194 = vector.load %arg9[%c1_109, %c0_110, %c0_111] : memref<2x1x2048xf32, #tpu.memory_space<vmem>>, vector<1x1x2048xf32>
    %195 = vector.shape_cast %194 : vector<1x1x2048xf32> to vector<1x2048xf32>
    %196 = vector.broadcast %195 : vector<1x2048xf32> to vector<8x2048xf32>
    %197 = arith.addf %193, %196 : vector<8x2048xf32>
    %cst_112 = arith.constant 0.000000e+00 : f32
    %198 = vector.broadcast %cst_112 : f32 to vector<8x2048xf32>
    %199 = arith.maximumf %197, %198 : vector<8x2048xf32>
    %c1_113 = arith.constant 1 : index
    %c0_114 = arith.constant 0 : index
    %c0_115 = arith.constant 0 : index
    %200 = vector.load %arg10[%c1_113, %c0_114, %c0_115] : memref<2x2048x8xf32, #tpu.memory_space<vmem>>, vector<1x2048x8xf32>
    %201 = vector.shape_cast %200 : vector<1x2048x8xf32> to vector<2048x8xf32>
    %cst_116 = arith.constant dense<0.000000e+00> : vector<8x8xf32>
    %202 = tpu.matmul %199, %201, %cst_116 {dimension_numbers = #tpu.dot_dimension_numbers<[1], [0], [0], [1], [0, 0, 1, 1], [], []>} : vector<8x2048xf32>, vector<2048x8xf32>, vector<8x8xf32> -> vector<8x8xf32>
    %203 = arith.addf %165, %202 : vector<8x8xf32>
    %c1_117 = arith.constant 1 : index
    %c0_118 = arith.constant 0 : index
    %c0_119 = arith.constant 0 : index
    %204 = vector.load %arg11[%c1_117, %c0_118, %c0_119] : memref<2x1x8xf32, #tpu.memory_space<vmem>>, vector<1x1x8xf32>
    %205 = vector.shape_cast %204 : vector<1x1x8xf32> to vector<1x8xf32>
    %206 = vector.broadcast %205 : vector<1x8xf32> to vector<8x8xf32>
    %207 = arith.addf %203, %206 : vector<8x8xf32>
    %c0_120 = arith.constant 0 : index
    %c0_121 = arith.constant 0 : index
    %208 = vector.load %arg14[%c0_120, %c0_121] : memref<1x8xf32, #tpu.memory_space<vmem>>, vector<1x8xf32>
    %c0_122 = arith.constant 0 : index
    %c0_123 = arith.constant 0 : index
    %209 = vector.load %arg15[%c0_122, %c0_123] : memref<1x8xf32, #tpu.memory_space<vmem>>, vector<1x8xf32>
    %cst_124 = arith.constant dense<0.000000e+00> : vector<8xf32>
    %210 = vector.multi_reduction <add>, %207, %cst_124 [1] : vector<8x8xf32> to vector<8xf32>
    %211 = vector.shape_cast %210 : vector<8xf32> to vector<8x1xf32>
    %cst_125 = arith.constant 8.000000e+00 : f32
    %212 = vector.broadcast %cst_125 : f32 to vector<8x1xf32>
    %213 = arith.divf %211, %212 : vector<8x1xf32>
    %214 = vector.broadcast %213 : vector<8x1xf32> to vector<8x8xf32>
    %215 = arith.subf %207, %214 : vector<8x8xf32>
    %216 = arith.mulf %215, %215 : vector<8x8xf32>
    %cst_126 = arith.constant dense<0.000000e+00> : vector<8xf32>
    %217 = vector.multi_reduction <add>, %216, %cst_126 [1] : vector<8x8xf32> to vector<8xf32>
    %218 = vector.shape_cast %217 : vector<8xf32> to vector<8x1xf32>
    %cst_127 = arith.constant 0.142857149 : f32
    %219 = vector.broadcast %cst_127 : f32 to vector<8x1xf32>
    %220 = arith.mulf %218, %219 : vector<8x1xf32>
    %221 = math.sqrt %220 : vector<8x1xf32>
    %cst_128 = arith.constant 9.99999997E-7 : f32
    %222 = vector.broadcast %cst_128 : f32 to vector<8x1xf32>
    %223 = arith.addf %221, %222 : vector<8x1xf32>
    %224 = tpu.reciprocal %223 {approx = true} : vector<8x1xf32> -> vector<8x1xf32>
    %225 = vector.broadcast %208 : vector<1x8xf32> to vector<8x8xf32>
    %226 = arith.mulf %225, %215 : vector<8x8xf32>
    %227 = vector.broadcast %224 : vector<8x1xf32> to vector<8x8xf32>
    %228 = arith.mulf %226, %227 : vector<8x8xf32>
    %229 = vector.broadcast %209 : vector<1x8xf32> to vector<8x8xf32>
    %230 = arith.addf %228, %229 : vector<8x8xf32>
    %c0_129 = arith.constant 0 : index
    %c0_130 = arith.constant 0 : index
    %231 = vector.load %arg16[%c0_129, %c0_130] : memref<1x1xf32, #tpu.memory_space<vmem>>, vector<1x1xf32>
    %232 = vector.broadcast %231 : vector<1x1xf32> to vector<8x8xf32>
    %233 = arith.mulf %230, %232 : vector<8x8xf32>
    %c0_131 = arith.constant 0 : index
    %c0_132 = arith.constant 0 : index
    %234 = vector.load %arg17[%c0_131, %c0_132] : memref<1x1xf32, #tpu.memory_space<vmem>>, vector<1x1xf32>
    %235 = vector.broadcast %234 : vector<1x1xf32> to vector<8x8xf32>
    %236 = arith.addf %233, %235 : vector<8x8xf32>
    %237 = math.tanh %236 : vector<8x8xf32>
    %238 = vector.shape_cast %237 : vector<8x8xf32> to vector<1x8x8xf32>
    %c0_133 = arith.constant 0 : index
    %c0_134 = arith.constant 0 : index
    %c0_135 = arith.constant 0 : index
    %239 = vector.load %arg18[%c0_133, %c0_134, %c0_135] : memref<1x8x8xf32, #tpu.memory_space<vmem>>, vector<1x8x8xf32>
    tpu.vector_store %arg18[%c0_133, %c0_134, %c0_135], %238 {strides = array<i32>} : memref<1x8x8xf32, #tpu.memory_space<vmem>>, vector<1x8x8xf32>,
    return
  }
  func.func @transform_0(%arg0: i32) -> (i32, i32, i32) {
    %c0_i32 = arith.constant 0 : i32
    %c0_i32_0 = arith.constant 0 : i32
    %c0_i32_1 = arith.constant 0 : i32
    return %arg0, %c0_i32, %c0_i32_0 : i32, i32, i32
  }
  func.func @transform_1(%arg0: i32) -> (i32, i32, i32) {
    %c0_i32 = arith.constant 0 : i32
    %c0_i32_0 = arith.constant 0 : i32
    %c0_i32_1 = arith.constant 0 : i32
    %c0_i32_2 = arith.constant 0 : i32
    return %c0_i32, %c0_i32_0, %c0_i32_1 : i32, i32, i32
  }
  func.func @transform_2(%arg0: i32) -> (i32, i32, i32) {
    %c0_i32 = arith.constant 0 : i32
    %c0_i32_0 = arith.constant 0 : i32
    %c0_i32_1 = arith.constant 0 : i32
    %c0_i32_2 = arith.constant 0 : i32
    return %c0_i32, %c0_i32_0, %c0_i32_1 : i32, i32, i32
  }
  func.func @transform_3(%arg0: i32) -> (i32, i32, i32, i32) {
    %c0_i32 = arith.constant 0 : i32
    %c0_i32_0 = arith.constant 0 : i32
    %c0_i32_1 = arith.constant 0 : i32
    %c0_i32_2 = arith.constant 0 : i32
    %c0_i32_3 = arith.constant 0 : i32
    return %c0_i32, %c0_i32_0, %c0_i32_1, %c0_i32_2 : i32, i32, i32, i32
  }
  func.func @transform_4(%arg0: i32) -> (i32, i32, i32, i32) {
    %c0_i32 = arith.constant 0 : i32
    %c0_i32_0 = arith.constant 0 : i32
    %c0_i32_1 = arith.constant 0 : i32
    %c0_i32_2 = arith.constant 0 : i32
    %c0_i32_3 = arith.constant 0 : i32
    return %c0_i32, %c0_i32_0, %c0_i32_1, %c0_i32_2 : i32, i32, i32, i32
  }
  func.func @transform_5(%arg0: i32) -> (i32, i32, i32, i32) {
    %c0_i32 = arith.constant 0 : i32
    %c0_i32_0 = arith.constant 0 : i32
    %c0_i32_1 = arith.constant 0 : i32
    %c0_i32_2 = arith.constant 0 : i32
    %c0_i32_3 = arith.constant 0 : i32
    return %c0_i32, %c0_i32_0, %c0_i32_1, %c0_i32_2 : i32, i32, i32, i32
  }
  func.func @transform_6(%arg0: i32) -> (i32, i32, i32) {
    %c0_i32 = arith.constant 0 : i32
    %c0_i32_0 = arith.constant 0 : i32
    %c0_i32_1 = arith.constant 0 : i32
    %c0_i32_2 = arith.constant 0 : i32
    return %c0_i32, %c0_i32_0, %c0_i32_1 : i32, i32, i32
  }
  func.func @transform_7(%arg0: i32) -> (i32, i32, i32) {
    %c0_i32 = arith.constant 0 : i32
    %c0_i32_0 = arith.constant 0 : i32
    %c0_i32_1 = arith.constant 0 : i32
    %c0_i32_2 = arith.constant 0 : i32
    return %c0_i32, %c0_i32_0, %c0_i32_1 : i32, i32, i32
  }
  func.func @transform_8(%arg0: i32) -> (i32, i32, i32) {
    %c0_i32 = arith.constant 0 : i32
    %c0_i32_0 = arith.constant 0 : i32
    %c0_i32_1 = arith.constant 0 : i32
    %c0_i32_2 = arith.constant 0 : i32
    return %c0_i32, %c0_i32_0, %c0_i32_1 : i32, i32, i32
  }
  func.func @transform_9(%arg0: i32) -> (i32, i32, i32) {
    %c0_i32 = arith.constant 0 : i32
    %c0_i32_0 = arith.constant 0 : i32
    %c0_i32_1 = arith.constant 0 : i32
    %c0_i32_2 = arith.constant 0 : i32
    return %c0_i32, %c0_i32_0, %c0_i32_1 : i32, i32, i32
  }
  func.func @transform_10(%arg0: i32) -> (i32, i32, i32) {
    %c0_i32 = arith.constant 0 : i32
    %c0_i32_0 = arith.constant 0 : i32
    %c0_i32_1 = arith.constant 0 : i32
    %c0_i32_2 = arith.constant 0 : i32
    return %c0_i32, %c0_i32_0, %c0_i32_1 : i32, i32, i32
  }
  func.func @transform_11(%arg0: i32) -> (i32, i32, i32) {
    %c0_i32 = arith.constant 0 : i32
    %c0_i32_0 = arith.constant 0 : i32
    %c0_i32_1 = arith.constant 0 : i32
    %c0_i32_2 = arith.constant 0 : i32
    return %c0_i32, %c0_i32_0, %c0_i32_1 : i32, i32, i32
  }
  func.func @transform_12(%arg0: i32) -> (i32, i32, i32) {
    %c0_i32 = arith.constant 0 : i32
    %c0_i32_0 = arith.constant 0 : i32
    %c0_i32_1 = arith.constant 0 : i32
    %c0_i32_2 = arith.constant 0 : i32
    return %c0_i32, %c0_i32_0, %c0_i32_1 : i32, i32, i32
  }
  func.func @transform_13(%arg0: i32) -> (i32, i32) {
    %c0_i32 = arith.constant 0 : i32
    %c0_i32_0 = arith.constant 0 : i32
    %c0_i32_1 = arith.constant 0 : i32
    return %c0_i32, %c0_i32_0 : i32, i32
  }
  func.func @transform_14(%arg0: i32) -> (i32, i32) {
    %c0_i32 = arith.constant 0 : i32
    %c0_i32_0 = arith.constant 0 : i32
    %c0_i32_1 = arith.constant 0 : i32
    return %c0_i32, %c0_i32_0 : i32, i32
  }
  func.func @transform_15(%arg0: i32) -> (i32, i32) {
    %c0_i32 = arith.constant 0 : i32
    %c0_i32_0 = arith.constant 0 : i32
    %c0_i32_1 = arith.constant 0 : i32
    return %c0_i32, %c0_i32_0 : i32, i32
  }
  func.func @transform_16(%arg0: i32) -> (i32, i32) {
    %c0_i32 = arith.constant 0 : i32
    %c0_i32_0 = arith.constant 0 : i32
    %c0_i32_1 = arith.constant 0 : i32
    return %c0_i32, %c0_i32_0 : i32, i32
  }
  func.func @transform_17(%arg0: i32) -> (i32, i32, i32) {
    %c0_i32 = arith.constant 0 : i32
    %c0_i32_0 = arith.constant 0 : i32
    %c0_i32_1 = arith.constant 0 : i32
    return %arg0, %c0_i32, %c0_i32_0 : i32, i32, i32
  }
}

</mosaic_0001>

<bundles_post_ra>
// kernel: generator_forward.2
= control target key start
LH: loop header
LB: loop body
LE: loop exit
PB: predicated region body
PF: predicated region fallthrough
CT: control target
= control target key end

     0   :  { %s5848_s0 = inlined_call_operand.vmem [shape: f32[2,8,8,3], index: 0, kind: input, shape index: {}]   ;;  %s5849_s1 = inlined_call_operand.vmem [shape: f32[2,8,8,1], index: 1, kind: input, shape index: {}]   ;;  %s5850_s2 = inlined_call_operand.hbm [shape: f32[2,8,8,8], index: 2, kind: input, shape index: {}]   ;;  %s5851_s3 = inlined_call_operand.hbm [shape: f32[4,8], index: 3, kind: input, shape index: {}]   ;;  %s5852_s4 = inlined_call_operand.hbm [shape: f32[1,8], index: 4, kind: input, shape index: {}]   ;;  %s5853_s5 = inlined_call_operand.vmem [shape: f32[8,1], index: 5, kind: input, shape index: {}]   ;;  %s5854_s6 = inlined_call_operand.vmem [shape: f32[8,1], index: 6, kind: input, shape index: {}]   ;;  %s5855_s7 = inlined_call_operand.vmem [shape: f32[8,4], index: 7, kind: input, shape index: {}]   ;;  %s5856_s8 = inlined_call_operand.hbm [shape: f32[1,4], index: 8, kind: input, shape index: {}]   ;;  %s5857_s9 = inlined_call_operand.vmem [shape: f32[8,1], index: 9, kind: input, shape index: {}]   ;;  %s5858_s10 = inlined_call_operand.vmem [shape: f32[8,1], index: 10, kind: input, shape index: {}]   ;;  %s5859_s11 = inlined_call_operand.vmem [shape: f32[4,2], index: 11, kind: input, shape index: {}]   ;;  %s5860_s12 = inlined_call_operand.hbm [shape: f32[1,2], index: 12, kind: input, shape index: {}]   ;;  %s5861_s13 = inlined_call_operand.vmem [shape: f32[8,1], index: 13, kind: input, shape index: {}]   ;;  %s5862_s14 = inlined_call_operand.vmem [shape: f32[8,1], index: 14, kind: input, shape index: {}]   ;;  %s5863_s15 = inlined_call_operand.vmem [shape: f32[2,1], index: 15, kind: input, shape index: {}]   ;;  %s5864_s16 = inlined_call_operand.<no memory space> [shape: f32[1,1], index: 16, kind: input, shape index: {}]   ;;  %s5865_s17 = inlined_call_operand.vmem [shape: f32[8,1], index: 17, kind: input, shape index: {}]   ;;  %s5866_s18 = inlined_call_operand.vmem [shape: f32[8,1], index: 18, kind: input, shape index: {}]   ;;  %s5867_s19 = inlined_call_operand.vmem [shape: f32[2,8,8,1], index: 19, kind: output, shape index: {}]  }
   0x1   :  { %5874 = sst [smem:[#allocation23_spill]] %s5848_s0  ;;  %v24_v0 = vstv %s5864_s16 }
   0x2   :  { %5875 = sst [smem:[#allocation24_spill]] %s5849_s1  ;;  %25 = vst [vmem:[#allocation2] sm:$0x1] %v24_v0 }
   0x3   :  { %5876 = sst [smem:[#allocation25_spill]] %s5850_s2 }
   0x4   :  { %5877 = sst [smem:[#allocation26_spill]] %s5851_s3 }
   0x5   :  { %5878 = sst [smem:[#allocation27_spill]] %s5852_s4 }
   0x6   :  { %5879 = sst [smem:[#allocation28_spill]] %s5856_s8 }
   0x7   :  { %5880 = sst [smem:[#allocation29_spill]] %s5860_s12 }
   0x8   :  { %5881 = sst [smem:[#allocation30_spill]] %s5866_s18 }
   0x9   :  { %5882 = sst [smem:[#allocation31_spill]] %s5867_s19 }
   0xa   :  { %26 = vsyncpa [#allocation6], 0 }
   0xb   :  { %28 = vsyncpa [#allocation6 + $0x1], 0 }
   0xc   :  { %29 = vsyncpa [#allocation8], 0 }
   0xd   :  { %30 = vsyncpa [#allocation11], 0  ;;  %s5253_s20 = smov 0   ;;  %s5255_s21 = smov 0  }
   0xe   :  { %s5257_s1 = smov 0   ;;  %s5259_s22 = smov 0  }
   0xf LB: > { %s5272_s16 = sadd.s32 4294967295, %s5134_s22   ;;  %s5275_s2 = sadd.s32 1, %s5134_s22   ;;  %s5134_s22 = sphi %s5259_s22, %s5908_s22   ;;  %s5130_s1 = sphi %s5257_s1, %s5912_s1   ;;  %s5126_s21 = sphi %s5255_s21, %s5911_s21   ;;  %s5122_s20 = sphi %s5253_s20, %s5910_s20  }
  0x10   : > { %5883 = sst [smem:[#allocation20_spill]] %s5275_s2  ;;  %s40_s23 = ssub.s32 %s5134_s22, %s5275_s2 }
  0x11   : > { %s43_s24 = sadd.s32 1, %s5130_s1  ;;  %p41_p0 = scmp.eq.s32.totalorder %s40_s23, 0 }
  0x12   : > { %p50_p1 = scmp.ne.s32.totalorder %s5130_s1, %s5126_s21  ;;  %p51_p2 = scmp.eq.s32.totalorder %s5134_s22, 0 }
  0x13   : > { %p108_p3 = scmp.ne.s32.totalorder %s5126_s21, %s5122_s20  ;;  %p5870_p5 = scmp.eq.s32.totalorder %s5272_s16, 0 }
  0x14   : > { %s5285_s25 = scalar_select %p41_p0, %s5130_s1, %s43_s24  }
  0x15   : > { %p5287_p4 = por %p51_p2, %p50_p1  ;;  %p468_p6 = scmp.eq.s32.totalorder %s5272_s16, 1 }
  0x16   : > { %5884 = sst [smem:[#allocation21_spill]] %s5285_s25  ;;  %p4432_p7 = scmp.ge.s32.totalorder %s5134_s22, 1 }
  0x17   : > { %p5296_p8 = por %p5870_p5, %p108_p3  ;;  %p481_p9 = scmp.lt.s32.totalorder %s5134_s22, 3 }
  0x18   : > { %p5301_p10 = por %p468_p6, %p50_p1  ;;  %s5136_s29 = smov [#allocation7]  }
  0x19   : > { %s5886_s26 = scalar_select %p5296_p8, 1, 0 }
  0x1a   : > { %s5887_s27 = scalar_select %p5301_p10, 1, 0 }
  0x1b   : > { %p5305_p11 = pnand %p4432_p7, %p481_p9  ;;  %s494_s0 = sshll.u32 %s5136_s29, 4  ;;  %s495_s0 = int_to_ptr.vmem [resolvable:$true] %s494_s0 }
  0x1c   : > { %5888 = sst [smem:[#allocation22_spill]] %s5887_s27  ;;  %s5137_s30 = smov [#allocation10]  }
  0x1d   : > { %s5889_s28 = scalar_select %p5305_p11, 1, 0 }
  0x1e   : > { %p4879_p12 = pneg %p5305_p11  ;;  %s525_s20 = sshll.u32 %s5137_s30, 4  ;;  %s526_s20 = int_to_ptr.vmem [resolvable:$true] %s525_s20 }
  0x1f   : > { %s5138_s24 = smov [#allocation9]   ;;  %s4999_s29 = scalar_lea.vmem %s495_s0, 64 }
  0x20   : > { %p5313_p13 = pnand %p4879_p12, %p5870_p5  ;;  %s505_s25 = sshll.u32 %s5138_s24, 4  ;;  %s5317_s25 = int_to_ptr.vmem [resolvable:$true] %s505_s25 }
  0x21   : > { %p5000_p1 = scmp.ne.s32.totalorder %s495_s0, %s4999_s29  ;;  %p5007_p6 = scmp.lt.s32.totalorder %s495_s0, %s495_s0 }
  0x22   : > { %p4990_p0 = pneg %p5313_p13  ;;  %p5008_p7 = scmp.lt.s32.totalorder %s4999_s29, %s4999_s29 }
  0x24   : > { %p5002_p2 = pnand %p5000_p1, %p4990_p0  ;;  %p5009_p9 = por %p5008_p7, %p5007_p6 }
  0x26   : > { %p5003_p3 = pneg %p5002_p2 }
  0x28   : > { %p5010_p12 = pnand %p5009_p9, %p5003_p3 }
  0x2a   : > { %5013 = shalt.err (!%p5010_p12)
}
  0x2b   : > { %s5891_s24 = sld [smem:[#allocation26_spill]]  ;;  %s5025_s19 = scalar_lea.vmem %s526_s20, 16 }
  0x2c   : > { %p5026_p5 = scmp.ne.s32.totalorder %s526_s20, %s5025_s19  ;;  %s5032_s27 = scalar_lea.vmem %s526_s20, 32 }
  0x2d   : > { %p5033_p1 = scmp.lt.s32.totalorder %s526_s20, %s526_s20  ;;  %p5034_p2 = scmp.lt.s32.totalorder %s5032_s27, %s5025_s19 }
  0x2e   : > { %p5028_p10 = pnand %p5026_p5, %p4990_p0 }
  0x2f   : > { %p5035_p11 = por %p5034_p2, %p5033_p1 }
  0x30   : > { %p5029_p8 = pneg %p5028_p10 }
  0x31   : > { %4882 = dma.hbm_to_vmem [thread:$0]  (!%p5313_p13), %s5891_s24, 64, %s495_s0, [#allocation8]  }
  0x32   : > { %p5036_p6 = pnand %p5035_p11, %p5029_p8 }
  0x34   : > { %5039 = shalt.err (!%p5036_p6)
}
  0x35   : > { %s5892_s8 = sld [smem:[#allocation28_spill]]  ;;  %s5051_s2 = scalar_lea.vmem %s5317_s25, 16 }
  0x36   : > { %p5052_p5 = scmp.ne.s32.totalorder %s5317_s25, %s5051_s2  ;;  %s5058_s19 = scalar_lea.vmem %s5317_s25, 32 }
  0x37   : > { %p5059_p8 = scmp.lt.s32.totalorder %s5317_s25, %s5317_s25  ;;  %p5060_p11 = scmp.lt.s32.totalorder %s5058_s19, %s5051_s2 }
  0x38   : > { %p5054_p10 = pnand %p5052_p5, %p4990_p0 }
  0x39   : > { %p5061_p7 = por %p5060_p11, %p5059_p8 }
  0x3a   : > { %p5055_p3 = pneg %p5054_p10 }
  0x3b   : > { %4888 = dma.hbm_to_vmem [thread:$0]  (!%p5313_p13), %s5892_s8, 16, %s526_s20, [#allocation11]  }
  0x3c   : > { %p5062_p9 = pnand %p5061_p7, %p5055_p3 }
  0x3e   : > { %5065 = shalt.err (!%p5062_p9)
}
  0x3f   : > { %s5893_s4 = sld [smem:[#allocation27_spill]]  ;;  %s5139_s0 = smov [#allocation12]  }
  0x40   : > { %s545_s20 = sshll.u32 %s5139_s0, 4  ;;  %s546_s20 = int_to_ptr.vmem [resolvable:$true] %s545_s20 }
  0x41   : > { %s5077_s30 = scalar_lea.vmem %s546_s20, 16  ;;  %s5084_s24 = scalar_lea.vmem %s546_s20, 32 }
  0x42   : > { %p5078_p12 = scmp.ne.s32.totalorder %s546_s20, %s5077_s30  ;;  %p5085_p6 = scmp.lt.s32.totalorder %s546_s20, %s546_s20 }
  0x43   : > { %p5086_p5 = scmp.lt.s32.totalorder %s5084_s24, %s5077_s30 }
  0x44   : > { %p5080_p1 = pnand %p5078_p12, %p4990_p0 }
  0x45   : > { %4885 = dma.hbm_to_vmem [thread:$0]  (!%p5313_p13), %s5893_s4, 16, %s5317_s25, [#allocation8]  }
  0x46   : > { %p5081_p2 = pneg %p5080_p1  ;;  %p5087_p10 = por %p5086_p5, %p5085_p6 }
  0x48   : > { %p5088_p3 = pnand %p5087_p10, %p5081_p2 }
  0x4a   : > { %5091 = shalt.err (!%p5088_p3)
}
  0x4b   : > { %s5894_s12 = sld [smem:[#allocation29_spill]]  ;;  %p4437_p8 = scmp.ge.s32.totalorder %s5134_s22, 2 }
  0x4d   : > { %570 = sbr.rel (%p4437_p8) target bundleno = 124 (0x7c), region = 80 }
  0x51   : > { %4891 = dma.hbm_to_vmem [thread:$0]  (!%p5313_p13), %s5894_s12, 16, %s546_s20, [#allocation11]  }
  0x52   : > { %573 = sbr.rel (!%p5287_p4) target bundleno = 96 (0x60), region = 84  ;;  %s575_s25 = sand.u32 (%p5287_p4), 1, %s5130_s1  }
  0x53   : > { %s4534_s19 = sshll.u32 (%p5287_p4), %s5134_s22, 5  ;;  %s4438_s18 = sshll.u32 (%p5287_p4), %s575_s25, 6 }
  0x54   : > { %s5895_s30 = sld [smem:[#allocation23_spill]] (%p5287_p4)  ;;  %s577_s23 = scalar_lea.vmem (%p5287_p4), [#allocation3], %s4438_s18 }
  0x5a   : > { %s580_s24 = scalar_lea.vmem %s5895_s30, %s4534_s19 }
  0x5b   : > { %v623_v1 = vld [vmem:[%s580_s24] sm:$0xff]  ;;  %v625_v2 = vld [vmem:[%s580_s24 + $0x8] sm:$0xff]  ;;  %v627_v3 = vld [vmem:[%s580_s24 + $0x10] sm:$0xff] }
  0x5c   : > { %624 = vst [vmem:[%s577_s23] sm:$0xff] %v623_v1  ;;  %626 = vst [vmem:[%s577_s23 + $0x8] sm:$0xff] %v625_v2  ;;  %v629_v4 = vld [vmem:[%s580_s24 + $0x18] sm:$0xff]  ;;  %v631_v5 = vld [vmem:[%s580_s24 + $0x40] sm:$0xff] }
  0x5d   : > { %628 = vst [vmem:[%s577_s23 + $0x10] sm:$0xff] %v627_v3  ;;  %v633_v6 = vld [vmem:[%s580_s24 + $0x48] sm:$0xff]  ;;  %630 = vst [vmem:[%s577_s23 + $0x18] sm:$0xff] %v629_v4  ;;  %v635_v7 = vld [vmem:[%s580_s24 + $0x50] sm:$0xff] }
  0x5e   : > { %632 = vst [vmem:[%s577_s23 + $0x20] sm:$0xff] %v631_v5  ;;  %634 = vst [vmem:[%s577_s23 + $0x28] sm:$0xff] %v633_v6  ;;  %v637_v8 = vld [vmem:[%s580_s24 + $0x58] sm:$0xff] }
  0x5f   : > { %636 = vst [vmem:[%s577_s23 + $0x30] sm:$0xff] %v635_v7  ;;  %638 = vst [vmem:[%s577_s23 + $0x38] sm:$0xff] %v637_v8 }
  0x60 PF: > { %644 = sbr.rel (!%p5287_p4) target bundleno = 110 (0x6e), region = 122  ;;  %s646_s20 = sand.u32 (%p5287_p4), 1, %s5130_s1  }
  0x61   : > { %s4535_s29 = sshll.u32 (%p5287_p4), %s5134_s22, 5  ;;  %s4441_s2 = sshll.u32 (%p5287_p4), %s646_s20, 6 }
  0x62   : > { %s5896_s18 = sld [smem:[#allocation24_spill]] (%p5287_p4)  ;;  %s648_s0 = scalar_lea.vmem (%p5287_p4), [#allocation4], %s4441_s2 }
  0x68   : > { %s651_s27 = scalar_lea.vmem %s5896_s18, %s4535_s29 }
  0x69   : > { %v694_v9 = vld [vmem:[%s651_s27] sm:$0xff]  ;;  %v696_v10 = vld [vmem:[%s651_s27 + $0x8] sm:$0xff]  ;;  %v698_v11 = vld [vmem:[%s651_s27 + $0x10] sm:$0xff] }
  0x6a   : > { %695 = vst [vmem:[%s648_s0] sm:$0xff] %v694_v9  ;;  %697 = vst [vmem:[%s648_s0 + $0x8] sm:$0xff] %v696_v10  ;;  %v700_v12 = vld [vmem:[%s651_s27 + $0x18] sm:$0xff]  ;;  %v702_v13 = vld [vmem:[%s651_s27 + $0x40] sm:$0xff] }
  0x6b   : > { %699 = vst [vmem:[%s648_s0 + $0x10] sm:$0xff] %v698_v11  ;;  %v704_v14 = vld [vmem:[%s651_s27 + $0x48] sm:$0xff]  ;;  %701 = vst [vmem:[%s648_s0 + $0x18] sm:$0xff] %v700_v12  ;;  %v706_v15 = vld [vmem:[%s651_s27 + $0x50] sm:$0xff] }
  0x6c   : > { %703 = vst [vmem:[%s648_s0 + $0x20] sm:$0xff] %v702_v13  ;;  %705 = vst [vmem:[%s648_s0 + $0x28] sm:$0xff] %v704_v14  ;;  %v708_v16 = vld [vmem:[%s651_s27 + $0x58] sm:$0xff] }
  0x6d   : > { %707 = vst [vmem:[%s648_s0 + $0x30] sm:$0xff] %v706_v15  ;;  %709 = vst [vmem:[%s648_s0 + $0x38] sm:$0xff] %v708_v16 }
  0x6e PF: > { %s716_s30 = sand.u32 1, %s5130_s1   ;;  %s4536_s24 = sshll.u32 %s5134_s22, 9 }
  0x6f   : > { %s4444_s23 = sshll.u32 %s716_s30, 6  ;;  %s5897_s2 = sld [smem:[#allocation25_spill]] }
  0x70   : > { %s4862_s19 = scalar_select %p5287_p4, [#allocation0], [#allocation16] }
  0x71   : > { %s720_s18 = scalar_lea.vmem [#allocation5], %s4444_s23  ;;  %s5140_s4 = smov 1024  }
  0x72   : > { %s739_s27 = sshll.u32 %s720_s18, 4  ;;  %s731_s0 = sld [smem:[%s4862_s19]]   ;;  %s740_s27 = int_to_ptr.vmem [resolvable:$true] %s739_s27 }
  0x73   : > { %4863 = sst [smem:[#allocation15]] (%p5287_p4), %s5140_s4  ;;  %s5141_s8 = smov 512  }
  0x74   : > { %4864 = sst [smem:[#allocation15 + $0x1]] (%p5287_p4), %s5141_s8  ;;  %s5142_s22 = smov 4  }
  0x75   : > { %s726_s25 = scalar_lea.hbm %s5897_s2, %s4536_s24  ;;  %4865 = sst [smem:[#allocation15 + $0x2]] (%p5287_p4), %s5142_s22 }
  0x76   : > { %s5143_s12 = smov 128   ;;  %s5144_s23 = smov 8  }
  0x77   : > { %4866 = sst [smem:[#allocation15 + $0x3]] (%p5287_p4), %s5143_s12  ;;  %s717_s29 = scalar_lea.sflag [#allocation6], %s716_s30 }
  0x78   : > { %4867 = sst [smem:[#allocation15 + $0x4]] (%p5287_p4), %s5143_s12  ;;  %s4447_s24 = sshll.u32 %s731_s0, 26 }
  0x79   : > { %4868 = sst [smem:[#allocation15 + $0x5]] (%p5287_p4), %s5144_s23  ;;  %s4448_s20 = sadd.s32 134217728, %s4447_s24 }
  0x7a   : > { %s5145_s2 = smov 131072  }
  0x7b   : > { %4869 = dma.general (%p5287_p4), %s726_s25, 1024, %s740_s27, %s717_s29, %s5145_s2, [#allocation15], %s4448_s20, 0  }
  0x7c PF: > { %p5898_p13 = scmp.ne.s32.totalorder %s5889_s28, 0 }
  0x7d   : > { %s767_s4 = sand.u32 (!%p5898_p13), 1, %s5126_s21   ;;  %p5899_p0 = scmp.ne.s32.totalorder (!%p5898_p13), %s5886_s26, 0 }
  0x7e   : > { %764 = sbr.rel (%p5898_p13) target bundleno = 3157 (0xc55), region = 164  ;;  %s5398_s8 = sshll.u32 (!%p5898_p13), %s767_s4, 6 }
  0x7f   : > { %s5401_s12 = scalar_lea.vmem (!%p5898_p13), [#allocation3], %s5398_s8  ;;  %s776_s19 = scalar_lea.vmem (!%p5898_p13), [#allocation4], %s5398_s8 }
  0x80   : > { %s781_s18 = scalar_lea.sflag (!%p5898_p13), [#allocation6], %s767_s4  ;;  %s5405_s30 = scalar_lea.vmem (!%p5898_p13), [#allocation5], %s5398_s8 }
  0x83   : > { %5109 = dma.done.wait (%p5899_p0), %s781_s18, 1024  }
  0x84   : > { %5111 = vsyncadd (%p5899_p0), %s781_s18, 4294966272  ;;  %p5900_p4 = scmp.eq.s32.totalorder %s5272_s16, 0 }
  0x86   : > { %5113 = dma.done.wait (%p5900_p4), [#allocation8], 80   ;;  %p5901_p11 = pmov %p5900_p4 }
  0x87   : > { %p5902_p7 = pmov %p5900_p4 }
  0x88   : > { %5115 = vsyncadd (%p5901_p11), [#allocation8], 4294967216 }
  0x89   : > { %5117 = dma.done.wait (%p5902_p7), [#allocation11], 32   ;;  %p5903_p9 = pmov %p5900_p4 }
  0x8a   : > { %vm957_vm0 = vcmask 1043456   ;;  %v874_v17 = vld [vmem:[%s776_s19] sm:$0xff]  ;;  %v876_v18 = vld [vmem:[%s776_s19 + $0x10] sm:$0xff]  ;;  %s5146_s3 = smov 3   ;;  %v875_v20 = vld [vmem:[%s776_s19 + $0x8] sm:$0xff]  ;;  %vm922_vm1 = vcmask 23552  }
  0x8b   : > { %5119 = vsyncadd (%p5903_p9), [#allocation11], 4294967264  ;;  %898 = vrot.lane.b32.xlu0 %v874_v17, %s5146_s3  ;;  %902 = vrot.lane.b32.xlu1 %v876_v18, %s5146_s3  ;;  %v931_v19 = vld [vmem:[#allocation7] sm:$0xf]  ;;  %v877_v21 = vld [vmem:[%s776_s19 + $0x18] sm:$0xff]  ;;  %vm932_vm2 = vcmask 31744  }
  0x8c   : > { %4638 = vmatprep.subr.msk.mxu0 %vm957_vm0, %v931_v19  ;;  %v878_v22 = vld [vmem:[%s776_s19 + $0x20] sm:$0xff]  ;;  %v879_v23 = vld [vmem:[%s776_s19 + $0x28] sm:$0xff]  ;;  %v880_v24 = vld [vmem:[%s776_s19 + $0x30] sm:$0xff]  ;;  %v5147_v50 = vmov 0.0   ;;  %vm5148_vm3 = vmmov 0   ;;  %vm1073_vm4 = vcmask 64512  }
  0x8d   : > { %4639 = vmatpush3.msk.msra.mxu0 %vm957_vm0, %v931_v19  ;;  %v881_v25 = vld [vmem:[%s776_s19 + $0x38] sm:$0xff]  ;;  %v866_v26 = vld [vmem:[%s5401_s12] sm:$0xff]  ;;  %v868_v30 = vld [vmem:[%s5401_s12 + $0x10] sm:$0xff]  ;;  %4652 = vmatprep.subr.mxu1 %v5147_v50  ;;  %vm3289_vm5 = vcmask 15360   ;;  %vm3432_vm6 = vcmask 1041408   ;;  %vm4108_vm7 = vcmask 7168  }
  0x8e   : > { %v867_v31 = vld [vmem:[%s5401_s12 + $0x8] sm:$0xff]  ;;  %v869_v35 = vld [vmem:[%s5401_s12 + $0x18] sm:$0xff]  ;;  %v870_v37 = vld [vmem:[%s5401_s12 + $0x20] sm:$0xff]  ;;  %4672 = vmatprep.subr.mxu0 %v5147_v50  ;;  %4654 = vmatprep.mubr.msk.f32.mxu1 %vm5148_vm3, %v5147_v50  ;;  %s5904_s22 = sld [smem:[#allocation30_spill]]  ;;  %s5803_s24 = scalar_lea.vmem [#allocation13], %s5398_s8 }
  0x8f   : > { %900 = vrot.lane.b32.xlu0 %v875_v20, %s5146_s3  ;;  %904 = vrot.lane.b32.xlu1 %v877_v21, %s5146_s3  ;;  %v871_v41 = vld [vmem:[%s5401_s12 + $0x28] sm:$0xff]  ;;  %v872_v43 = vld [vmem:[%s5401_s12 + $0x30] sm:$0xff]  ;;  %v4467_v5 = vld [vmem:[#allocation9] ss:$0 sm:$0xff]  ;;  %s5905_s8 = sld [smem:[#allocation22_spill]] }
  0x90   : > { %v873_v47 = vld [vmem:[%s5401_s12 + $0x38] sm:$0xff]  ;;  %v5452_v52 = vld [vmem:[%s5405_s30] sm:$0xff]  ;;  %v5460_v55 = vld [vmem:[%s5405_s30 + $0x8] sm:$0xff] }
  0x91   : > { %v5468_v58 = vld [vmem:[%s5405_s30 + $0x10] sm:$0xff]  ;;  %v5471_v59 = vld [vmem:[%s5405_s30 + $0x20] sm:$0xff]  ;;  %v5480_v62 = vld [vmem:[%s5405_s30 + $0x18] sm:$0xff] }
  0x92   : > { %v5483_v63 = vld [vmem:[%s5405_s30 + $0x30] sm:$0xff]  ;;  %v5497_v1 = vld [vmem:[%s5405_s30 + $0x28] sm:$0xff]  ;;  %v5505_v2 = vld [vmem:[%s5405_s30 + $0x38] sm:$0xff] }
  0x93   : > { %906 = vrot.lane.b32.xlu0 %v878_v22, %s5146_s3  ;;  %908 = vrot.lane.b32.xlu1 %v879_v23, %s5146_s3 }
  0x95   : > { %p5906_p12 = scmp.ne.s32.totalorder %s5905_s8, 0 }
  0x96   : > { %s4537_s23 = sshll.u32 (%p5906_p12), %s5272_s16, 5  ;;  %s5907_s2 = sld [smem:[#allocation31_spill]] (%p5906_p12) }
  0x97   : > { %910 = vrot.lane.b32.xlu0 %v880_v24, %s5146_s3  ;;  %912 = vrot.lane.b32.xlu1 %v881_v25, %s5146_s3 }
  0x9c   : > { %s4233_s4 = scalar_lea.vmem (%p5906_p12), %s5907_s2, %s4537_s23 }
  0xfd   : > { %v899_v27 = vpop.permute.xlu0 %898  ;;  %v903_v28 = vpop.permute.xlu1 %902 }
  0xfe   : > { %v923_v29 = vsel %vm922_vm1, %v866_v26, %v899_v27  ;;  %v925_v32 = vsel %vm922_vm1, %v868_v30, %v903_v28 }
  0xff   : > { %4640 = vmatprep.mubr.msk.f32.mxu0 %vm932_vm2, %v923_v29 }
 0x101   : > { %v901_v33 = vpop.permute.xlu0 %900  ;;  %v905_v34 = vpop.permute.xlu1 %904 }
 0x102   : > { %v924_v36 = vsel %vm922_vm1, %v867_v31, %v901_v33  ;;  %v926_v38 = vsel %vm922_vm1, %v869_v35, %v905_v34 }
 0x103   : > { %4641 = vmatmul.mubr.msk.f32.vlgmr.msra.gmra.mxu0 %vm932_vm2, %v924_v36 }
 0x104   : > { %4643 = vmatprep.mubr.msk.f32.mxu0 %vm932_vm2, %v925_v32 }
 0x105   : > { %v907_v39 = vpop.permute.xlu0 %906  ;;  %v909_v40 = vpop.permute.xlu1 %908 }
 0x106   : > { %v927_v42 = vsel %vm922_vm1, %v870_v37, %v907_v39  ;;  %v928_v44 = vsel %vm922_vm1, %v871_v41, %v909_v40  ;;  %v5149_v40 = vmov 0  }
 0x107   : > { %4644 = vmatmul.mubr.msk.f32.gmra.mxu0 %vm932_vm2, %v926_v38  ;;  %4946 = vset.pattern.permute.xlu1 %v5149_v40 }
 0x108   : > { %4646 = vmatprep.mubr.msk.f32.mxu0 %vm932_vm2, %v927_v42  ;;  %4947 = vset.pattern.permute.xlu0 %v5149_v40 }
 0x109   : > { %v911_v45 = vpop.permute.xlu0 %910  ;;  %v913_v46 = vpop.permute.xlu1 %912 }
 0x10a   : > { %v929_v48 = vsel %vm922_vm1, %v872_v43, %v911_v45  ;;  %v930_v49 = vsel %vm922_vm1, %v873_v47, %v913_v46 }
 0x10b   : > { %4647 = vmatmul.mubr.msk.f32.gmra.mxu0 %vm932_vm2, %v928_v44 }
 0x10c   : > { %4649 = vmatprep.mubr.msk.f32.mxu0 %vm932_vm2, %v929_v48 }
 0x10f   : > { %4650 = vmatmul.mubr.msk.f32.gmra.mxu0 %vm932_vm2, %v930_v49 }
 0x110   : > { %4674 = vmatprep.mubr.msk.f32.mxu0 %vm5148_vm3, %v5147_v50 }
 0x1c3   : > { %v4642_v51 = vpop.f32.mrf.mxu0 }
 0x1c5   : > { %v1027_v53 = vpop.f32.mrf.mxu0 }
 0x1c6   : > { %4653 = vmatpush3.msra.mxu1 %v1027_v53 }
 0x1c7   : > { %v4645_v54 = vpop.f32.mrf.mxu0  ;;  %4655 = vmatmul.mubr.msk.f32.vlgmr.msra.gmra.mxu1 %vm1073_vm4, %v5452_v52  ;;  %4657 = vmatprep.subr.mxu1 %v5147_v50 }
 0x1c8   : > { %4658 = vmatpush3.msra.mxu1 %v4642_v51  ;;  %4659 = vmatprep.mubr.msk.f32.mxu1 %vm5148_vm3, %v5147_v50 }
 0x1c9   : > { %v1037_v56 = vpop.f32.mrf.mxu0  ;;  %4662 = vmatprep.subr.mxu1 %v5147_v50 }
 0x1cb   : > { %v4648_v57 = vpop.f32.mrf.mxu0  ;;  %4660 = vmatmul.mubr.msk.f32.vlgmr.msra.gmra.mxu1 %vm1073_vm4, %v5460_v55 }
 0x1cc   : > { %4663 = vmatpush3.msra.mxu1 %v1037_v56  ;;  %4664 = vmatprep.mubr.msk.f32.mxu1 %vm5148_vm3, %v5147_v50 }
 0x1cd   : > { %v1047_v60 = vpop.f32.mrf.mxu0  ;;  %4667 = vmatprep.subr.mxu1 %v5147_v50 }
 0x1ce   : > { %4673 = vmatpush3.msra.mxu0 %v1047_v60 }
 0x1cf   : > { %v4651_v61 = vpop.f32.mrf.mxu0  ;;  %4665 = vmatmul.mubr.msk.f32.vlgmr.msra.gmra.mxu1 %vm1073_vm4, %v5468_v58  ;;  %4675 = vmatmul.mubr.msk.f32.vlgmr.msra.gmra.mxu0 %vm1073_vm4, %v5471_v59 }
 0x1d0   : > { %4668 = vmatpush3.msra.mxu1 %v4645_v54  ;;  %4682 = vmatprep.subr.mxu0 %v5147_v50 }
 0x1d1   : > { %v1057_v0 = vpop.f32.mrf.mxu0  ;;  %4669 = vmatprep.mubr.msk.f32.mxu1 %vm5148_vm3, %v5147_v50  ;;  %4677 = vmatprep.subr.mxu1 %v5147_v50 }
 0x1d2   : > { %4683 = vmatpush3.msra.mxu0 %v1057_v0  ;;  %4684 = vmatprep.mubr.msk.f32.mxu0 %vm5148_vm3, %v5147_v50 }
 0x1d3   : > { %4670 = vmatmul.mubr.msk.f32.vlgmr.msra.gmra.mxu1 %vm1073_vm4, %v5480_v62  ;;  %4685 = vmatmul.mubr.msk.f32.vlgmr.msra.gmra.mxu0 %vm1073_vm4, %v5483_v63 }
 0x1d4   : > { %4678 = vmatpush3.msra.mxu1 %v4648_v57  ;;  %4679 = vmatprep.mubr.msk.f32.mxu1 %vm5148_vm3, %v5147_v50 }
 0x1d5   : > { %4687 = vmatprep.subr.mxu1 %v5147_v50 }
 0x1d7   : > { %4680 = vmatmul.mubr.msk.f32.vlgmr.msra.gmra.mxu1 %vm1073_vm4, %v5497_v1 }
 0x1d8   : > { %4688 = vmatpush3.msra.mxu1 %v4651_v61  ;;  %4689 = vmatprep.mubr.msk.f32.mxu1 %vm5148_vm3, %v5147_v50 }
 0x1d9   : > { %4706 = vmatprep.subr.mxu1 %v5147_v50 }
 0x1db   : > { %4690 = vmatmul.mubr.msk.f32.vlgmr.msra.gmra.mxu1 %vm1073_vm4, %v5505_v2 }
 0x1dc   : > { %4708 = vmatprep.mubr.msk.f32.mxu1 %vm5148_vm3, %v5147_v50 }
 0x287   : > { %v1143_v3 = vpop.f32.mrf.mxu1 }
 0x288   : > { %v1144_v8 = vadd.f32 %v4467_v5, %v1143_v3 }
 0x289   : > { %v4656_v4 = vpop.f32.mrf.mxu1 }
 0x28a   : > { %v1658_v15 = vsel %vm1073_vm4, %v1144_v8, 0.0 }
 0x28b   : > { %v1216_v6 = vpop.f32.mrf.mxu1 }
 0x28c   : > { %v1217_v23 = vadd.f32 %v4467_v5, %v1216_v6 }
 0x28d   : > { %v4661_v7 = vpop.f32.mrf.mxu1 }
 0x28e   : > { %v1663_v31 = vsel %vm1073_vm4, %v1217_v23, 0.0 }
 0x28f   : > { %v1289_v9 = vpop.f32.mrf.mxu1  ;;  %v1435_v10 = vpop.f32.mrf.mxu0 }
 0x290   : > { %v1436_v11 = vadd.f32 %v4467_v5, %v1435_v10  ;;  %v1290_v14 = vadd.f32 %v4467_v5, %v1289_v9 }
 0x291   : > { %v4666_v12 = vpop.f32.mrf.mxu1  ;;  %v4676_v13 = vpop.f32.mrf.mxu0 }
 0x292   : > { %v1659_v16 = vsel %vm1073_vm4, %v1436_v11, 0.0  ;;  %v1668_v24 = vsel %vm1073_vm4, %v1290_v14, 0.0 }
 0x293   : > { %v1362_v17 = vpop.f32.mrf.mxu1  ;;  %v1581_v18 = vpop.f32.mrf.mxu0  ;;  %v1660_v19 = vadd.f32 %v1659_v16, %v1658_v15 }
 0x294   : > { %v1582_v20 = vadd.f32 %v4467_v5, %v1581_v18  ;;  %v1363_v30 = vadd.f32 %v4467_v5, %v1362_v17 }
 0x295   : > { %v4671_v21 = vpop.f32.mrf.mxu1  ;;  %1661 = vadd.xlane.f32.xlu0 %v1660_v19  ;;  %v4686_v22 = vpop.f32.mrf.mxu0 }
 0x296   : > { %v1669_v25 = vsel %vm1073_vm4, %v1582_v20, 0.0  ;;  %v1673_v37 = vsel %vm1073_vm4, %v1363_v30, 0.0  ;;  %v1739_v22 = vld [vmem:[%s5853_s5] sm:$0xff] }
 0x297   : > { %v1508_v26 = vpop.f32.mrf.mxu1  ;;  %v1670_v27 = vadd.f32 %v1669_v25, %v1668_v24  ;;  %v1775_v24 = vld [vmem:[%s5855_s7] sm:$0xff] }
 0x298   : > { %v1509_v28 = vadd.f32 %v4467_v5, %v1508_v26  ;;  %4692 = vmatprep.subr.mxu0 %v1775_v24 }
 0x299   : > { %v4681_v29 = vpop.f32.mrf.mxu1  ;;  %1671 = vadd.xlane.f32.xlu0 %v1670_v27  ;;  %4693 = vmatpush3.msra.mxu0 %v1775_v24 }
 0x29a   : > { %v1664_v32 = vsel %vm1073_vm4, %v1509_v28, 0.0  ;;  %4726 = vmatprep.subr.mxu0 %v5147_v50 }
 0x29b   : > { %v1654_v33 = vpop.f32.mrf.mxu1  ;;  %v1665_v34 = vadd.f32 %v1664_v32, %v1663_v31 }
 0x29c   : > { %v1655_v35 = vadd.f32 %v4467_v5, %v1654_v33 }
 0x29d   : > { %1666 = vadd.xlane.f32.xlu1 %v1665_v34  ;;  %v4691_v36 = vpop.f32.mrf.mxu1 }
 0x29e   : > { %v1674_v38 = vsel %vm1073_vm4, %v1655_v35, 0.0 }
 0x29f   : > { %v1675_v39 = vadd.f32 %v1674_v38, %v1673_v37 }
 0x2a1   : > { %1676 = vadd.xlane.f32.xlu0 %v1675_v39 }
 0x31e   : > { %v1662_v41 = vpop.xlane.xlu0 %1661 }
 0x31f   : > { %v1679_v42 = vmul.f32 0.0625, %v1662_v41 }
 0x321   : > { %v5520_v43 = vsub.f32 %v1144_v8, %v1679_v42  ;;  %v5522_v44 = vsub.f32 %v1436_v11, %v1679_v42 }
 0x322   : > { %v1672_v45 = vpop.xlane.xlu0 %1671 }
 0x323   : > { %v1681_v46 = vmul.f32 0.0625, %v1672_v45  ;;  %v1691_v47 = vmul.f32 %v5520_v43, %v5520_v43  ;;  %v1695_v48 = vmul.f32 %v5522_v44, %v5522_v44 }
 0x325   : > { %v5528_v49 = vsub.f32 %v1290_v14, %v1681_v46  ;;  %v5530_v51 = vsub.f32 %v1582_v20, %v1681_v46  ;;  %v1699_v53 = vsel %vm1073_vm4, %v1691_v47, 0.0  ;;  %v1700_v54 = vsel %vm1073_vm4, %v1695_v48, 0.0 }
 0x326   : > { %v1667_v56 = vpop.xlane.xlu1 %1666  ;;  %v1701_v57 = vadd.f32 %v1700_v54, %v1699_v53 }
 0x327   : > { %v1680_v60 = vmul.f32 0.0625, %v1667_v56  ;;  %v1693_v61 = vmul.f32 %v5528_v49, %v5528_v49  ;;  %v1697_v0 = vmul.f32 %v5530_v51, %v5530_v51 }
 0x328   : > { %1702 = vadd.xlane.f32.xlu1 %v1701_v57 }
 0x329   : > { %v1684_v3 = vsub.f32 %v1217_v23, %v1680_v60  ;;  %v1688_v4 = vsub.f32 %v1509_v28, %v1680_v60  ;;  %v1709_v5 = vsel %vm1073_vm4, %v1693_v61, 0.0  ;;  %v1710_v6 = vsel %vm1073_vm4, %v1697_v0, 0.0  ;;  %v1753_v23 = vld [vmem:[%s5854_s6] sm:$0xff] }
 0x32a   : > { %v1677_v7 = vpop.xlane.xlu0 %1676  ;;  %v1711_v8 = vadd.f32 %v1710_v6, %v1709_v5 }
 0x32b   : > { %v1682_v9 = vmul.f32 0.0625, %v1677_v7  ;;  %v1692_v10 = vmul.f32 %v1684_v3, %v1684_v3  ;;  %v1696_v11 = vmul.f32 %v1688_v4, %v1688_v4 }
 0x32c   : > { %1712 = vadd.xlane.f32.xlu1 %v1711_v8 }
 0x32d   : > { %v1686_v12 = vsub.f32 %v1363_v30, %v1682_v9  ;;  %v1690_v13 = vsub.f32 %v1655_v35, %v1682_v9  ;;  %v1704_v14 = vsel %vm1073_vm4, %v1692_v10, 0.0  ;;  %v1705_v15 = vsel %vm1073_vm4, %v1696_v11, 0.0 }
 0x32e   : > { %v1706_v16 = vadd.f32 %v1705_v15, %v1704_v14 }
 0x32f   : > { %v1694_v17 = vmul.f32 %v1686_v12, %v1686_v12  ;;  %v1698_v18 = vmul.f32 %v1690_v13, %v1690_v13 }
 0x330   : > { %1707 = vadd.xlane.f32.xlu0 %v1706_v16 }
 0x331   : > { %v1714_v19 = vsel %vm1073_vm4, %v1694_v17, 0.0  ;;  %v1715_v20 = vsel %vm1073_vm4, %v1698_v18, 0.0 }
 0x332   : > { %v1716_v21 = vadd.f32 %v1715_v20, %v1714_v19 }
 0x334   : > { %1717 = vadd.xlane.f32.xlu0 %v1716_v21 }
 0x33d   : > { %1742 = vperm.xlu1 %4946, %v1739_v22  }
 0x34a   : > { %1756 = vperm.xlu0 %4947, %v1753_v23  }
 0x3b1   : > { %v1703_v25 = vpop.xlane.xlu1 %1702 }
 0x3b2   : > { %v1719_v26 = vmul.f32 0.0625, %v1703_v25 }
 0x3b4   : > { %v1723_v27 = vadd.f32 1e-05, %v1719_v26 }
 0x3b5   : > { %v1713_v28 = vpop.xlane.xlu1 %1712 }
 0x3b6   : > { %4948 = vrsqrt.f32 %v1723_v27  ;;  %v1721_v29 = vmul.f32 0.0625, %v1713_v28 }
 0x3b8   : > { %v1725_v30 = vadd.f32 1e-05, %v1721_v29 }
 0x3b9   : > { %v1708_v31 = vpop.xlane.xlu0 %1707  ;;  %v1743_v38 = vpop.permute.xlu1 %1742 }
 0x3ba   : > { %4950 = vrsqrt.f32 %v1725_v30  ;;  %v1720_v32 = vmul.f32 0.0625, %v1708_v31  ;;  %v4484_v30 = vld [vmem:[#allocation10] ss:$0 sm:$0xff] }
 0x3bc   : > { %v1724_v33 = vadd.f32 1e-05, %v1720_v32 }
 0x3bd   : > { %v1718_v34 = vpop.xlane.xlu0 %1717 }
 0x3be   : > { %4952 = vrsqrt.f32 %v1724_v33  ;;  %v1722_v35 = vmul.f32 0.0625, %v1718_v34 }
 0x3c0   : > { %v1726_v36 = vadd.f32 1e-05, %v1722_v35 }
 0x3c2   : > { %4954 = vrsqrt.f32 %v1726_v36 }
 0x3c3   : > { %v4949_v37 = vpop.eup %4948 }
 0x3c4   : > { %v1731_v39 = vmul.f32 %v4949_v37, %v5520_v43  ;;  %v1735_v54 = vmul.f32 %v4949_v37, %v5522_v44 }
 0x3c5   : > { %v1757_v40 = vpop.permute.xlu0 %1756 }
 0x3c6   : > { %v1745_v41 = vmul.f32 %v1743_v38, %v1731_v39  ;;  %v1749_v5 = vmul.f32 %v1743_v38, %v1735_v54 }
 0x3c7   : > { %v4951_v42 = vpop.eup %4950 }
 0x3c8   : > { %v1759_v45 = vadd.f32 %v1757_v40, %v1745_v41  ;;  %v1733_v46 = vmul.f32 %v4951_v42, %v5528_v49  ;;  %v1737_v43 = vmul.f32 %v4951_v42, %v5530_v51  ;;  %v1763_v14 = vadd.f32 %v1757_v40, %v1749_v5 }
 0x3ca   : > { %v1767_v47 = vmax.f32 %v1759_v45, 0.0  ;;  %v1747_v53 = vmul.f32 %v1743_v38, %v1733_v46  ;;  %v1751_v15 = vmul.f32 %v1743_v38, %v1737_v43  ;;  %v1771_v17 = vmax.f32 %v1763_v14, 0.0 }
 0x3cb   : > { %v4953_v48 = vpop.eup %4952 }
 0x3cc   : > { %v1732_v56 = vmul.f32 %v4953_v48, %v1684_v3  ;;  %4694 = vmatprep.mubr.msk.f32.mxu0 %vm1073_vm4, %v1767_v47  ;;  %v1736_v60 = vmul.f32 %v4953_v48, %v1688_v4  ;;  %v1761_v0 = vadd.f32 %v1757_v40, %v1747_v53  ;;  %v1765_v18 = vadd.f32 %v1757_v40, %v1751_v15 }
 0x3ce   : > { %v1746_v57 = vmul.f32 %v1743_v38, %v1732_v56  ;;  %v1750_v49 = vmul.f32 %v1743_v38, %v1736_v60  ;;  %v1769_v11 = vmax.f32 %v1761_v0, 0.0 }
 0x3cf   : > { %v4955_v61 = vpop.eup %4954 }
 0x3d0   : > { %v1760_v6 = vadd.f32 %v1757_v40, %v1746_v57  ;;  %v1734_v7 = vmul.f32 %v4955_v61, %v1686_v12  ;;  %v1738_v10 = vmul.f32 %v4955_v61, %v1690_v13  ;;  %v1764_v4 = vadd.f32 %v1757_v40, %v1750_v49 }
 0x3d1   : > { %v1773_v13 = vmax.f32 %v1765_v18, 0.0 }
 0x3d2   : > { %v1768_v8 = vmax.f32 %v1760_v6, 0.0  ;;  %v1748_v9 = vmul.f32 %v1743_v38, %v1734_v7  ;;  %v1752_v16 = vmul.f32 %v1743_v38, %v1738_v10  ;;  %v1772_v51 = vmax.f32 %v1764_v4, 0.0 }
 0x3d4   : > { %4695 = vmatmul.mubr.msk.f32.vlgmr.msra.gmra.mxu0 %vm1073_vm4, %v1768_v8  ;;  %v1762_v44 = vadd.f32 %v1757_v40, %v1748_v9  ;;  %v1766_v12 = vadd.f32 %v1757_v40, %v1752_v16 }
 0x3d5   : > { %4697 = vmatprep.mubr.msk.f32.mxu0 %vm1073_vm4, %v1769_v11 }
 0x3d6   : > { %v1770_v3 = vmax.f32 %v1762_v44, 0.0  ;;  %v1774_v19 = vmax.f32 %v1766_v12, 0.0  ;;  %v2567_v44 = vld [vmem:[%s5858_s10] sm:$0xff] }
 0x3d8   : > { %4698 = vmatmul.mubr.msk.f32.gmra.mxu0 %vm1073_vm4, %v1770_v3 }
 0x3d9   : > { %4700 = vmatprep.mubr.msk.f32.mxu0 %vm1073_vm4, %v1771_v17 }
 0x3dc   : > { %4701 = vmatmul.mubr.msk.f32.gmra.mxu0 %vm1073_vm4, %v1772_v51 }
 0x3dd   : > { %4703 = vmatprep.mubr.msk.f32.mxu0 %vm1073_vm4, %v1773_v13 }
 0x3e0   : > { %4704 = vmatmul.mubr.msk.f32.gmra.mxu0 %vm1073_vm4, %v1774_v19 }
 0x3e1   : > { %4728 = vmatprep.mubr.msk.f32.mxu0 %vm5148_vm3, %v5147_v50 }
 0x494   : > { %v4696_v20 = vpop.f32.mrf.mxu0 }
 0x496   : > { %v1866_v21 = vpop.f32.mrf.mxu0 }
 0x497   : > { %4707 = vmatpush3.msra.mxu1 %v1866_v21 }
 0x498   : > { %v4699_v22 = vpop.f32.mrf.mxu0  ;;  %4709 = vmatmul.mubr.msk.f32.vlgmr.msra.gmra.mxu1 %vm1073_vm4, %v5452_v52  ;;  %4711 = vmatprep.subr.mxu1 %v5147_v50 }
 0x499   : > { %4712 = vmatpush3.msra.mxu1 %v4696_v20  ;;  %4713 = vmatprep.mubr.msk.f32.mxu1 %vm5148_vm3, %v5147_v50 }
 0x49a   : > { %v1876_v23 = vpop.f32.mrf.mxu0  ;;  %4716 = vmatprep.subr.mxu1 %v5147_v50 }
 0x49c   : > { %v4702_v24 = vpop.f32.mrf.mxu0  ;;  %4714 = vmatmul.mubr.msk.f32.vlgmr.msra.gmra.mxu1 %vm1073_vm4, %v5460_v55 }
 0x49d   : > { %4717 = vmatpush3.msra.mxu1 %v1876_v23  ;;  %4718 = vmatprep.mubr.msk.f32.mxu1 %vm5148_vm3, %v5147_v50 }
 0x49e   : > { %v1886_v25 = vpop.f32.mrf.mxu0  ;;  %4721 = vmatprep.subr.mxu1 %v5147_v50 }
 0x49f   : > { %4727 = vmatpush3.msra.mxu0 %v1886_v25 }
 0x4a0   : > { %v4705_v26 = vpop.f32.mrf.mxu0  ;;  %4719 = vmatmul.mubr.msk.f32.vlgmr.msra.gmra.mxu1 %vm1073_vm4, %v5468_v58  ;;  %4729 = vmatmul.mubr.msk.f32.vlgmr.msra.gmra.mxu0 %vm1073_vm4, %v5471_v59 }
 0x4a1   : > { %4722 = vmatpush3.msra.mxu1 %v4699_v22  ;;  %4736 = vmatprep.subr.mxu0 %v5147_v50 }
 0x4a2   : > { %v1896_v27 = vpop.f32.mrf.mxu0  ;;  %4723 = vmatprep.mubr.msk.f32.mxu1 %vm5148_vm3, %v5147_v50  ;;  %4731 = vmatprep.subr.mxu1 %v5147_v50 }
 0x4a3   : > { %4737 = vmatpush3.msra.mxu0 %v1896_v27  ;;  %4738 = vmatprep.mubr.msk.f32.mxu0 %vm5148_vm3, %v5147_v50 }
 0x4a4   : > { %4724 = vmatmul.mubr.msk.f32.vlgmr.msra.gmra.mxu1 %vm1073_vm4, %v5480_v62  ;;  %4739 = vmatmul.mubr.msk.f32.vlgmr.msra.gmra.mxu0 %vm1073_vm4, %v5483_v63 }
 0x4a5   : > { %4732 = vmatpush3.msra.mxu1 %v4702_v24  ;;  %4733 = vmatprep.mubr.msk.f32.mxu1 %vm5148_vm3, %v5147_v50 }
 0x4a6   : > { %4741 = vmatprep.subr.mxu1 %v5147_v50 }
 0x4a8   : > { %4734 = vmatmul.mubr.msk.f32.vlgmr.msra.gmra.mxu1 %vm1073_vm4, %v5497_v1 }
 0x4a9   : > { %4742 = vmatpush3.msra.mxu1 %v4705_v26  ;;  %4743 = vmatprep.mubr.msk.f32.mxu1 %vm5148_vm3, %v5147_v50 }
 0x4aa   : > { %4760 = vmatprep.subr.mxu1 %v5147_v50 }
 0x4ac   : > { %4744 = vmatmul.mubr.msk.f32.vlgmr.msra.gmra.mxu1 %vm1073_vm4, %v5505_v2 }
 0x4ad   : > { %4762 = vmatprep.mubr.msk.f32.mxu1 %vm5148_vm3, %v5147_v50 }
 0x558   : > { %v1978_v28 = vpop.f32.mrf.mxu1 }
 0x559   : > { %v1979_v33 = vadd.f32 %v4484_v30, %v1978_v28 }
 0x55a   : > { %v4710_v29 = vpop.f32.mrf.mxu1 }
 0x55b   : > { %v2472_v40 = vsel %vm932_vm2, %v1979_v33, 0.0 }
 0x55c   : > { %v2048_v31 = vpop.f32.mrf.mxu1 }
 0x55d   : > { %v2049_v54 = vadd.f32 %v4484_v30, %v2048_v31 }
 0x55e   : > { %v4715_v32 = vpop.f32.mrf.mxu1 }
 0x55f   : > { %v2477_v6 = vsel %vm932_vm2, %v2049_v54, 0.0 }
 0x560   : > { %v2118_v34 = vpop.f32.mrf.mxu1  ;;  %v2258_v35 = vpop.f32.mrf.mxu0 }
 0x561   : > { %v2259_v36 = vadd.f32 %v4484_v30, %v2258_v35  ;;  %v2119_v39 = vadd.f32 %v4484_v30, %v2118_v34 }
 0x562   : > { %v4720_v37 = vpop.f32.mrf.mxu1  ;;  %v4730_v38 = vpop.f32.mrf.mxu0 }
 0x563   : > { %v2473_v41 = vsel %vm932_vm2, %v2259_v36, 0.0  ;;  %v2482_v56 = vsel %vm932_vm2, %v2119_v39, 0.0 }
 0x564   : > { %v2188_v42 = vpop.f32.mrf.mxu1  ;;  %v2398_v45 = vpop.f32.mrf.mxu0  ;;  %v2474_v46 = vadd.f32 %v2473_v41, %v2472_v40 }
 0x565   : > { %v2399_v47 = vadd.f32 %v4484_v30, %v2398_v45  ;;  %v2189_v43 = vadd.f32 %v4484_v30, %v2188_v42 }
 0x566   : > { %v4725_v48 = vpop.f32.mrf.mxu1  ;;  %2475 = vadd.xlane.f32.xlu1 %v2474_v46  ;;  %v4740_v53 = vpop.f32.mrf.mxu0 }
 0x567   : > { %v2483_v57 = vsel %vm932_vm2, %v2399_v47, 0.0  ;;  %v2487_v11 = vsel %vm932_vm2, %v2189_v43, 0.0  ;;  %v2553_v53 = vld [vmem:[%s5857_s9] sm:$0xff] }
 0x568   : > { %v2328_v60 = vpop.f32.mrf.mxu1  ;;  %v2484_v61 = vadd.f32 %v2483_v57, %v2482_v56 }
 0x569   : > { %v2329_v0 = vadd.f32 %v4484_v30, %v2328_v60 }
 0x56a   : > { %v4735_v5 = vpop.f32.mrf.mxu1  ;;  %2485 = vadd.xlane.f32.xlu1 %v2484_v61 }
 0x56b   : > { %v2478_v7 = vsel %vm932_vm2, %v2329_v0, 0.0 }
 0x56c   : > { %v2468_v8 = vpop.f32.mrf.mxu1  ;;  %v2479_v9 = vadd.f32 %v2478_v7, %v2477_v6 }
 0x56d   : > { %v2469_v49 = vadd.f32 %v4484_v30, %v2468_v8 }
 0x56e   : > { %2480 = vadd.xlane.f32.xlu0 %v2479_v9  ;;  %v4745_v10 = vpop.f32.mrf.mxu1 }
 0x56f   : > { %v2488_v14 = vsel %vm932_vm2, %v2469_v49, 0.0 }
 0x570   : > { %v2489_v15 = vadd.f32 %v2488_v14, %v2487_v11 }
 0x572   : > { %2490 = vadd.xlane.f32.xlu1 %v2489_v15 }
 0x584   : > { %2570 = vperm.xlu0 %4947, %v2567_v44  }
 0x5ef   : > { %v2476_v3 = vpop.xlane.xlu1 %2475 }
 0x5f0   : > { %v2493_v4 = vmul.f32 0.125, %v2476_v3 }
 0x5f2   : > { %v2497_v16 = vsub.f32 %v1979_v33, %v2493_v4  ;;  %v5616_v17 = vsub.f32 %v2259_v36, %v2493_v4 }
 0x5f3   : > { %v2486_v18 = vpop.xlane.xlu1 %2485 }
 0x5f4   : > { %v2495_v51 = vmul.f32 0.125, %v2486_v18  ;;  %v2505_v12 = vmul.f32 %v2497_v16, %v2497_v16  ;;  %v2509_v13 = vmul.f32 %v5616_v17, %v5616_v17 }
 0x5f6   : > { %v2499_v19 = vsub.f32 %v2119_v39, %v2495_v51  ;;  %v5620_v20 = vsub.f32 %v2399_v47, %v2495_v51  ;;  %v2513_v21 = vsel %vm932_vm2, %v2505_v12, 0.0  ;;  %v2514_v22 = vsel %vm932_vm2, %v2509_v13, 0.0 }
 0x5f7   : > { %v2481_v23 = vpop.xlane.xlu0 %2480  ;;  %v2515_v24 = vadd.f32 %v2514_v22, %v2513_v21 }
 0x5f8   : > { %v2494_v25 = vmul.f32 0.125, %v2481_v23  ;;  %v2507_v26 = vmul.f32 %v2499_v19, %v2499_v19  ;;  %v2511_v27 = vmul.f32 %v5620_v20, %v5620_v20 }
 0x5f9   : > { %2516 = vadd.xlane.f32.xlu1 %v2515_v24 }
 0x5fa   : > { %v2498_v28 = vsub.f32 %v2049_v54, %v2494_v25  ;;  %v2502_v29 = vsub.f32 %v2329_v0, %v2494_v25  ;;  %v2523_v30 = vsel %vm932_vm2, %v2507_v26, 0.0  ;;  %v2524_v31 = vsel %vm932_vm2, %v2511_v27, 0.0  ;;  %v2589_v54 = vld [vmem:[%s5859_s11] sm:$0xf] }
 0x5fb   : > { %v2491_v32 = vpop.xlane.xlu1 %2490  ;;  %v2525_v33 = vadd.f32 %v2524_v31, %v2523_v30  ;;  %4746 = vmatprep.subr.msk.mxu0 %vm957_vm0, %v2589_v54 }
 0x5fc   : > { %v2496_v34 = vmul.f32 0.125, %v2491_v32  ;;  %v2506_v35 = vmul.f32 %v2498_v28, %v2498_v28  ;;  %v2510_v36 = vmul.f32 %v2502_v29, %v2502_v29  ;;  %4747 = vmatpush3.msk.msra.mxu0 %vm957_vm0, %v2589_v54 }
 0x5fd   : > { %2526 = vadd.xlane.f32.xlu1 %v2525_v33  ;;  %4780 = vmatprep.subr.mxu0 %v5147_v50 }
 0x5fe   : > { %v2500_v37 = vsub.f32 %v2189_v43, %v2496_v34  ;;  %v2504_v38 = vsub.f32 %v2469_v49, %v2496_v34  ;;  %v2518_v39 = vsel %vm932_vm2, %v2506_v35, 0.0  ;;  %v2519_v40 = vsel %vm932_vm2, %v2510_v36, 0.0 }
 0x5ff   : > { %v2520_v41 = vadd.f32 %v2519_v40, %v2518_v39  ;;  %v2571_v3 = vpop.permute.xlu0 %2570 }
 0x600   : > { %v2508_v42 = vmul.f32 %v2500_v37, %v2500_v37  ;;  %v2512_v45 = vmul.f32 %v2504_v38, %v2504_v38 }
 0x601   : > { %2521 = vadd.xlane.f32.xlu1 %v2520_v41 }
 0x602   : > { %v2528_v46 = vsel %vm932_vm2, %v2508_v42, 0.0  ;;  %v2529_v47 = vsel %vm932_vm2, %v2512_v45, 0.0 }
 0x603   : > { %v2530_v48 = vadd.f32 %v2529_v47, %v2528_v46 }
 0x605   : > { %2531 = vadd.xlane.f32.xlu1 %v2530_v48 }
 0x616   : > { %2556 = vperm.xlu1 %4946, %v2553_v53  }
 0x682   : > { %v2517_v56 = vpop.xlane.xlu1 %2516 }
 0x683   : > { %v2533_v57 = vmul.f32 0.125, %v2517_v56 }
 0x685   : > { %v2537_v60 = vadd.f32 1e-05, %v2533_v57 }
 0x686   : > { %v2527_v61 = vpop.xlane.xlu1 %2526 }
 0x687   : > { %4956 = vrsqrt.f32 %v2537_v60  ;;  %v2535_v0 = vmul.f32 0.125, %v2527_v61 }
 0x689   : > { %v2539_v5 = vadd.f32 1e-05, %v2535_v0 }
 0x68a   : > { %v2522_v43 = vpop.xlane.xlu1 %2521 }
 0x68b   : > { %4958 = vrsqrt.f32 %v2539_v5  ;;  %v2534_v6 = vmul.f32 0.125, %v2522_v43 }
 0x68d   : > { %v2538_v7 = vadd.f32 1e-05, %v2534_v6 }
 0x68e   : > { %v2532_v8 = vpop.xlane.xlu1 %2531 }
 0x68f   : > { %4960 = vrsqrt.f32 %v2538_v7  ;;  %v2536_v9 = vmul.f32 0.125, %v2532_v8 }
 0x691   : > { %v2540_v49 = vadd.f32 1e-05, %v2536_v9 }
 0x692   : > { %v2557_v14 = vpop.permute.xlu1 %2556 }
 0x693   : > { %4962 = vrsqrt.f32 %v2540_v49 }
 0x694   : > { %v4957_v10 = vpop.eup %4956 }
 0x695   : > { %v2545_v11 = vmul.f32 %v4957_v10, %v2497_v16  ;;  %v2549_v21 = vmul.f32 %v4957_v10, %v5616_v17 }
 0x697   : > { %v2559_v15 = vmul.f32 %v2557_v14, %v2545_v11  ;;  %v2563_v27 = vmul.f32 %v2557_v14, %v2549_v21 }
 0x698   : > { %v4959_v44 = vpop.eup %4958 }
 0x699   : > { %v2573_v4 = vadd.f32 %v2571_v3, %v2559_v15  ;;  %v2547_v18 = vmul.f32 %v4959_v44, %v2499_v19  ;;  %v2551_v16 = vmul.f32 %v4959_v44, %v5620_v20  ;;  %v2577_v36 = vadd.f32 %v2571_v3, %v2563_v27 }
 0x69b   : > { %v2581_v51 = vmax.f32 %v2573_v4, 0.0  ;;  %v2561_v13 = vmul.f32 %v2557_v14, %v2547_v18  ;;  %v2565_v39 = vmul.f32 %v2557_v14, %v2551_v16  ;;  %v2585_v41 = vmax.f32 %v2577_v36, 0.0 }
 0x69c   : > { %v4961_v12 = vpop.eup %4960 }
 0x69d   : > { %v2546_v22 = vmul.f32 %v4961_v12, %v2498_v28  ;;  %4748 = vmatprep.mubr.msk.f32.mxu0 %vm932_vm2, %v2581_v51  ;;  %v2550_v24 = vmul.f32 %v4961_v12, %v2502_v29  ;;  %v2575_v26 = vadd.f32 %v2571_v3, %v2561_v13  ;;  %v2579_v42 = vadd.f32 %v2571_v3, %v2565_v39 }
 0x69f   : > { %v2560_v23 = vmul.f32 %v2557_v14, %v2546_v22  ;;  %v2564_v19 = vmul.f32 %v2557_v14, %v2550_v24  ;;  %v2583_v35 = vmax.f32 %v2575_v26, 0.0 }
 0x6a0   : > { %v4963_v25 = vpop.eup %4962 }
 0x6a1   : > { %v2574_v30 = vadd.f32 %v2571_v3, %v2560_v23  ;;  %v2548_v31 = vmul.f32 %v4963_v25, %v2500_v37  ;;  %v2552_v34 = vmul.f32 %v4963_v25, %v2504_v38  ;;  %v2578_v29 = vadd.f32 %v2571_v3, %v2564_v19 }
 0x6a2   : > { %v2587_v38 = vmax.f32 %v2579_v42, 0.0 }
 0x6a3   : > { %v2582_v32 = vmax.f32 %v2574_v30, 0.0  ;;  %v2562_v33 = vmul.f32 %v2557_v14, %v2548_v31  ;;  %v2566_v40 = vmul.f32 %v2557_v14, %v2552_v34  ;;  %v2586_v20 = vmax.f32 %v2578_v29, 0.0 }
 0x6a5   : > { %4749 = vmatmul.mubr.msk.f32.vlgmr.msra.gmra.mxu0 %vm932_vm2, %v2582_v32  ;;  %v2576_v17 = vadd.f32 %v2571_v3, %v2562_v33  ;;  %v2580_v37 = vadd.f32 %v2571_v3, %v2566_v40 }
 0x6a6   : > { %4751 = vmatprep.mubr.msk.f32.mxu0 %vm932_vm2, %v2583_v35 }
 0x6a7   : > { %v2584_v28 = vmax.f32 %v2576_v17, 0.0  ;;  %v2588_v45 = vmax.f32 %v2580_v37, 0.0 }
 0x6a9   : > { %4752 = vmatmul.mubr.msk.f32.gmra.mxu0 %vm932_vm2, %v2584_v28 }
 0x6aa   : > { %4754 = vmatprep.mubr.msk.f32.mxu0 %vm932_vm2, %v2585_v41 }
 0x6ad   : > { %4755 = vmatmul.mubr.msk.f32.gmra.mxu0 %vm932_vm2, %v2586_v20 }
 0x6ae   : > { %4757 = vmatprep.mubr.msk.f32.mxu0 %vm932_vm2, %v2587_v38 }
 0x6b1   : > { %4758 = vmatmul.mubr.msk.f32.gmra.mxu0 %vm932_vm2, %v2588_v45 }
 0x6b2   : > { %4782 = vmatprep.mubr.msk.f32.mxu0 %vm5148_vm3, %v5147_v50 }
 0x765   : > { %v4750_v46 = vpop.f32.mrf.mxu0 }
 0x767   : > { %v2683_v47 = vpop.f32.mrf.mxu0 }
 0x768   : > { %4761 = vmatpush3.msra.mxu1 %v2683_v47 }
 0x769   : > { %v4753_v48 = vpop.f32.mrf.mxu0  ;;  %4763 = vmatmul.mubr.msk.f32.vlgmr.msra.gmra.mxu1 %vm1073_vm4, %v5452_v52  ;;  %4765 = vmatprep.subr.mxu1 %v5147_v50 }
 0x76a   : > { %4766 = vmatpush3.msra.mxu1 %v4750_v46  ;;  %4767 = vmatprep.mubr.msk.f32.mxu1 %vm5148_vm3, %v5147_v50 }
 0x76b   : > { %v2693_v53 = vpop.f32.mrf.mxu0  ;;  %4770 = vmatprep.subr.mxu1 %v5147_v50 }
 0x76d   : > { %v4756_v54 = vpop.f32.mrf.mxu0  ;;  %4768 = vmatmul.mubr.msk.f32.vlgmr.msra.gmra.mxu1 %vm1073_vm4, %v5460_v55 }
 0x76e   : > { %4771 = vmatpush3.msra.mxu1 %v2693_v53  ;;  %4772 = vmatprep.mubr.msk.f32.mxu1 %vm5148_vm3, %v5147_v50 }
 0x76f   : > { %v2703_v56 = vpop.f32.mrf.mxu0  ;;  %4775 = vmatprep.subr.mxu1 %v5147_v50 }
 0x770   : > { %4781 = vmatpush3.msra.mxu0 %v2703_v56 }
 0x771   : > { %v4759_v52 = vpop.f32.mrf.mxu0  ;;  %4773 = vmatmul.mubr.msk.f32.vlgmr.msra.gmra.mxu1 %vm1073_vm4, %v5468_v58  ;;  %4783 = vmatmul.mubr.msk.f32.vlgmr.msra.gmra.mxu0 %vm1073_vm4, %v5471_v59  ;;  %v4502_v59 = vld [vmem:[#allocation12] ss:$0 sm:$0xff] }
 0x772   : > { %4776 = vmatpush3.msra.mxu1 %v4753_v48  ;;  %4790 = vmatprep.subr.mxu0 %v5147_v50 }
 0x773   : > { %v2713_v57 = vpop.f32.mrf.mxu0  ;;  %4777 = vmatprep.mubr.msk.f32.mxu1 %vm5148_vm3, %v5147_v50  ;;  %4785 = vmatprep.subr.mxu1 %v5147_v50 }
 0x774   : > { %4791 = vmatpush3.msra.mxu0 %v2713_v57  ;;  %4792 = vmatprep.mubr.msk.f32.mxu0 %vm5148_vm3, %v5147_v50 }
 0x775   : > { %4778 = vmatmul.mubr.msk.f32.vlgmr.msra.gmra.mxu1 %vm1073_vm4, %v5480_v62  ;;  %4793 = vmatmul.mubr.msk.f32.vlgmr.msra.gmra.mxu0 %vm1073_vm4, %v5483_v63 }
 0x776   : > { %4786 = vmatpush3.msra.mxu1 %v4756_v54  ;;  %4787 = vmatprep.mubr.msk.f32.mxu1 %vm5148_vm3, %v5147_v50 }
 0x777   : > { %4795 = vmatprep.subr.mxu1 %v5147_v50 }
 0x779   : > { %4788 = vmatmul.mubr.msk.f32.vlgmr.msra.gmra.mxu1 %vm1073_vm4, %v5497_v1 }
 0x77a   : > { %4796 = vmatpush3.msra.mxu1 %v4759_v52  ;;  %4797 = vmatprep.mubr.msk.f32.mxu1 %vm5148_vm3, %v5147_v50 }
 0x77b   : > { %4814 = vmatprep.subr.mxu1 %v5147_v50 }
 0x77d   : > { %4798 = vmatmul.mubr.msk.f32.vlgmr.msra.gmra.mxu1 %vm1073_vm4, %v5505_v2 }
 0x77e   : > { %4816 = vmatprep.mubr.msk.f32.mxu1 %vm5148_vm3, %v5147_v50 }
 0x829   : > { %v2795_v55 = vpop.f32.mrf.mxu1 }
 0x82a   : > { %v2796_v60 = vadd.f32 %v4502_v59, %v2795_v55 }
 0x82b   : > { %v4764_v58 = vpop.f32.mrf.mxu1 }
 0x82c   : > { %v3290_v7 = vsel %vm3289_vm5, %v2796_v60, 0.0 }
 0x82d   : > { %v2865_v62 = vpop.f32.mrf.mxu1 }
 0x82e   : > { %v2866_v15 = vadd.f32 %v4502_v59, %v2865_v62 }
 0x82f   : > { %v4769_v63 = vpop.f32.mrf.mxu1 }
 0x830   : > { %v3295_v21 = vsel %vm3289_vm5, %v2866_v15, 0.0 }
 0x831   : > { %v2935_v61 = vpop.f32.mrf.mxu1  ;;  %v3075_v1 = vpop.f32.mrf.mxu0 }
 0x832   : > { %v3076_v0 = vadd.f32 %v4502_v59, %v3075_v1  ;;  %v2936_v6 = vadd.f32 %v4502_v59, %v2935_v61 }
 0x833   : > { %v4774_v5 = vpop.f32.mrf.mxu1  ;;  %v4784_v43 = vpop.f32.mrf.mxu0 }
 0x834   : > { %v3291_v2 = vsel %vm3289_vm5, %v3076_v0, 0.0  ;;  %v3300_v44 = vsel %vm3289_vm5, %v2936_v6, 0.0  ;;  %v3371_v43 = vld [vmem:[%s5861_s13] sm:$0xff] }
 0x835   : > { %v3005_v8 = vpop.f32.mrf.mxu1  ;;  %v3215_v9 = vpop.f32.mrf.mxu0  ;;  %v3292_v49 = vadd.f32 %v3291_v2, %v3290_v7  ;;  %v3407_v7 = vld [vmem:[%s5863_s15] sm:$0x3] }
 0x836   : > { %v3216_v10 = vadd.f32 %v4502_v59, %v3215_v9  ;;  %v3006_v13 = vadd.f32 %v4502_v59, %v3005_v8  ;;  %4800 = vmatprep.subr.msk.mxu0 %vm3432_vm6, %v3407_v7 }
 0x837   : > { %v4779_v11 = vpop.f32.mrf.mxu1  ;;  %3293 = vadd.xlane.f32.xlu1 %v3292_v49  ;;  %v4794_v14 = vpop.f32.mrf.mxu0  ;;  %4801 = vmatpush3.msk.msra.mxu0 %vm3432_vm6, %v3407_v7  ;;  %v4984_v7 = vld [vmem:[%s5405_s30 + $0x18] sm:$0xff] }
 0x838   : > { %v3301_v3 = vsel %vm3289_vm5, %v3216_v10, 0.0  ;;  %v3305_v27 = vsel %vm3289_vm5, %v3006_v13, 0.0  ;;  %4834 = vmatprep.subr.mxu0 %v5147_v50 }
 0x839   : > { %v3145_v4 = vpop.f32.mrf.mxu1  ;;  %v3302_v18 = vadd.f32 %v3301_v3, %v3300_v44 }
 0x83a   : > { %v3146_v51 = vadd.f32 %v4502_v59, %v3145_v4 }
 0x83b   : > { %v4789_v12 = vpop.f32.mrf.mxu1  ;;  %3303 = vadd.xlane.f32.xlu1 %v3302_v18 }
 0x83c   : > { %v3296_v22 = vsel %vm3289_vm5, %v3146_v51, 0.0 }
 0x83d   : > { %v3285_v23 = vpop.f32.mrf.mxu1  ;;  %v3297_v24 = vadd.f32 %v3296_v22, %v3295_v21 }
 0x83e   : > { %v3286_v25 = vadd.f32 %v4502_v59, %v3285_v23 }
 0x83f   : > { %3298 = vadd.xlane.f32.xlu0 %v3297_v24  ;;  %v4799_v26 = vpop.f32.mrf.mxu1 }
 0x840   : > { %v3306_v16 = vsel %vm3289_vm5, %v3286_v25, 0.0 }
 0x841   : > { %v3307_v30 = vadd.f32 %v3306_v16, %v3305_v27 }
 0x843   : > { %3308 = vadd.xlane.f32.xlu0 %v3307_v30 }
 0x8c0   : > { %v3294_v31 = vpop.xlane.xlu1 %3293 }
 0x8c1   : > { %v3311_v32 = vmul.f32 0.25, %v3294_v31 }
 0x8c3   : > { %v5698_v33 = vsub.f32 %v2796_v60, %v3311_v32  ;;  %v5700_v19 = vsub.f32 %v3076_v0, %v3311_v32 }
 0x8c4   : > { %v3304_v34 = vpop.xlane.xlu1 %3303 }
 0x8c5   : > { %v3313_v35 = vmul.f32 0.25, %v3304_v34  ;;  %v3323_v36 = vmul.f32 %v5698_v33, %v5698_v33  ;;  %v3327_v39 = vmul.f32 %v5700_v19, %v5700_v19 }
 0x8c7   : > { %v5706_v17 = vsub.f32 %v2936_v6, %v3313_v35  ;;  %v5708_v28 = vsub.f32 %v3216_v10, %v3313_v35  ;;  %v3331_v29 = vsel %vm3289_vm5, %v3323_v36, 0.0  ;;  %v3332_v40 = vsel %vm3289_vm5, %v3327_v39, 0.0  ;;  %v3385_v6 = vld [vmem:[%s5862_s14] sm:$0xff] }
 0x8c8   : > { %v3299_v41 = vpop.xlane.xlu0 %3298  ;;  %v3333_v42 = vadd.f32 %v3332_v40, %v3331_v29 }
 0x8c9   : > { %v3312_v20 = vmul.f32 0.25, %v3299_v41  ;;  %v3325_v37 = vmul.f32 %v5706_v17, %v5706_v17  ;;  %v3329_v38 = vmul.f32 %v5708_v28, %v5708_v28 }
 0x8ca   : > { %3334 = vadd.xlane.f32.xlu1 %v3333_v42 }
 0x8cb   : > { %v3316_v45 = vsub.f32 %v2866_v15, %v3312_v20  ;;  %v3320_v46 = vsub.f32 %v3146_v51, %v3312_v20  ;;  %v3341_v47 = vsel %vm3289_vm5, %v3325_v37, 0.0  ;;  %v3342_v48 = vsel %vm3289_vm5, %v3329_v38, 0.0 }
 0x8cc   : > { %v3309_v53 = vpop.xlane.xlu0 %3308  ;;  %v3343_v54 = vadd.f32 %v3342_v48, %v3341_v47 }
 0x8cd   : > { %v3314_v56 = vmul.f32 0.25, %v3309_v53  ;;  %v3324_v52 = vmul.f32 %v3316_v45, %v3316_v45  ;;  %v3328_v57 = vmul.f32 %v3320_v46, %v3320_v46 }
 0x8ce   : > { %3344 = vadd.xlane.f32.xlu1 %v3343_v54 }
 0x8cf   : > { %v3318_v55 = vsub.f32 %v3006_v13, %v3314_v56  ;;  %v3322_v58 = vsub.f32 %v3286_v25, %v3314_v56  ;;  %v3336_v59 = vsel %vm3289_vm5, %v3324_v52, 0.0  ;;  %v3337_v62 = vsel %vm3289_vm5, %v3328_v57, 0.0 }
 0x8d0   : > { %v3338_v63 = vadd.f32 %v3337_v62, %v3336_v59  ;;  %v4980_v62 = vld [vmem:[%s5405_s30] sm:$0xff] }
 0x8d1   : > { %v3326_v60 = vmul.f32 %v3318_v55, %v3318_v55  ;;  %v3330_v61 = vmul.f32 %v3322_v58, %v3322_v58 }
 0x8d2   : > { %3339 = vadd.xlane.f32.xlu0 %v3338_v63 }
 0x8d3   : > { %v3346_v1 = vsel %vm3289_vm5, %v3326_v60, 0.0  ;;  %v3347_v0 = vsel %vm3289_vm5, %v3330_v61, 0.0  ;;  %v4981_v61 = vld [vmem:[%s5405_s30 + $0x8] sm:$0xff] }
 0x8d4   : > { %v3348_v5 = vadd.f32 %v3347_v0, %v3346_v1 }
 0x8d6   : > { %3349 = vadd.xlane.f32.xlu0 %v3348_v5  ;;  %v4982_v5 = vld [vmem:[%s5405_s30 + $0x10] sm:$0xff] }
 0x8df   : > { %3374 = vperm.xlu1 %4946, %v3371_v43   ;;  %v4983_v43 = vld [vmem:[%s5405_s30 + $0x20] sm:$0xff] }
 0x8ec   : > { %3388 = vperm.xlu0 %4947, %v3385_v6  }
 0x953   : > { %v3335_v2 = vpop.xlane.xlu1 %3334 }
 0x954   : > { %v3351_v8 = vmul.f32 0.25, %v3335_v2  ;;  %v4985_v2 = vld [vmem:[%s5405_s30 + $0x30] sm:$0xff] }
 0x956   : > { %v3355_v9 = vadd.f32 1e-05, %v3351_v8  ;;  %v4986_v8 = vld [vmem:[%s5405_s30 + $0x28] sm:$0xff] }
 0x957   : > { %v3345_v49 = vpop.xlane.xlu1 %3344 }
 0x958   : > { %4964 = vrsqrt.f32 %v3355_v9  ;;  %v3353_v10 = vmul.f32 0.25, %v3345_v49  ;;  %v4987_v9 = vld [vmem:[%s5405_s30 + $0x38] sm:$0xff] }
 0x95a   : > { %v3357_v11 = vadd.f32 1e-05, %v3353_v10 }
 0x95b   : > { %v3340_v14 = vpop.xlane.xlu0 %3339  ;;  %v3375_v13 = vpop.permute.xlu1 %3374 }
 0x95c   : > { %4966 = vrsqrt.f32 %v3357_v11  ;;  %v3352_v15 = vmul.f32 0.25, %v3340_v14  ;;  %v4520_v11 = vld [vmem:[#allocation2] ss:$0 sm:$0xff] }
 0x95e   : > { %v3356_v44 = vadd.f32 1e-05, %v3352_v15 }
 0x95f   : > { %v3350_v3 = vpop.xlane.xlu0 %3349 }
 0x960   : > { %4968 = vrsqrt.f32 %v3356_v44  ;;  %v3354_v4 = vmul.f32 0.25, %v3350_v3 }
 0x962   : > { %v3358_v18 = vadd.f32 1e-05, %v3354_v4 }
 0x964   : > { %4970 = vrsqrt.f32 %v3358_v18 }
 0x965   : > { %v4965_v51 = vpop.eup %4964 }
 0x966   : > { %v3363_v12 = vmul.f32 %v4965_v51, %v5698_v33  ;;  %v3367_v30 = vmul.f32 %v4965_v51, %v5700_v19 }
 0x967   : > { %v3389_v23 = vpop.permute.xlu0 %3388 }
 0x968   : > { %v3377_v21 = vmul.f32 %v3375_v13, %v3363_v12  ;;  %v3381_v33 = vmul.f32 %v3375_v13, %v3367_v30 }
 0x969   : > { %v4967_v22 = vpop.eup %4966 }
 0x96a   : > { %v3391_v24 = vadd.f32 %v3389_v23, %v3377_v21  ;;  %v3365_v25 = vmul.f32 %v4967_v22, %v5706_v17  ;;  %v3369_v39 = vmul.f32 %v4967_v22, %v5708_v28  ;;  %v3395_v38 = vadd.f32 %v3389_v23, %v3381_v33 }
 0x96c   : > { %v3399_v26 = vmax.f32 %v3391_v24, 0.0  ;;  %v3379_v16 = vmul.f32 %v3375_v13, %v3365_v25  ;;  %v3383_v47 = vmul.f32 %v3375_v13, %v3369_v39  ;;  %v3403_v53 = vmax.f32 %v3395_v38, 0.0 }
 0x96d   : > { %v4969_v27 = vpop.eup %4968 }
 0x96e   : > { %v3364_v31 = vmul.f32 %v4969_v27, %v3316_v45  ;;  %4802 = vmatprep.mubr.msk.f32.mxu0 %vm3289_vm5, %v3399_v26  ;;  %v3368_v34 = vmul.f32 %v4969_v27, %v3320_v46  ;;  %v3393_v36 = vadd.f32 %v3389_v23, %v3379_v16  ;;  %v3397_v28 = vadd.f32 %v3389_v23, %v3383_v47 }
 0x970   : > { %v3378_v32 = vmul.f32 %v3375_v13, %v3364_v31  ;;  %v3382_v17 = vmul.f32 %v3375_v13, %v3368_v34  ;;  %v3401_v37 = vmax.f32 %v3393_v36, 0.0  ;;  %v3405_v52 = vmax.f32 %v3397_v28, 0.0 }
 0x971   : > { %v4971_v35 = vpop.eup %4970 }
 0x972   : > { %v3392_v29 = vadd.f32 %v3389_v23, %v3378_v32  ;;  %v3366_v40 = vmul.f32 %v4971_v35, %v3318_v55  ;;  %v3370_v20 = vmul.f32 %v4971_v35, %v3322_v58  ;;  %v3396_v46 = vadd.f32 %v3389_v23, %v3382_v17 }
 0x974   : > { %v3400_v41 = vmax.f32 %v3392_v29, 0.0  ;;  %v3380_v42 = vmul.f32 %v3375_v13, %v3366_v40  ;;  %v3384_v48 = vmul.f32 %v3375_v13, %v3370_v20  ;;  %v3404_v54 = vmax.f32 %v3396_v46, 0.0 }
 0x976   : > { %4803 = vmatmul.mubr.msk.f32.vlgmr.msra.gmra.mxu0 %vm3289_vm5, %v3400_v41  ;;  %v3394_v19 = vadd.f32 %v3389_v23, %v3380_v42  ;;  %v3398_v56 = vadd.f32 %v3389_v23, %v3384_v48 }
 0x977   : > { %4805 = vmatprep.mubr.msk.f32.mxu0 %vm3289_vm5, %v3401_v37 }
 0x978   : > { %v3402_v45 = vmax.f32 %v3394_v19, 0.0  ;;  %v3406_v57 = vmax.f32 %v3398_v56, 0.0 }
 0x97a   : > { %4806 = vmatmul.mubr.msk.f32.gmra.mxu0 %vm3289_vm5, %v3402_v45 }
 0x97b   : > { %4808 = vmatprep.mubr.msk.f32.mxu0 %vm3289_vm5, %v3403_v53 }
 0x97e   : > { %4809 = vmatmul.mubr.msk.f32.gmra.mxu0 %vm3289_vm5, %v3404_v54 }
 0x97f   : > { %4811 = vmatprep.mubr.msk.f32.mxu0 %vm3289_vm5, %v3405_v52 }
 0x982   : > { %4812 = vmatmul.mubr.msk.f32.gmra.mxu0 %vm3289_vm5, %v3406_v57 }
 0x983   : > { %4836 = vmatprep.mubr.msk.f32.mxu0 %vm5148_vm3, %v5147_v50 }
 0xa36   : > { %v4804_v55 = vpop.f32.mrf.mxu0 }
 0xa38   : > { %v3502_v58 = vpop.f32.mrf.mxu0 }
 0xa39   : > { %4815 = vmatpush3.msra.mxu1 %v3502_v58 }
 0xa3a   : > { %v4807_v59 = vpop.f32.mrf.mxu0  ;;  %4817 = vmatmul.mubr.msk.f32.vlgmr.msra.gmra.mxu1 %vm1073_vm4, %v4980_v62  ;;  %4819 = vmatprep.subr.mxu1 %v5147_v50 }
 0xa3b   : > { %4820 = vmatpush3.msra.mxu1 %v4804_v55  ;;  %4821 = vmatprep.mubr.msk.f32.mxu1 %vm5148_vm3, %v5147_v50 }
 0xa3c   : > { %v3512_v63 = vpop.f32.mrf.mxu0  ;;  %4824 = vmatprep.subr.mxu1 %v5147_v50 }
 0xa3e   : > { %v4810_v60 = vpop.f32.mrf.mxu0  ;;  %4822 = vmatmul.mubr.msk.f32.vlgmr.msra.gmra.mxu1 %vm1073_vm4, %v4981_v61 }
 0xa3f   : > { %4825 = vmatpush3.msra.mxu1 %v3512_v63  ;;  %4826 = vmatprep.mubr.msk.f32.mxu1 %vm5148_vm3, %v5147_v50 }
 0xa40   : > { %v3522_v1 = vpop.f32.mrf.mxu0  ;;  %4829 = vmatprep.subr.mxu1 %v5147_v50 }
 0xa41   : > { %4835 = vmatpush3.msra.mxu0 %v3522_v1 }
 0xa42   : > { %v4813_v0 = vpop.f32.mrf.mxu0  ;;  %4827 = vmatmul.mubr.msk.f32.vlgmr.msra.gmra.mxu1 %vm1073_vm4, %v4982_v5  ;;  %4837 = vmatmul.mubr.msk.f32.vlgmr.msra.gmra.mxu0 %vm1073_vm4, %v4983_v43 }
 0xa43   : > { %4830 = vmatpush3.msra.mxu1 %v4807_v59  ;;  %4844 = vmatprep.subr.mxu0 %v5147_v50 }
 0xa44   : > { %v3532_v6 = vpop.f32.mrf.mxu0  ;;  %4831 = vmatprep.mubr.msk.f32.mxu1 %vm5148_vm3, %v5147_v50  ;;  %4839 = vmatprep.subr.mxu1 %v5147_v50 }
 0xa45   : > { %4845 = vmatpush3.msra.mxu0 %v3532_v6  ;;  %4846 = vmatprep.mubr.msk.f32.mxu0 %vm5148_vm3, %v5147_v50 }
 0xa46   : > { %4832 = vmatmul.mubr.msk.f32.vlgmr.msra.gmra.mxu1 %vm1073_vm4, %v4984_v7  ;;  %4847 = vmatmul.mubr.msk.f32.vlgmr.msra.gmra.mxu0 %vm1073_vm4, %v4985_v2 }
 0xa47   : > { %4840 = vmatpush3.msra.mxu1 %v4810_v60  ;;  %4841 = vmatprep.mubr.msk.f32.mxu1 %vm5148_vm3, %v5147_v50 }
 0xa48   : > { %4849 = vmatprep.subr.mxu1 %v5147_v50 }
 0xa4a   : > { %4842 = vmatmul.mubr.msk.f32.vlgmr.msra.gmra.mxu1 %vm1073_vm4, %v4986_v8 }
 0xa4b   : > { %4850 = vmatpush3.msra.mxu1 %v4813_v0  ;;  %4851 = vmatprep.mubr.msk.f32.mxu1 %vm5148_vm3, %v5147_v50 }
 0xa4e   : > { %4852 = vmatmul.mubr.msk.f32.vlgmr.msra.gmra.mxu1 %vm1073_vm4, %v4987_v9 }
 0xafa   : > { %v3614_v49 = vpop.f32.mrf.mxu1 }
 0xafb   : > { %v3615_v44 = vadd.f32 %v4520_v11, %v3614_v49 }
 0xafc   : > { %v4818_v10 = vpop.f32.mrf.mxu1 }
 0xafd   : > { %v4109_v21 = vsel %vm4108_vm7, %v3615_v44, 0.0 }
 0xafe   : > { %v3684_v14 = vpop.f32.mrf.mxu1 }
 0xaff   : > { %v3685_v16 = vadd.f32 %v4520_v11, %v3684_v14 }
 0xb00   : > { %v4823_v15 = vpop.f32.mrf.mxu1 }
 0xb01   : > { %v4114_v39 = vsel %vm4108_vm7, %v3685_v16, 0.0 }
 0xb02   : > { %v3754_v3 = vpop.f32.mrf.mxu1  ;;  %v3894_v4 = vpop.f32.mrf.mxu0 }
 0xb03   : > { %v3895_v18 = vadd.f32 %v4520_v11, %v3894_v4  ;;  %v3755_v13 = vadd.f32 %v4520_v11, %v3754_v3 }
 0xb04   : > { %v4828_v51 = vpop.f32.mrf.mxu1  ;;  %v4838_v12 = vpop.f32.mrf.mxu0 }
 0xb05   : > { %v4110_v50 = vsel %vm4108_vm7, %v3895_v18, 0.0  ;;  %v4119_v30 = vsel %vm4108_vm7, %v3755_v13, 0.0 }
 0xb06   : > { %v3824_v22 = vpop.f32.mrf.mxu1  ;;  %v4034_v23 = vpop.f32.mrf.mxu0  ;;  %v4111_v24 = vadd.f32 %v4110_v50, %v4109_v21 }
 0xb07   : > { %v4035_v25 = vadd.f32 %v4520_v11, %v4034_v23  ;;  %v3825_v33 = vadd.f32 %v4520_v11, %v3824_v22 }
 0xb08   : > { %v4833_v26 = vpop.f32.mrf.mxu1  ;;  %4112 = vadd.xlane.f32.xlu1 %v4111_v24  ;;  %v4848_v27 = vpop.f32.mrf.mxu0 }
 0xb09   : > { %v4120_v31 = vsel %vm4108_vm7, %v4035_v25, 0.0  ;;  %v4124_v20 = vsel %vm4108_vm7, %v3825_v33, 0.0 }
 0xb0a   : > { %v3964_v32 = vpop.f32.mrf.mxu1  ;;  %v4121_v34 = vadd.f32 %v4120_v31, %v4119_v30  ;;  %v4190_v31 = vld [vmem:[%s5865_s17] sm:$0xff] }
 0xb0b   : > { %v3965_v35 = vadd.f32 %v4520_v11, %v3964_v32 }
 0xb0c   : > { %v4843_v36 = vpop.f32.mrf.mxu1  ;;  %4122 = vadd.xlane.f32.xlu1 %v4121_v34 }
 0xb0d   : > { %v4115_v29 = vsel %vm4108_vm7, %v3965_v35, 0.0 }
 0xb0e   : > { %v4104_v40 = vpop.f32.mrf.mxu1  ;;  %v4116_v41 = vadd.f32 %v4115_v29, %v4114_v39 }
 0xb0f   : > { %v4105_v42 = vadd.f32 %v4520_v11, %v4104_v40 }
 0xb10   : > { %4117 = vadd.xlane.f32.xlu0 %v4116_v41  ;;  %v4853_v17 = vpop.f32.mrf.mxu1 }
 0xb11   : > { %v4125_v37 = vsel %vm4108_vm7, %v4105_v42, 0.0 }
 0xb12   : > { %v4126_v38 = vadd.f32 %v4125_v37, %v4124_v20 }
 0xb14   : > { %4127 = vadd.xlane.f32.xlu0 %v4126_v38 }
 0xb91   : > { %v4113_v47 = vpop.xlane.xlu1 %4112 }
 0xb92   : > { %v4130_v19 = vmul.f32 0.5, %v4113_v47 }
 0xb94   : > { %v4134_v45 = vsub.f32 %v3615_v44, %v4130_v19  ;;  %v4138_v46 = vsub.f32 %v3895_v18, %v4130_v19 }
 0xb95   : > { %v4123_v48 = vpop.xlane.xlu1 %4122 }
 0xb96   : > { %v4132_v53 = vmul.f32 0.5, %v4123_v48  ;;  %v4142_v28 = vmul.f32 %v4134_v45, %v4134_v45  ;;  %v4146_v54 = vmul.f32 %v4138_v46, %v4138_v46 }
 0xb98   : > { %v4136_v56 = vsub.f32 %v3755_v13, %v4132_v53  ;;  %v4140_v52 = vsub.f32 %v4035_v25, %v4132_v53  ;;  %v4150_v57 = vsel %vm4108_vm7, %v4142_v28, 0.0  ;;  %v4151_v55 = vsel %vm4108_vm7, %v4146_v54, 0.0 }
 0xb99   : > { %v4118_v58 = vpop.xlane.xlu0 %4117  ;;  %v4152_v59 = vadd.f32 %v4151_v55, %v4150_v57 }
 0xb9a   : > { %v4131_v62 = vmul.f32 0.5, %v4118_v58  ;;  %v4144_v63 = vmul.f32 %v4136_v56, %v4136_v56  ;;  %v4148_v60 = vmul.f32 %v4140_v52, %v4140_v52 }
 0xb9b   : > { %4153 = vadd.xlane.f32.xlu1 %v4152_v59 }
 0xb9c   : > { %v4135_v61 = vsub.f32 %v3685_v16, %v4131_v62  ;;  %v4139_v1 = vsub.f32 %v3965_v35, %v4131_v62  ;;  %v4160_v0 = vsel %vm4108_vm7, %v4144_v63, 0.0  ;;  %v4161_v5 = vsel %vm4108_vm7, %v4148_v60, 0.0  ;;  %v4199_v35 = vld [vmem:[%s5904_s22] sm:$0xff] }
 0xb9d   : > { %v4128_v43 = vpop.xlane.xlu0 %4127  ;;  %v4162_v6 = vadd.f32 %v4161_v5, %v4160_v0 }
 0xb9e   : > { %v4133_v7 = vmul.f32 0.5, %v4128_v43  ;;  %v4143_v2 = vmul.f32 %v4135_v61, %v4135_v61  ;;  %v4147_v8 = vmul.f32 %v4139_v1, %v4139_v1 }
 0xb9f   : > { %4163 = vadd.xlane.f32.xlu1 %v4162_v6 }
 0xba0   : > { %v4137_v9 = vsub.f32 %v3825_v33, %v4133_v7  ;;  %v4141_v49 = vsub.f32 %v4105_v42, %v4133_v7  ;;  %v4155_v10 = vsel %vm4108_vm7, %v4143_v2, 0.0  ;;  %v4156_v11 = vsel %vm4108_vm7, %v4147_v8, 0.0 }
 0xba1   : > { %v4157_v14 = vadd.f32 %v4156_v11, %v4155_v10 }
 0xba2   : > { %v4145_v15 = vmul.f32 %v4137_v9, %v4137_v9  ;;  %v4149_v44 = vmul.f32 %v4141_v49, %v4141_v49 }
 0xba3   : > { %4158 = vadd.xlane.f32.xlu0 %v4157_v14 }
 0xba4   : > { %v4165_v3 = vsel %vm4108_vm7, %v4145_v15, 0.0  ;;  %v4166_v4 = vsel %vm4108_vm7, %v4149_v44, 0.0 }
 0xba5   : > { %v4167_v18 = vadd.f32 %v4166_v4, %v4165_v3 }
 0xba7   : > { %4168 = vadd.xlane.f32.xlu0 %v4167_v18 }
 0xc24   : > { %v4154_v51 = vpop.xlane.xlu1 %4153 }
 0xc25   : > { %v4170_v12 = vmul.f32 0.5, %v4154_v51 }
 0xc27   : > { %v4174_v13 = vadd.f32 1e-05, %v4170_v12 }
 0xc28   : > { %v4164_v21 = vpop.xlane.xlu1 %4163 }
 0xc29   : > { %4972 = vrsqrt.f32 %v4174_v13  ;;  %v4172_v50 = vmul.f32 0.5, %v4164_v21 }
 0xc2b   : > { %v4176_v22 = vadd.f32 1e-05, %v4172_v50 }
 0xc2c   : > { %v4159_v23 = vpop.xlane.xlu0 %4158 }
 0xc2d   : > { %4974 = vrsqrt.f32 %v4176_v22  ;;  %v4171_v24 = vmul.f32 0.5, %v4159_v23 }
 0xc2f   : > { %v4175_v25 = vadd.f32 1e-05, %v4171_v24 }
 0xc30   : > { %v4169_v26 = vpop.xlane.xlu0 %4168 }
 0xc31   : > { %4976 = vrsqrt.f32 %v4175_v25  ;;  %v4173_v27 = vmul.f32 0.5, %v4169_v26 }
 0xc33   : > { %v4177_v16 = vadd.f32 1e-05, %v4173_v27 }
 0xc35   : > { %4978 = vrsqrt.f32 %v4177_v16 }
 0xc36   : > { %v4973_v30 = vpop.eup %4972 }
 0xc37   : > { %v4182_v32 = vmul.f32 %v4973_v30, %v4134_v45  ;;  %v4186_v34 = vmul.f32 %v4973_v30, %v4138_v46 }
 0xc39   : > { %v4191_v36 = vmul.f32 %v4190_v31, %v4182_v32  ;;  %v4195_v33 = vmul.f32 %v4190_v31, %v4186_v34 }
 0xc3a   : > { %v4975_v39 = vpop.eup %4974 }
 0xc3b   : > { %v4200_v29 = vadd.f32 %v4199_v35, %v4191_v36  ;;  %v4204_v40 = vadd.f32 %v4199_v35, %v4195_v33  ;;  %v4184_v41 = vmul.f32 %v4975_v39, %v4136_v56  ;;  %v4188_v42 = vmul.f32 %v4975_v39, %v4140_v52 }
 0xc3d   : > { %v4208_v17 = vmax.f32 %v4200_v29, 0.0  ;;  %v4212_v20 = vmax.f32 %v4204_v40, 0.0  ;;  %v4193_v37 = vmul.f32 %v4190_v31, %v4184_v41  ;;  %v4197_v38 = vmul.f32 %v4190_v31, %v4188_v42 }
 0xc3e   : > { %v4977_v47 = vpop.eup %4976 }
 0xc3f   : > { %4216 = vst.msk [vmem:[%s5803_s24] sm:$0xff] %vm4108_vm7, %v4208_v17  ;;  %4220 = vst.msk [vmem:[%s5803_s24 + $0x20] sm:$0xff] %vm4108_vm7, %v4212_v20  ;;  %v4202_v19 = vadd.f32 %v4199_v35, %v4193_v37  ;;  %v4206_v45 = vadd.f32 %v4199_v35, %v4197_v38  ;;  %v4183_v46 = vmul.f32 %v4977_v47, %v4135_v61 }
 0xc40   : > { %v4187_v48 = vmul.f32 %v4977_v47, %v4139_v1 }
 0xc41   : > { %v4210_v53 = vmax.f32 %v4202_v19, 0.0  ;;  %v4214_v28 = vmax.f32 %v4206_v45, 0.0  ;;  %v4192_v54 = vmul.f32 %v4190_v31, %v4183_v46 }
 0xc42   : > { %v4196_v56 = vmul.f32 %v4190_v31, %v4187_v48  ;;  %v4979_v52 = vpop.eup %4978 }
 0xc43   : > { %4218 = vst.msk [vmem:[%s5803_s24 + $0x10] sm:$0xff] %vm4108_vm7, %v4210_v53  ;;  %4222 = vst.msk [vmem:[%s5803_s24 + $0x30] sm:$0xff] %vm4108_vm7, %v4214_v28  ;;  %v4201_v57 = vadd.f32 %v4199_v35, %v4192_v54  ;;  %v4185_v58 = vmul.f32 %v4979_v52, %v4137_v9  ;;  %v4189_v59 = vmul.f32 %v4979_v52, %v4141_v49 }
 0xc44   : > { %v4205_v55 = vadd.f32 %v4199_v35, %v4196_v56 }
 0xc45   : > { %v4209_v62 = vmax.f32 %v4201_v57, 0.0  ;;  %v4194_v60 = vmul.f32 %v4190_v31, %v4185_v58  ;;  %v4198_v61 = vmul.f32 %v4190_v31, %v4189_v59 }
 0xc46   : > { %v4213_v63 = vmax.f32 %v4205_v55, 0.0  ;;  %v4276_v6 = vld [vmem:[%s5803_s24] sm:$0xff] (%p5906_p12) }
 0xc47   : > { %4217 = vst.msk [vmem:[%s5803_s24 + $0x8] sm:$0xff] %vm4108_vm7, %v4209_v62  ;;  %v4203_v1 = vadd.f32 %v4199_v35, %v4194_v60  ;;  %v4207_v0 = vadd.f32 %v4199_v35, %v4198_v61  ;;  %4230 = sbr.rel (!%p5906_p12) target bundleno = 3157 (0xc55), region = 196  ;;  %v4284_v9 = vld [vmem:[%s5803_s24 + $0x20] sm:$0xff] (%p5906_p12)  ;;  %4277 = vst [vmem:[%s4233_s4] sm:$0xff] (%p5906_p12), %v4276_v6 }
 0xc48   : > { %4221 = vst.msk [vmem:[%s5803_s24 + $0x28] sm:$0xff] %vm4108_vm7, %v4213_v63  ;;  %4285 = vst [vmem:[%s4233_s4 + $0x40] sm:$0xff] (%p5906_p12), %v4284_v9 }
 0xc49   : > { %v4211_v5 = vmax.f32 %v4203_v1, 0.0  ;;  %v4215_v43 = vmax.f32 %v4207_v0, 0.0 }
 0xc4a   : > { %v4280_v2 = vld [vmem:[%s5803_s24 + $0x10] sm:$0xff] (%p5906_p12) }
 0xc4b   : > { %4219 = vst.msk [vmem:[%s5803_s24 + $0x18] sm:$0xff] %vm4108_vm7, %v4211_v5  ;;  %4223 = vst.msk [vmem:[%s5803_s24 + $0x38] sm:$0xff] %vm4108_vm7, %v4215_v43  ;;  %v4288_v10 = vld [vmem:[%s5803_s24 + $0x30] sm:$0xff] (%p5906_p12) }
 0xc4c   : > { %4281 = vst [vmem:[%s4233_s4 + $0x10] sm:$0xff] %v4280_v2  ;;  %4289 = vst [vmem:[%s4233_s4 + $0x50] sm:$0xff] %v4288_v10 }
 0xc4e   : > { %v4278_v7 = vld [vmem:[%s5803_s24 + $0x8] sm:$0xff] }
 0xc4f   : > { %v4286_v49 = vld [vmem:[%s5803_s24 + $0x28] sm:$0xff]  ;;  %4279 = vst [vmem:[%s4233_s4 + $0x8] sm:$0xff] %v4278_v7 }
 0xc50   : > { %4287 = vst [vmem:[%s4233_s4 + $0x48] sm:$0xff] %v4286_v49 }
 0xc52   : > { %v4282_v8 = vld [vmem:[%s5803_s24 + $0x18] sm:$0xff] }
 0xc53   : > { %4283 = vst [vmem:[%s4233_s4 + $0x18] sm:$0xff] %v4282_v8  ;;  %v4290_v11 = vld [vmem:[%s5803_s24 + $0x38] sm:$0xff] }
 0xc54   : > { %4291 = vst [vmem:[%s4233_s4 + $0x58] sm:$0xff] %v4290_v11 }
 0xc55 PF: > { %s5908_s22 = sld [smem:[#allocation20_spill]]  ;;  %s5910_s20 = smov %s5126_s21 }
 0xc56   : > { %s5909_s16 = sld [smem:[#allocation21_spill]]  ;;  %s5911_s21 = smov %s5130_s1 }
 0xc5b   : > { %p33_p1 = scmp.ge.s32.totalorder %s5908_s22, 4  }
 0xc5c   : > { %s5912_s1 = smov %s5909_s16 }
 0xc5d   :  { %35 = sbr.rel (!%p33_p1) target bundleno = 15 (0xf), region = 287 }
 0xc62   :  { %4307 = vsyncpa [#allocation6], 1 }
 0xc63   :  { %4309 = vsyncpa [#allocation6 + $0x1], 1 }
 0xc64   :  { %4310 = vsyncpa [#allocation8], 1 }
 0xc65   :  { %4311 = vsyncpa [#allocation11], 1 }

// kernel: generator_forward.3
= control target key start
LH: loop header
LB: loop body
LE: loop exit
PB: predicated region body
PF: predicated region fallthrough
CT: control target
= control target key end

     0   :  { %s9312_s0 = inlined_call_operand.vmem [shape: f32[2,8,8], index: 0, kind: input, shape index: {}]   ;;  %s9313_s1 = inlined_call_operand.vmem [shape: f32[2,1,8], index: 1, kind: input, shape index: {}]   ;;  %s9314_s2 = inlined_call_operand.vmem [shape: f32[2,1,8], index: 2, kind: input, shape index: {}]   ;;  %s9315_s3 = inlined_call_operand.vmem [shape: f32[2,6,8,4], index: 3, kind: input, shape index: {}]   ;;  %s9316_s4 = inlined_call_operand.vmem [shape: f32[2,6,1,4], index: 4, kind: input, shape index: {}]   ;;  %s9317_s5 = inlined_call_operand.vmem [shape: f32[2,2,4,8], index: 5, kind: input, shape index: {}]   ;;  %s9318_s6 = inlined_call_operand.vmem [shape: f32[2,1,8], index: 6, kind: input, shape index: {}]   ;;  %s9319_s7 = inlined_call_operand.vmem [shape: f32[2,8,2048], index: 7, kind: input, shape index: {}]   ;;  %s9320_s8 = inlined_call_operand.vmem [shape: f32[2,1,2048], index: 8, kind: input, shape index: {}]   ;;  %s9321_s9 = inlined_call_operand.vmem [shape: f32[2,2048,8], index: 9, kind: input, shape index: {}]   ;;  %s9322_s10 = inlined_call_operand.vmem [shape: f32[2,1,8], index: 10, kind: input, shape index: {}]   ;;  %s9323_s11 = inlined_call_operand.vmem [shape: f32[2,1,8], index: 11, kind: input, shape index: {}]   ;;  %s9324_s12 = inlined_call_operand.vmem [shape: f32[2,1,8], index: 12, kind: input, shape index: {}]   ;;  %s9325_s13 = inlined_call_operand.vmem [shape: f32[1,8], index: 13, kind: input, shape index: {}]   ;;  %s9326_s14 = inlined_call_operand.vmem [shape: f32[1,8], index: 14, kind: input, shape index: {}]   ;;  %s9327_s15 = inlined_call_operand.<no memory space> [shape: f32[1,1], index: 15, kind: input, shape index: {}]   ;;  %s9328_s17 = inlined_call_operand.hbm [shape: f32[2,8,8], index: 17, kind: output, shape index: {}]   ;;  %s9329_s16 = inlined_call_operand.<no memory space> [shape: f32[1,1], index: 16, kind: input, shape index: {}]  }
   0x1   :  { %9334 = sst [smem:[#allocation10_spill]] %s9312_s0  ;;  %v22_v0 = vstv %s9327_s15  ;;  %v24_v1 = vstv %s9329_s16 }
   0x2   :  { %9335 = sst [smem:[#allocation11_spill]] %s9313_s1  ;;  %23 = vst [vmem:[#allocation2] sm:$0x1] %v22_v0  ;;  %25 = vst [vmem:[#allocation3] sm:$0x1] %v24_v1 }
   0x3   :  { %9336 = sst [smem:[#allocation12_spill]] %s9314_s2 }
   0x4   :  { %9337 = sst [smem:[#allocation13_spill]] %s9315_s3 }
   0x5   :  { %26 = vsyncpa [#allocation5], 0 }
   0x6   :  { %28 = vsyncpa [#allocation5 + $0x1], 0  ;;  %s7136_s28 = smov 0   ;;  %s7138_s29 = smov 0  }
   0x7   :  { %s7140_s0 = smov 0   ;;  %s7142_s30 = smov 0  }
   0x8 LB: > { %9338 = sst [smem:[#allocation7_spill]] %s7030_s0  ;;  %s7157_s15 = sadd.s32 4294967295, %s7034_s30   ;;  %s7034_s30 = sphi %s7142_s30, %s9347_s30   ;;  %s7030_s0 = sphi %s7140_s0, %s9349_s0   ;;  %s7026_s29 = sphi %s7138_s29, %s9351_s29   ;;  %s7022_s28 = sphi %s7136_s28, %s9350_s28  }
   0x9   : > { %s5784_s16 = sadd.s32 4294967294, %s7034_s30   ;;  %s7161_s18 = sadd.s32 1, %s7034_s30  }
   0xa   : > { %9339 = sst [smem:[#allocation8_spill]] %s7161_s18  ;;  %s403_s19 = sadd.s32 1, %s7030_s0 }
   0xb   : > { %s400_s1 = ssub.s32 %s7034_s30, %s7161_s18  ;;  %p413_p0 = scmp.ne.s32.totalorder %s7030_s0, %s7026_s29 }
   0xc   : > { %p401_p1 = scmp.eq.s32.totalorder %s400_s1, 0  ;;  %p414_p2 = scmp.eq.s32.totalorder %s7157_s15, 1 }
   0xd   : > { %p419_p3 = scmp.ne.s32.totalorder %s7026_s29, %s7022_s28  ;;  %p420_p4 = scmp.eq.s32.totalorder %s5784_s16, 1 }
   0xe   : > { %s7172_s20 = scalar_select %p401_p1, %s7030_s0, %s403_s19  }
   0xf   : > { %p7174_p5 = por %p414_p2, %p413_p0  ;;  %p7178_p6 = por %p420_p4, %p419_p3 }
  0x10   : > { %9340 = sst [smem:[#allocation9_spill]] %s7172_s20  ;;  %p5787_p7 = scmp.ge.s32.totalorder %s7034_s30, 1 }
  0x11   : > { %p493_p8 = scmp.lt.s32.totalorder %s7034_s30, 3 }
  0x13   : > { %p494_p9 = pnand %p5787_p7, %p493_p8 }
  0x14   : > { %p544_p10 = scmp.lt.s32.totalorder (!%p494_p9), %s7157_s15, 1  ;;  %s9343_s27 = sld [smem:[#allocation10_spill]] (!%p494_p9) }
  0x15   : > { %497 = sbr.rel (%p494_p9) target bundleno = 4903 (0x1327), region = 88  ;;  %s9344_s3 = sld [smem:[#allocation13_spill]] (!%p494_p9) }
  0x16   : > { %s9346_s2 = sld [smem:[#allocation12_spill]] (!%p494_p9)  ;;  %s541_s20 = sand.u32 (!%p494_p9), 1, %s7026_s29  }
  0x17   : > { %s6161_s19 = sshll.u32 (!%p494_p9), %s7157_s15, 7  ;;  %s5712_s25 = scalar_lea.sflag (!%p494_p9), [#allocation5], %s541_s20 }
  0x18   : > { %s9276_s18 = scalar_lea.hbm (!%p494_p9), %s9328_s17, %s6161_s19 }
  0x1a   : > { %s545_s23 = scalar_select %p544_p10, %s7157_s15, 1  ;;  %vm551_vm0 = vcmask 64512   ;;  %v7036_v11 = vmov 0.0   ;;  %vm7037_vm1 = vmmov 0   ;;  %v5794_v34 = vld [vmem:[%s9316_s4 + $0x2] ss:$0 sm:$0xff] }
  0x1b   : > { %v587_v9 = vld [vmem:[%s9344_s3] sm:$0xff]  ;;  %v588_v10 = vld [vmem:[%s9344_s3 + $0x8] sm:$0xff]  ;;  %6772 = vmatprep.subr.mxu0 %v7036_v11  ;;  %6777 = vmatprep.subr.mxu1 %v7036_v11  ;;  %v589_v26 = vld [vmem:[%s9344_s3 + $0x10] sm:$0xff]  ;;  %vm1058_vm4 = vcmask 31744   ;;  %vm1386_vm5 = vcmask 1043456  }
  0x1c   : > { %s5789_s24 = sshll.u32 %s545_s23, 3  ;;  %6773 = vmatpush3.msra.mxu0 %v587_v9  ;;  %6774 = vmatprep.mubr.msk.f32.mxu0 %vm7037_vm1, %v7036_v11  ;;  %v5791_v23 = vld [vmem:[%s9346_s2] ss:$0 sm:$0xff]  ;;  %v590_v27 = vld [vmem:[%s9344_s3 + $0x18] sm:$0xff]  ;;  %v592_v29 = vld [vmem:[%s9344_s3 + $0x28] sm:$0xff] }
  0x1d   : > { %s547_s16 = scalar_lea.vmem %s9343_s27, %s5789_s24  ;;  %6778 = vmatpush3.msra.mxu1 %v588_v10  ;;  %6779 = vmatprep.mubr.msk.f32.mxu1 %vm7037_vm1, %v7036_v11  ;;  %s9345_s27 = sld [smem:[#allocation11_spill]]  ;;  %v591_v28 = vld [vmem:[%s9344_s3 + $0x20] sm:$0xff] }
  0x1e   : > { %v7189_v2 = vld [vmem:[%s547_s16] sm:$0xff]  ;;  %6782 = vmatprep.subr.mxu0 %v7036_v11  ;;  %6787 = vmatprep.subr.mxu1 %v7036_v11  ;;  %s5788_s16 = sshll.u32 %s541_s20, 3 }
  0x1f   : > { %v552_v3 = vsel %vm551_vm0, %v7189_v2, 0.0  ;;  %v5795_v35 = vld [vmem:[%s9316_s4 + $0x3] ss:$0 sm:$0xff]  ;;  %v5792_v38 = vld [vmem:[%s9316_s4] ss:$0 sm:$0xff]  ;;  %s543_s1 = scalar_lea.vmem [#allocation4], %s5788_s16 }
  0x20   : > { %553 = vadd.xlane.f32.xlu0 %v552_v3  ;;  %v5793_v39 = vld [vmem:[%s9316_s4 + $0x1] ss:$0 sm:$0xff]  ;;  %v5796_v44 = vld [vmem:[%s9316_s4 + $0x4] ss:$0 sm:$0xff]  ;;  %v5797_v45 = vld [vmem:[%s9316_s4 + $0x5] ss:$0 sm:$0xff] }
  0x21   : > { %s5725_s23 = sshll.u32 %s543_s1, 4  ;;  %s5726_s23 = int_to_ptr.vmem [resolvable:$true] %s5725_s23 }
  0x22   : > { %s6974_s26 = scalar_lea.vmem %s5726_s23, 128 }
  0x23   : > { %v5790_v20 = vld [vmem:[%s9345_s27] ss:$0 sm:$0xff]  ;;  %p6975_p11 = scmp.ne.s32.totalorder %s5726_s23, %s6974_s26 }
  0x25   : > { %p6976_p12 = pnand %p6975_p11, %p7174_p5 }
  0x27   : > { %p6977_p13 = pneg %p6976_p12 }
  0xa9   : > { %v554_v4 = vpop.xlane.xlu0 %553 }
  0xaa   : > { %v556_v5 = vmul.f32 0.125, %v554_v4 }
  0xac   : > { %v557_v6 = vsub.f32 %v7189_v2, %v556_v5 }
  0xae   : > { %v558_v7 = vmul.f32 %v557_v6, %v557_v6  ;;  %v578_v21 = vmul.f32 %v5790_v20, %v557_v6 }
  0xb0   : > { %v559_v8 = vsel %vm551_vm0, %v558_v7, 0.0 }
  0xb1   : > { %560 = vadd.xlane.f32.xlu0 %v559_v8 }
 0x13a   : > { %v561_v12 = vpop.xlane.xlu0 %560 }
 0x13b   : > { %v562_v13 = vmul.f32 0.14285715, %v561_v12 }
 0x13d   : > { %6936 = vrsqrt.f32 %v562_v13  ;;  %vm565_vm2 = vcmp.eq.f32.partialorder %v562_v13, inf  ;;  %v568_v16 = vand.u32 2147483648, %v562_v13  ;;  %vm567_vm3 = vcmp.eq.f32.partialorder %v562_v13, 0.0 }
 0x14a   : > { %v6937_v14 = vpop.eup %6936 }
 0x14b   : > { %v564_v15 = vmul.f32 %v6937_v14, %v562_v13 }
 0x14d   : > { %v566_v17 = vsel %vm565_vm2, %v562_v13, %v564_v15 }
 0x14e   : > { %v569_v18 = vsel %vm567_vm3, %v568_v16, %v566_v17  ;;  %v1381_v16 = vld [vmem:[%s9317_s5] sm:$0xf]  ;;  %v1382_v17 = vld [vmem:[%s9317_s5 + $0x4] sm:$0xf] }
 0x14f   : > { %v570_v19 = vadd.f32 1e-06, %v569_v18 }
 0x151   : > { %6938 = vrcp.f32 %v570_v19 }
 0x15e   : > { %v6939_v22 = vpop.eup %6938 }
 0x15f   : > { %v579_v24 = vmul.f32 %v6939_v22, %v578_v21 }
 0x161   : > { %v586_v25 = vadd.f32 %v5791_v23, %v579_v24 }
 0x163   : > { %6775 = vmatmul.mubr.msk.f32.vlgmr.msra.gmra.mxu0 %vm551_vm0, %v586_v25  ;;  %6780 = vmatmul.mubr.msk.f32.vlgmr.msra.gmra.mxu1 %vm551_vm0, %v586_v25 }
 0x164   : > { %6783 = vmatpush3.msra.mxu0 %v589_v26  ;;  %6784 = vmatprep.mubr.msk.f32.mxu0 %vm7037_vm1, %v7036_v11 }
 0x165   : > { %6788 = vmatpush3.msra.mxu1 %v590_v27  ;;  %6789 = vmatprep.mubr.msk.f32.mxu1 %vm7037_vm1, %v7036_v11 }
 0x166   : > { %6792 = vmatprep.subr.mxu0 %v7036_v11  ;;  %6797 = vmatprep.subr.mxu1 %v7036_v11 }
 0x167   : > { %6785 = vmatmul.mubr.msk.f32.vlgmr.msra.gmra.mxu0 %vm551_vm0, %v586_v25  ;;  %6790 = vmatmul.mubr.msk.f32.vlgmr.msra.gmra.mxu1 %vm551_vm0, %v586_v25 }
 0x168   : > { %6793 = vmatpush3.msra.mxu0 %v591_v28  ;;  %6794 = vmatprep.mubr.msk.f32.mxu0 %vm7037_vm1, %v7036_v11 }
 0x169   : > { %6798 = vmatpush3.msra.mxu1 %v592_v29  ;;  %6799 = vmatprep.mubr.msk.f32.mxu1 %vm7037_vm1, %v7036_v11  ;;  %v5814_v29 = vld [vmem:[%s9318_s6] ss:$0 sm:$0xff] }
 0x16a   : > { %6802 = vmatprep.subr.mxu0 %v7036_v11  ;;  %6807 = vmatprep.subr.mxu1 %v7036_v11 }
 0x16b   : > { %6795 = vmatmul.mubr.msk.f32.vlgmr.msra.gmra.mxu0 %vm551_vm0, %v586_v25  ;;  %6800 = vmatmul.mubr.msk.f32.vlgmr.msra.gmra.mxu1 %vm551_vm0, %v586_v25 }
 0x16c   : > { %6804 = vmatprep.mubr.msk.f32.mxu0 %vm7037_vm1, %v7036_v11  ;;  %6809 = vmatprep.mubr.msk.f32.mxu1 %vm7037_vm1, %v7036_v11 }
 0x223   : > { %v704_v30 = vpop.f32.mrf.mxu0  ;;  %v774_v31 = vpop.f32.mrf.mxu1 }
 0x224   : > { %v705_v46 = vadd.f32 %v5792_v38, %v704_v30  ;;  %v775_v47 = vadd.f32 %v5793_v39, %v774_v31  ;;  %v1585_v38 = vld [vmem:[%s9319_s7 + $0x8] sm:$0xff]  ;;  %v1587_v39 = vld [vmem:[%s9319_s7 + $0x18] sm:$0xff] }
 0x225   : > { %v6776_v32 = vpop.f32.mrf.mxu0  ;;  %v6781_v33 = vpop.f32.mrf.mxu1 }
 0x227   : > { %v844_v36 = vpop.f32.mrf.mxu0  ;;  %v914_v37 = vpop.f32.mrf.mxu1 }
 0x228   : > { %v845_v40 = vadd.f32 %v5794_v34, %v844_v36  ;;  %v915_v41 = vadd.f32 %v5795_v35, %v914_v37 }
 0x229   : > { %v6786_v42 = vpop.f32.mrf.mxu0  ;;  %v6791_v43 = vpop.f32.mrf.mxu1 }
 0x22a   : > { %6803 = vmatpush3.xpose.msk.msra.mxu0 %vm1058_vm4, %v845_v40  ;;  %6808 = vmatpush3.xpose.msk.msra.mxu1 %vm1058_vm4, %v915_v41  ;;  %v1586_v40 = vld [vmem:[%s9319_s7 + $0x10] sm:$0xff]  ;;  %v1589_v41 = vld [vmem:[%s9319_s7 + $0x28] sm:$0xff]  ;;  %v1591_v42 = vld [vmem:[%s9319_s7 + $0x38] sm:$0xff] }
 0x22b   : > { %v984_v48 = vpop.f32.mrf.mxu0  ;;  %v1054_v49 = vpop.f32.mrf.mxu1  ;;  %6812 = vmatprep.subr.mxu0 %v7036_v11  ;;  %6817 = vmatprep.subr.mxu1 %v7036_v11 }
 0x22c   : > { %v985_v50 = vadd.f32 %v5796_v44, %v984_v48  ;;  %v1055_v51 = vadd.f32 %v5797_v45, %v1054_v49 }
 0x22d   : > { %v6796_v52 = vpop.f32.mrf.mxu0  ;;  %v6801_v53 = vpop.f32.mrf.mxu1  ;;  %6805 = vmatmul.mubr.msk.f32.vlgmr.msra.gmra.mxu0 %vm1058_vm4, %v705_v46  ;;  %6810 = vmatmul.mubr.msk.f32.vlgmr.msra.gmra.mxu1 %vm1058_vm4, %v775_v47 }
 0x22e   : > { %6813 = vmatpush3.msra.mxu0 %v985_v50  ;;  %6818 = vmatpush3.msra.mxu1 %v1055_v51  ;;  %v5815_v51 = vld [vmem:[%s9323_s11] ss:$0 sm:$0xff] }
 0x22f   : > { %6814 = vmatprep.mubr.msk.f32.mxu0 %vm7037_vm1, %v7036_v11  ;;  %6819 = vmatprep.mubr.msk.f32.mxu1 %vm7037_vm1, %v7036_v11 }
 0x230   : > { %6822 = vmatprep.subr.mxu0 %v7036_v11  ;;  %6827 = vmatprep.subr.mxu1 %v7036_v11 }
 0x2ed   : > { %v1131_v54 = vpop.f32.mrf.mxu0  ;;  %v1207_v55 = vpop.f32.mrf.mxu1 }
 0x2ee   : > { %v1211_v56 = vmul.f32 0.5, %v1131_v54  ;;  %v1212_v59 = vmul.f32 0.5, %v1207_v55  ;;  %v5816_v54 = vld [vmem:[%s9324_s12] ss:$0 sm:$0xff] }
 0x2ef   : > { %v6806_v57 = vpop.f32.mrf.mxu0  ;;  %v6811_v58 = vpop.f32.mrf.mxu1 }
 0x2f0   : > { %v1213_v60 = vsel %vm551_vm0, %v1211_v56, -inf  ;;  %v1216_v61 = vsel %vm551_vm0, %v1212_v59, -inf  ;;  %v1588_v57 = vld [vmem:[%s9319_s7 + $0x20] sm:$0xff]  ;;  %v1590_v58 = vld [vmem:[%s9319_s7 + $0x30] sm:$0xff] }
 0x2f1   : > { %1214 = vmax.xlane.f32.xlu1 %v1213_v60  ;;  %v1595_v60 = vld [vmem:[%s9319_s7 + $0x58] sm:$0xff] }
 0x2f5   : > { %1217 = vmax.xlane.f32.xlu1 %v1216_v61  ;;  %v1592_v61 = vld [vmem:[%s9319_s7 + $0x40] sm:$0xff] }
 0x37a   : > { %v1215_v62 = vpop.xlane.xlu1 %1214 }
 0x37b   : > { %v1219_v63 = vsub.f32 %v1211_v56, %v1215_v62  ;;  %v1594_v62 = vld [vmem:[%s9319_s7 + $0x50] sm:$0xff] }
 0x37d   : > { %v1221_v0 = vmul.f32 1.442695, %v1219_v63  ;;  %v1597_v63 = vld [vmem:[%s9319_s7 + $0x68] sm:$0xff] }
 0x37e   : > { %v1218_v1 = vpop.xlane.xlu1 %1217 }
 0x37f   : > { %6940 = vpow2.f32 %v1221_v0  ;;  %v1220_v3 = vsub.f32 %v1212_v59, %v1218_v1  ;;  %v1593_v59 = vld [vmem:[%s9319_s7 + $0x48] sm:$0xff]  ;;  %v1599_v0 = vld [vmem:[%s9319_s7 + $0x78] sm:$0xff]  ;;  %v1596_v1 = vld [vmem:[%s9319_s7 + $0x60] sm:$0xff] }
 0x381   : > { %v1223_v4 = vmul.f32 1.442695, %v1220_v3  ;;  %v1598_v3 = vld [vmem:[%s9319_s7 + $0x70] sm:$0xff] }
 0x383   : > { %6942 = vpow2.f32 %v1223_v4  ;;  %v2302_v4 = vld [vmem:[%s9321_s9 + $0xf8] sm:$0xff] }
 0x38c   : > { %v6941_v5 = vpop.eup %6940 }
 0x38d   : > { %v1225_v6 = vsel %vm551_vm0, %v6941_v5, 0.0 }
 0x38e   : > { %1226 = vadd.xlane.f32.xlu0 %v1225_v6  ;;  %v2286_v6 = vld [vmem:[%s9321_s9 + $0x78] sm:$0xff] }
 0x390   : > { %v6943_v7 = vpop.eup %6942 }
 0x391   : > { %v1228_v8 = vsel %vm551_vm0, %v6943_v7, 0.0 }
 0x392   : > { %1229 = vadd.xlane.f32.xlu1 %v1228_v8  ;;  %v2301_v8 = vld [vmem:[%s9321_s9 + $0xf0] sm:$0xff] }
 0x417   : > { %v1227_v9 = vpop.xlane.xlu0 %1226 }
 0x418   : > { %6944 = vrcp.f32 %v1227_v9  ;;  %v2333_v9 = vld [vmem:[%s9321_s9 + $0x1f0] sm:$0xff] }
 0x41b   : > { %v1230_v10 = vpop.xlane.xlu1 %1229 }
 0x41c   : > { %6946 = vrcp.f32 %v1230_v10  ;;  %v2285_v10 = vld [vmem:[%s9321_s9 + $0x70] sm:$0xff] }
 0x425   : > { %v6945_v12 = vpop.eup %6944 }
 0x426   : > { %v1233_v13 = vmul.f32 %v6945_v12, %v6941_v5  ;;  %v2334_v5 = vld [vmem:[%s9321_s9 + $0x1f8] sm:$0xff]  ;;  %v2317_v12 = vld [vmem:[%s9321_s9 + $0x170] sm:$0xff] }
 0x428   : > { %6815 = vmatmul.mubr.msk.f32.vlgmr.msra.gmra.mxu0 %vm551_vm0, %v1233_v13  ;;  %v2300_v13 = vld [vmem:[%s9321_s9 + $0xe8] sm:$0xff] }
 0x429   : > { %v6947_v14 = vpop.eup %6946  ;;  %6824 = vmatprep.mubr.msk.f32.mxu0 %vm7037_vm1, %v7036_v11  ;;  %6823 = vmatpush3.msk.msra.mxu0 %vm1386_vm5, %v1381_v16  ;;  %v2316_v16 = vld [vmem:[%s9321_s9 + $0x168] sm:$0xff] }
 0x42a   : > { %v1234_v15 = vmul.f32 %v6947_v14, %v6943_v7  ;;  %1717 = vmatprep.subr.mxu0 %v1585_v38  ;;  %v2318_v7 = vld [vmem:[%s9321_s9 + $0x178] sm:$0xff]  ;;  %v2332_v14 = vld [vmem:[%s9321_s9 + $0x1e8] sm:$0xff] }
 0x42b   : > { %v2294_v38 = vld [vmem:[%s9321_s9 + $0xb8] sm:$0xff] }
 0x42c   : > { %6820 = vmatmul.mubr.msk.f32.vlgmr.msra.gmra.mxu1 %vm551_vm0, %v1234_v15  ;;  %v2284_v15 = vld [vmem:[%s9321_s9 + $0x68] sm:$0xff] }
 0x42d   : > { %6829 = vmatprep.mubr.msk.f32.mxu1 %vm7037_vm1, %v7036_v11  ;;  %6828 = vmatpush3.msk.msra.mxu1 %vm1386_vm5, %v1382_v17  ;;  %v2299_v17 = vld [vmem:[%s9321_s9 + $0xe0] sm:$0xff] }
 0x42e   : > { %1788 = vmatprep.subr.mxu1 %v1587_v39  ;;  %v2278_v39 = vld [vmem:[%s9321_s9 + $0x38] sm:$0xff] }
 0x4e8   : > { %v1304_v18 = vpop.f32.mrf.mxu0 }
 0x4e9   : > { %6825 = vmatmul.mubr.msk.f32.vlgmr.msra.gmra.mxu0 %vm1058_vm4, %v1304_v18  ;;  %v2331_v18 = vld [vmem:[%s9321_s9 + $0x1e0] sm:$0xff] }
 0x4ea   : > { %v6816_v19 = vpop.f32.mrf.mxu0  ;;  %1751 = vmatprep.mubr.f32.mxu0 %v7036_v11 }
 0x4eb   : > { %v2283_v19 = vld [vmem:[%s9321_s9 + $0x60] sm:$0xff] }
 0x4ec   : > { %v1377_v20 = vpop.f32.mrf.mxu1 }
 0x4ed   : > { %6830 = vmatmul.mubr.msk.f32.vlgmr.msra.gmra.mxu1 %vm1058_vm4, %v1377_v20  ;;  %v2315_v20 = vld [vmem:[%s9321_s9 + $0x160] sm:$0xff] }
 0x4ee   : > { %v6821_v21 = vpop.f32.mrf.mxu1  ;;  %1822 = vmatprep.mubr.f32.mxu1 %v7036_v11  ;;  %1789 = vmatpush1.msra.mxu1 %v1586_v40  ;;  %v2310_v40 = vld [vmem:[%s9321_s9 + $0x138] sm:$0xff] }
 0x4ef   : > { %1930 = vmatprep.subr.mxu1 %v1591_v42  ;;  %v2298_v21 = vld [vmem:[%s9321_s9 + $0xd8] sm:$0xff]  ;;  %v2325_v42 = vld [vmem:[%s9321_s9 + $0x1b0] sm:$0xff] }
 0x5a9   : > { %v1456_v22 = vpop.f32.mrf.mxu0 }
 0x5aa   : > { %v1536_v25 = vsel %vm551_vm0, %v1456_v22, 0.0  ;;  %v2330_v22 = vld [vmem:[%s9321_s9 + $0x1d8] sm:$0xff] }
 0x5ab   : > { %v6826_v23 = vpop.f32.mrf.mxu0 }
 0x5ac   : > { %v2282_v23 = vld [vmem:[%s9321_s9 + $0x58] sm:$0xff] }
 0x5ad   : > { %v1532_v24 = vpop.f32.mrf.mxu1 }
 0x5ae   : > { %v1537_v26 = vsel %vm551_vm0, %v1532_v24, 0.0  ;;  %v2314_v24 = vld [vmem:[%s9321_s9 + $0x158] sm:$0xff] }
 0x5af   : > { %v1538_v27 = vadd.f32 %v1537_v26, %v1536_v25  ;;  %v6831_v28 = vpop.f32.mrf.mxu1  ;;  %v2297_v25 = vld [vmem:[%s9321_s9 + $0xd0] sm:$0xff] }
 0x5b0   : > { %v2329_v26 = vld [vmem:[%s9321_s9 + $0x1d0] sm:$0xff] }
 0x5b1   : > { %v1539_v30 = vadd.f32 %v1538_v27, %v7189_v2  ;;  %v1584_v2 = vld [vmem:[%s9319_s7] sm:$0xff]  ;;  %v2281_v27 = vld [vmem:[%s9321_s9 + $0x50] sm:$0xff] }
 0x5b2   : > { %1718 = vmatpush1.msra.mxu0 %v1584_v2  ;;  %v2313_v28 = vld [vmem:[%s9321_s9 + $0x150] sm:$0xff]  ;;  %v2326_v2 = vld [vmem:[%s9321_s9 + $0x1b8] sm:$0xff] }
 0x5b3   : > { %v7307_v31 = vadd.f32 %v5814_v29, %v1539_v30  ;;  %1859 = vmatprep.subr.mxu0 %v1589_v41  ;;  %v2296_v29 = vld [vmem:[%s9321_s9 + $0xc8] sm:$0xff]  ;;  %v2293_v41 = vld [vmem:[%s9321_s9 + $0xb0] sm:$0xff] }
 0x5b4   : > { %v2328_v30 = vld [vmem:[%s9321_s9 + $0x1c8] sm:$0xff] }
 0x5b5   : > { %v1550_v32 = vsel %vm551_vm0, %v7307_v31, 0.0 }
 0x5b6   : > { %1551 = vadd.xlane.f32.xlu0 %v1550_v32  ;;  %v2280_v32 = vld [vmem:[%s9321_s9 + $0x48] sm:$0xff] }
 0x63f   : > { %v1552_v33 = vpop.xlane.xlu0 %1551 }
 0x640   : > { %v1553_v34 = vmul.f32 0.125, %v1552_v33  ;;  %v2312_v33 = vld [vmem:[%s9321_s9 + $0x148] sm:$0xff] }
 0x642   : > { %v1554_v35 = vsub.f32 %v7307_v31, %v1553_v34  ;;  %v2295_v34 = vld [vmem:[%s9321_s9 + $0xc0] sm:$0xff] }
 0x644   : > { %v1555_v36 = vmul.f32 %v1554_v35, %v1554_v35  ;;  %v1575_v52 = vmul.f32 %v5815_v51, %v1554_v35  ;;  %v2327_v35 = vld [vmem:[%s9321_s9 + $0x1c0] sm:$0xff] }
 0x645   : > { %v2275_v51 = vld [vmem:[%s9321_s9 + $0x20] sm:$0xff] }
 0x646   : > { %v1556_v37 = vsel %vm551_vm0, %v1555_v36, 0.0  ;;  %v2279_v36 = vld [vmem:[%s9321_s9 + $0x40] sm:$0xff] }
 0x647   : > { %1557 = vadd.xlane.f32.xlu1 %v1556_v37  ;;  %v2311_v37 = vld [vmem:[%s9321_s9 + $0x140] sm:$0xff] }
 0x6d0   : > { %v1558_v43 = vpop.xlane.xlu1 %1557 }
 0x6d1   : > { %v1559_v44 = vmul.f32 0.14285715, %v1558_v43  ;;  %v2277_v43 = vld [vmem:[%s9321_s9 + $0x30] sm:$0xff] }
 0x6d3   : > { %6948 = vrsqrt.f32 %v1559_v44  ;;  %vm1562_vm6 = vcmp.eq.f32.partialorder %v1559_v44, inf  ;;  %v1565_v47 = vand.u32 2147483648, %v1559_v44  ;;  %vm1564_vm7 = vcmp.eq.f32.partialorder %v1559_v44, 0.0 }
 0x6e0   : > { %v6949_v45 = vpop.eup %6948 }
 0x6e1   : > { %v1561_v46 = vmul.f32 %v6949_v45, %v1559_v44  ;;  %v2292_v45 = vld [vmem:[%s9321_s9 + $0xa8] sm:$0xff] }
 0x6e3   : > { %v1563_v48 = vsel %vm1562_vm6, %v1559_v44, %v1561_v46  ;;  %v2309_v44 = vld [vmem:[%s9321_s9 + $0x130] sm:$0xff]  ;;  %v2324_v46 = vld [vmem:[%s9321_s9 + $0x1a8] sm:$0xff] }
 0x6e4   : > { %v1566_v49 = vsel %vm1564_vm7, %v1565_v47, %v1563_v48  ;;  %v2276_v47 = vld [vmem:[%s9321_s9 + $0x28] sm:$0xff] }
 0x6e5   : > { %v1567_v50 = vadd.f32 1e-06, %v1566_v49  ;;  %v2308_v48 = vld [vmem:[%s9321_s9 + $0x128] sm:$0xff]  ;;  %v2291_v49 = vld [vmem:[%s9321_s9 + $0xa0] sm:$0xff] }
 0x6e7   : > { %6950 = vrcp.f32 %v1567_v50  ;;  %v2323_v50 = vld [vmem:[%s9321_s9 + $0x1a0] sm:$0xff] }
 0x6f4   : > { %v6951_v53 = vpop.eup %6950 }
 0x6f5   : > { %v1576_v55 = vmul.f32 %v6951_v53, %v1575_v52  ;;  %v2307_v52 = vld [vmem:[%s9321_s9 + $0x120] sm:$0xff]  ;;  %v2290_v53 = vld [vmem:[%s9321_s9 + $0x98] sm:$0xff] }
 0x6f7   : > { %v1583_v56 = vadd.f32 %v5816_v54, %v1576_v55  ;;  %v2322_v54 = vld [vmem:[%s9321_s9 + $0x198] sm:$0xff] }
 0x6f8   : > { %v2274_v55 = vld [vmem:[%s9321_s9 + $0x18] sm:$0xff] }
 0x6f9   : > { %5817 = vmatmul.mubr.msk.f32.vlgmr.msra.gmra.mxu0 %vm551_vm0, %v1583_v56  ;;  %5818 = vmatmul.mubr.msk.f32.vlgmr.msra.gmra.mxu1 %vm551_vm0, %v1583_v56 }
 0x6fa   : > { %1860 = vmatpush1.msra.mxu0 %v1588_v57  ;;  %1893 = vmatprep.mubr.f32.mxu0 %v7036_v11  ;;  %v2289_v57 = vld [vmem:[%s9321_s9 + $0x90] sm:$0xff] }
 0x6fb   : > { %1931 = vmatpush1.msra.mxu1 %v1590_v58  ;;  %1964 = vmatprep.mubr.f32.mxu1 %v7036_v11  ;;  %v2321_v58 = vld [vmem:[%s9321_s9 + $0x190] sm:$0xff] }
 0x6fc   : > { %2001 = vmatprep.subr.mxu0 %v1593_v59  ;;  %2072 = vmatprep.subr.mxu1 %v1595_v60  ;;  %v2273_v59 = vld [vmem:[%s9321_s9 + $0x10] sm:$0xff] }
 0x6fd   : > { %5819 = vmatmul.mubr.msk.f32.vlgmr.msra.gmra.mxu0 %vm551_vm0, %v1583_v56  ;;  %5820 = vmatmul.mubr.msk.f32.vlgmr.msra.gmra.mxu1 %vm551_vm0, %v1583_v56  ;;  %v2305_v60 = vld [vmem:[%s9321_s9 + $0x110] sm:$0xff] }
 0x6fe   : > { %2002 = vmatpush1.msra.mxu0 %v1592_v61  ;;  %2035 = vmatprep.mubr.f32.mxu0 %v7036_v11  ;;  %v2288_v61 = vld [vmem:[%s9321_s9 + $0x88] sm:$0xff] }
 0x6ff   : > { %2073 = vmatpush1.msra.mxu1 %v1594_v62  ;;  %2106 = vmatprep.mubr.f32.mxu1 %v7036_v11  ;;  %v2320_v62 = vld [vmem:[%s9321_s9 + $0x188] sm:$0xff] }
 0x700   : > { %2143 = vmatprep.subr.mxu0 %v1597_v63  ;;  %2214 = vmatprep.subr.mxu1 %v1599_v0  ;;  %v2272_v63 = vld [vmem:[%s9321_s9 + $0x8] sm:$0xff] }
 0x701   : > { %5821 = vmatmul.mubr.msk.f32.vlgmr.msra.gmra.mxu0 %vm551_vm0, %v1583_v56  ;;  %5822 = vmatmul.mubr.msk.f32.vlgmr.msra.gmra.mxu1 %vm551_vm0, %v1583_v56  ;;  %v2304_v0 = vld [vmem:[%s9321_s9 + $0x108] sm:$0xff] }
 0x702   : > { %2144 = vmatpush1.msra.mxu0 %v1596_v1  ;;  %2177 = vmatprep.mubr.f32.mxu0 %v7036_v11  ;;  %v2287_v1 = vld [vmem:[%s9321_s9 + $0x80] sm:$0xff] }
 0x703   : > { %2215 = vmatpush1.msra.mxu1 %v1598_v3  ;;  %2248 = vmatprep.mubr.f32.mxu1 %v7036_v11  ;;  %v2319_v3 = vld [vmem:[%s9321_s9 + $0x180] sm:$0xff] }
 0x704   : > { %6188 = vmatprep.subr.mxu0 %v2302_v4  ;;  %6223 = vmatprep.subr.mxu1 %v2334_v5  ;;  %v2271_v4 = vld [vmem:[%s9321_s9] sm:$0xff] }
 0x705   : > { %5823 = vmatmul.mubr.msk.f32.vlgmr.msra.gmra.mxu0 %vm551_vm0, %v1583_v56  ;;  %5824 = vmatmul.mubr.msk.f32.vlgmr.msra.gmra.mxu1 %vm551_vm0, %v1583_v56  ;;  %v2306_v56 = vld [vmem:[%s9321_s9 + $0x118] sm:$0xff]  ;;  %v2303_v5 = vld [vmem:[%s9321_s9 + $0x100] sm:$0xff] }
 0x706   : > { %6189 = vmatpush3.msra.mxu0 %v2286_v6  ;;  %6224 = vmatpush3.msra.mxu1 %v2318_v7  ;;  %v2366_v6 = vld [vmem:[%s9321_s9 + $0x2f8] sm:$0xff] }
 0x707   : > { %6190 = vmatprep.subr.mxu0 %v2301_v8  ;;  %6225 = vmatprep.subr.mxu1 %v2333_v9  ;;  %v2398_v7 = vld [vmem:[%s9321_s9 + $0x3f8] sm:$0xff]  ;;  %v1604_v8 = vlaneseq }
 0x708   : > { %6191 = vmatpush3.msra.mxu0 %v2285_v10  ;;  %6226 = vmatpush3.msra.mxu1 %v2317_v12 }
 0x709   : > { %6192 = vmatprep.subr.mxu0 %v2300_v13  ;;  %6227 = vmatprep.subr.mxu1 %v2332_v14  ;;  %v7579_v9 = vshrl.u32 %v1604_v8, 7  ;;  %v7590_v13 = vld [vmem:[%s9320_s8] sm:$0xff] }
 0x70a   : > { %6193 = vmatpush3.msra.mxu0 %v2284_v15  ;;  %6228 = vmatpush3.msra.mxu1 %v2316_v16  ;;  %v2391_v8 = vld [vmem:[%s9321_s9 + $0x3c0] sm:$0xff] }
 0x70b   : > { %6194 = vmatprep.subr.mxu0 %v2299_v17  ;;  %6229 = vmatprep.subr.mxu1 %v2331_v18  ;;  %v7582_v10 = vsub.s32 0, %v7579_v9  ;;  %v7585_v12 = vsub.s32 2, %v7579_v9  ;;  %v7593_v14 = vsub.s32 1, %v7579_v9  ;;  %v7596_v15 = vsub.s32 3, %v7579_v9 }
 0x70c   : > { %6195 = vmatpush3.msra.mxu0 %v2283_v19  ;;  %6230 = vmatpush3.msra.mxu1 %v2315_v20  ;;  %v7607_v20 = vsub.s32 5, %v7579_v9 }
 0x70d   : > { %6196 = vmatprep.subr.mxu0 %v2298_v21  ;;  %6231 = vmatprep.subr.mxu1 %v2330_v22  ;;  %v1607_v16 = vrot.slane %v7590_v13, %v7582_v10  ;;  %v1615_v17 = vrot.slane %v7590_v13, %v7585_v12  ;;  %v1611_v18 = vrot.slane %v7590_v13, %v7593_v14  ;;  %v7610_v21 = vsub.s32 7, %v7579_v9 }
 0x70e   : > { %6197 = vmatpush3.msra.mxu0 %v2282_v23  ;;  %6232 = vmatpush3.msra.mxu1 %v2314_v24  ;;  %v1619_v19 = vrot.slane %v7590_v13, %v7596_v15 }
 0x70f   : > { %6198 = vmatprep.subr.mxu0 %v2297_v25  ;;  %6233 = vmatprep.subr.mxu1 %v2329_v26 }
 0x710   : > { %6199 = vmatpush3.msra.mxu0 %v2281_v27  ;;  %6234 = vmatpush3.msra.mxu1 %v2313_v28 }
 0x711   : > { %6200 = vmatprep.subr.mxu0 %v2296_v29  ;;  %6235 = vmatprep.subr.mxu1 %v2328_v30  ;;  %v1627_v30 = vrot.slane %v7590_v13, %v7607_v20 }
 0x712   : > { %6201 = vmatpush3.msra.mxu0 %v2280_v32  ;;  %6236 = vmatpush3.msra.mxu1 %v2312_v33  ;;  %v1635_v32 = vrot.slane %v7590_v13, %v7610_v21 }
 0x713   : > { %6202 = vmatprep.subr.mxu0 %v2295_v34  ;;  %6237 = vmatprep.subr.mxu1 %v2327_v35 }
 0x714   : > { %6203 = vmatpush3.msra.mxu0 %v2279_v36  ;;  %6238 = vmatpush3.msra.mxu1 %v2311_v37 }
 0x715   : > { %6204 = vmatprep.subr.mxu0 %v2294_v38  ;;  %6239 = vmatprep.subr.mxu1 %v2326_v2 }
 0x716   : > { %6205 = vmatpush3.msra.mxu0 %v2278_v39  ;;  %6240 = vmatpush3.msra.mxu1 %v2310_v40  ;;  %v2350_v40 = vld [vmem:[%s9321_s9 + $0x278] sm:$0xff] }
 0x717   : > { %6206 = vmatprep.subr.mxu0 %v2293_v41  ;;  %6241 = vmatprep.subr.mxu1 %v2325_v42  ;;  %v2382_v41 = vld [vmem:[%s9321_s9 + $0x378] sm:$0xff] }
 0x718   : > { %6207 = vmatpush3.msra.mxu0 %v2277_v43  ;;  %6242 = vmatpush3.msra.mxu1 %v2309_v44  ;;  %v2365_v44 = vld [vmem:[%s9321_s9 + $0x2f0] sm:$0xff] }
 0x719   : > { %6208 = vmatprep.subr.mxu0 %v2292_v45  ;;  %6243 = vmatprep.subr.mxu1 %v2324_v46  ;;  %v2397_v45 = vld [vmem:[%s9321_s9 + $0x3f0] sm:$0xff] }
 0x71a   : > { %6209 = vmatpush3.msra.mxu0 %v2276_v47  ;;  %6244 = vmatpush3.msra.mxu1 %v2308_v48  ;;  %v2349_v46 = vld [vmem:[%s9321_s9 + $0x270] sm:$0xff] }
 0x71b   : > { %6210 = vmatprep.subr.mxu0 %v2291_v49  ;;  %6245 = vmatprep.subr.mxu1 %v2323_v50  ;;  %v2381_v47 = vld [vmem:[%s9321_s9 + $0x370] sm:$0xff]  ;;  %v2364_v50 = vld [vmem:[%s9321_s9 + $0x2e8] sm:$0xff] }
 0x71c   : > { %6211 = vmatpush3.msra.mxu0 %v2275_v51  ;;  %6246 = vmatpush3.msra.mxu1 %v2307_v52  ;;  %v2396_v51 = vld [vmem:[%s9321_s9 + $0x3e8] sm:$0xff] }
 0x71d   : > { %6212 = vmatprep.subr.mxu0 %v2290_v53  ;;  %6247 = vmatprep.subr.mxu1 %v2322_v54  ;;  %v2348_v52 = vld [vmem:[%s9321_s9 + $0x268] sm:$0xff]  ;;  %v2363_v54 = vld [vmem:[%s9321_s9 + $0x2e0] sm:$0xff] }
 0x71e   : > { %6213 = vmatpush3.msra.mxu0 %v2274_v55  ;;  %6248 = vmatpush3.msra.mxu1 %v2306_v56  ;;  %v2380_v53 = vld [vmem:[%s9321_s9 + $0x368] sm:$0xff]  ;;  %v2395_v55 = vld [vmem:[%s9321_s9 + $0x3e0] sm:$0xff] }
 0x71f   : > { %6214 = vmatprep.subr.mxu0 %v2289_v57  ;;  %6249 = vmatprep.subr.mxu1 %v2321_v58  ;;  %v2347_v56 = vld [vmem:[%s9321_s9 + $0x260] sm:$0xff]  ;;  %v2362_v58 = vld [vmem:[%s9321_s9 + $0x2d8] sm:$0xff] }
 0x720   : > { %6215 = vmatpush3.msra.mxu0 %v2273_v59  ;;  %6250 = vmatpush3.msra.mxu1 %v2305_v60  ;;  %v2379_v57 = vld [vmem:[%s9321_s9 + $0x360] sm:$0xff]  ;;  %v2394_v59 = vld [vmem:[%s9321_s9 + $0x3d8] sm:$0xff] }
 0x721   : > { %6216 = vmatprep.subr.mxu0 %v2288_v61  ;;  %6251 = vmatprep.subr.mxu1 %v2320_v62  ;;  %v2346_v60 = vld [vmem:[%s9321_s9 + $0x258] sm:$0xff]  ;;  %v2361_v62 = vld [vmem:[%s9321_s9 + $0x2d0] sm:$0xff] }
 0x722   : > { %6217 = vmatpush3.msra.mxu0 %v2272_v63  ;;  %6252 = vmatpush3.msra.mxu1 %v2304_v0  ;;  %v2378_v61 = vld [vmem:[%s9321_s9 + $0x358] sm:$0xff]  ;;  %v2393_v63 = vld [vmem:[%s9321_s9 + $0x3d0] sm:$0xff] }
 0x723   : > { %6218 = vmatprep.subr.mxu0 %v2287_v1  ;;  %6253 = vmatprep.subr.mxu1 %v2319_v3  ;;  %v2345_v0 = vld [vmem:[%s9321_s9 + $0x250] sm:$0xff]  ;;  %v2360_v3 = vld [vmem:[%s9321_s9 + $0x2c8] sm:$0xff] }
 0x724   : > { %6219 = vmatpush3.msra.mxu0 %v2271_v4  ;;  %6254 = vmatpush3.msra.mxu1 %v2303_v5  ;;  %v2377_v1 = vld [vmem:[%s9321_s9 + $0x350] sm:$0xff]  ;;  %v2392_v4 = vld [vmem:[%s9321_s9 + $0x3c8] sm:$0xff] }
 0x725   : > { %6258 = vmatprep.subr.mxu0 %v2366_v6  ;;  %6293 = vmatprep.subr.mxu1 %v2398_v7  ;;  %v2344_v5 = vld [vmem:[%s9321_s9 + $0x248] sm:$0xff]  ;;  %v2359_v7 = vld [vmem:[%s9321_s9 + $0x2c0] sm:$0xff] }
 0x726   : > { %v2376_v6 = vld [vmem:[%s9321_s9 + $0x348] sm:$0xff] }
 0x7b9   : > { %v1753_v22 = vpop.f32.mrf.mxu0  ;;  %v1824_v23 = vpop.f32.mrf.mxu1 }
 0x7ba   : > { %v1754_v24 = vadd.f32 %v1753_v22, %v1607_v16  ;;  %v1825_v25 = vadd.f32 %v1824_v23, %v1615_v17  ;;  %v2343_v16 = vld [vmem:[%s9321_s9 + $0x240] sm:$0xff]  ;;  %v2342_v22 = vld [vmem:[%s9321_s9 + $0x238] sm:$0xff] }
 0x7bb   : > { %v1755_v26 = vpop.f32.mrf.mxu0  ;;  %v1826_v27 = vpop.f32.mrf.mxu1  ;;  %v2375_v17 = vld [vmem:[%s9321_s9 + $0x340] sm:$0xff]  ;;  %v2374_v23 = vld [vmem:[%s9321_s9 + $0x338] sm:$0xff] }
 0x7bc   : > { %v1756_v28 = vadd.f32 %v1755_v26, %v1611_v18  ;;  %v1827_v29 = vadd.f32 %v1826_v27, %v1619_v19  ;;  %v2255_v37 = vmax.f32 %v1754_v24, 0.0  ;;  %v2257_v38 = vmax.f32 %v1825_v25, 0.0  ;;  %v2358_v18 = vld [vmem:[%s9321_s9 + $0x2b8] sm:$0xff]  ;;  %v2357_v24 = vld [vmem:[%s9321_s9 + $0x2b0] sm:$0xff] }
 0x7bd   : > { %v7616_v33 = vpop.f32.mrf.mxu0  ;;  %v7618_v34 = vpop.f32.mrf.mxu1  ;;  %v2390_v19 = vld [vmem:[%s9321_s9 + $0x3b8] sm:$0xff]  ;;  %v2389_v25 = vld [vmem:[%s9321_s9 + $0x3b0] sm:$0xff] }
 0x7be   : > { %v2256_v35 = vmax.f32 %v1756_v28, 0.0  ;;  %v2258_v36 = vmax.f32 %v1827_v29, 0.0  ;;  %v2341_v26 = vld [vmem:[%s9321_s9 + $0x230] sm:$0xff]  ;;  %v2356_v28 = vld [vmem:[%s9321_s9 + $0x2a8] sm:$0xff] }
 0x7bf   : > { %v1897_v2 = vpop.f32.mrf.mxu0  ;;  %v1968_v39 = vpop.f32.mrf.mxu1  ;;  %v2373_v27 = vld [vmem:[%s9321_s9 + $0x330] sm:$0xff]  ;;  %v2388_v29 = vld [vmem:[%s9321_s9 + $0x3a8] sm:$0xff] }
 0x7c0   : > { %v1898_v42 = vadd.f32 %v1897_v2, %v1627_v30  ;;  %v1969_v43 = vadd.f32 %v1968_v39, %v1635_v32  ;;  %2591 = vmatprep.mubr.f32.mxu0 %v2256_v35  ;;  %2661 = vmatprep.mubr.f32.mxu1 %v2258_v36  ;;  %v7741_v30 = vsub.s32 4, %v7579_v9  ;;  %v7744_v32 = vsub.s32 6, %v7579_v9  ;;  %v2340_v35 = vld [vmem:[%s9321_s9 + $0x228] sm:$0xff]  ;;  %v2387_v9 = vld [vmem:[%s9321_s9 + $0x3a0] sm:$0xff] }
 0x7c1   : > { %2592 = vmatmul.mubr.f32.vlgmr.msra.gmra.mxu0 %v2255_v37  ;;  %2662 = vmatmul.mubr.f32.vlgmr.msra.gmra.mxu1 %v2257_v38  ;;  %v2372_v36 = vld [vmem:[%s9321_s9 + $0x328] sm:$0xff]  ;;  %v2355_v37 = vld [vmem:[%s9321_s9 + $0x2a0] sm:$0xff]  ;;  %v7764_v39 = vpop.f32.mrf.mxu0 }
 0x7c2   : > { %v2260_v48 = vmax.f32 %v1898_v42, 0.0  ;;  %v2262_v49 = vmax.f32 %v1969_v43, 0.0  ;;  %6259 = vmatpush3.msra.mxu0 %v2350_v40  ;;  %6294 = vmatpush3.msra.mxu1 %v2382_v41  ;;  %v2339_v38 = vld [vmem:[%s9321_s9 + $0x220] sm:$0xff]  ;;  %v2354_v40 = vld [vmem:[%s9321_s9 + $0x298] sm:$0xff]  ;;  %v1623_v42 = vrot.slane %v7590_v13, %v7741_v30  ;;  %v1631_v43 = vrot.slane %v7590_v13, %v7744_v32  ;;  %v2353_v13 = vld [vmem:[%s9321_s9 + $0x290] sm:$0xff] }
 0x7c3   : > { %6260 = vmatprep.subr.mxu0 %v2365_v44  ;;  %6295 = vmatprep.subr.mxu1 %v2397_v45  ;;  %v2371_v2 = vld [vmem:[%s9321_s9 + $0x320] sm:$0xff]  ;;  %v2386_v41 = vld [vmem:[%s9321_s9 + $0x398] sm:$0xff]  ;;  %v7776_v44 = vpop.f32.mrf.mxu1 }
 0x7c4   : > { %6261 = vmatpush3.msra.mxu0 %v2349_v46  ;;  %6296 = vmatpush3.msra.mxu1 %v2381_v47  ;;  %v2338_v45 = vld [vmem:[%s9321_s9 + $0x218] sm:$0xff]  ;;  %v7787_v47 = vld [vmem:[%s9320_s8 + $0x8] sm:$0xff] }
 0x7c5   : > { %6262 = vmatprep.subr.mxu0 %v2364_v50  ;;  %2731 = vmatprep.mubr.f32.mxu0 %v2260_v48  ;;  %v2370_v46 = vld [vmem:[%s9321_s9 + $0x318] sm:$0xff]  ;;  %v2385_v48 = vld [vmem:[%s9321_s9 + $0x390] sm:$0xff] }
 0x7c6   : > { %6297 = vmatprep.subr.mxu1 %v2396_v51  ;;  %2801 = vmatprep.mubr.f32.mxu1 %v2262_v49  ;;  %v1643_v49 = vrot.slane %v7787_v47, %v7593_v14  ;;  %v2337_v50 = vld [vmem:[%s9321_s9 + $0x210] sm:$0xff] }
 0x7c7   : > { %6263 = vmatpush3.msra.mxu0 %v2348_v52  ;;  %6298 = vmatpush3.msra.mxu1 %v2380_v53  ;;  %v2369_v51 = vld [vmem:[%s9321_s9 + $0x310] sm:$0xff]  ;;  %v2039_v52 = vpop.f32.mrf.mxu0  ;;  %v1651_v53 = vrot.slane %v7787_v47, %v7596_v15 }
 0x7c8   : > { %6264 = vmatprep.subr.mxu0 %v2363_v54  ;;  %6299 = vmatprep.subr.mxu1 %v2395_v55  ;;  %v2352_v54 = vld [vmem:[%s9321_s9 + $0x288] sm:$0xff] }
 0x7c9   : > { %6265 = vmatpush3.msra.mxu0 %v2347_v56  ;;  %6300 = vmatpush3.msra.mxu1 %v2379_v57  ;;  %v2384_v55 = vld [vmem:[%s9321_s9 + $0x388] sm:$0xff]  ;;  %v1896_v56 = vadd.f32 %v7616_v33, %v1623_v42  ;;  %v1967_v57 = vadd.f32 %v7618_v34, %v1631_v43  ;;  %v2383_v33 = vld [vmem:[%s9321_s9 + $0x380] sm:$0xff]  ;;  %v2040_v34 = vadd.f32 %v2039_v52, %v1643_v49  ;;  %v2441_v42 = vld [vmem:[%s9321_s9 + $0x550] sm:$0xff] }
 0x7ca   : > { %6266 = vmatprep.subr.mxu0 %v2362_v58  ;;  %6301 = vmatprep.subr.mxu1 %v2394_v59  ;;  %v2110_v58 = vpop.f32.mrf.mxu1  ;;  %v2336_v59 = vld [vmem:[%s9321_s9 + $0x208] sm:$0xff]  ;;  %v2455_v49 = vld [vmem:[%s9321_s9 + $0x5c0] sm:$0xff]  ;;  %v2422_v52 = vld [vmem:[%s9321_s9 + $0x4b8] sm:$0xff] }
 0x7cb   : > { %6267 = vmatpush3.msra.mxu0 %v2346_v60  ;;  %6302 = vmatpush3.msra.mxu1 %v2378_v61  ;;  %v2368_v60 = vld [vmem:[%s9321_s9 + $0x308] sm:$0xff]  ;;  %v2351_v61 = vld [vmem:[%s9321_s9 + $0x280] sm:$0xff] }
 0x7cc   : > { %6268 = vmatprep.subr.mxu0 %v2361_v62  ;;  %6303 = vmatprep.subr.mxu1 %v2393_v63  ;;  %v2335_v62 = vld [vmem:[%s9321_s9 + $0x200] sm:$0xff]  ;;  %v2424_v43 = vld [vmem:[%s9321_s9 + $0x4c8] sm:$0xff] }
 0x7cd   : > { %6269 = vmatpush3.msra.mxu0 %v2345_v0  ;;  %6304 = vmatpush3.msra.mxu1 %v2377_v1  ;;  %v2367_v63 = vld [vmem:[%s9321_s9 + $0x300] sm:$0xff]  ;;  %v2111_v0 = vadd.f32 %v2110_v58, %v1651_v53  ;;  %v2259_v1 = vmax.f32 %v1896_v56, 0.0  ;;  %v2454_v53 = vld [vmem:[%s9321_s9 + $0x5b8] sm:$0xff]  ;;  %v2421_v56 = vld [vmem:[%s9321_s9 + $0x4b0] sm:$0xff] }
 0x7ce   : > { %6270 = vmatprep.subr.mxu0 %v2360_v3  ;;  %6305 = vmatprep.subr.mxu1 %v2392_v4  ;;  %v2261_v3 = vmax.f32 %v1967_v57, 0.0  ;;  %v2430_v4 = vld [vmem:[%s9321_s9 + $0x4f8] sm:$0xff]  ;;  %v2453_v57 = vld [vmem:[%s9321_s9 + $0x5b0] sm:$0xff] }
 0x7cf   : > { %6271 = vmatpush3.msra.mxu0 %v2344_v5  ;;  %6306 = vmatpush3.msra.mxu1 %v2376_v6  ;;  %v2462_v5 = vld [vmem:[%s9321_s9 + $0x5f8] sm:$0xff]  ;;  %v2405_v58 = vld [vmem:[%s9321_s9 + $0x430] sm:$0xff] }
 0x7d0   : > { %6272 = vmatprep.subr.mxu0 %v2359_v7  ;;  %6307 = vmatprep.subr.mxu1 %v2391_v8  ;;  %v2414_v6 = vld [vmem:[%s9321_s9 + $0x478] sm:$0xff]  ;;  %v2264_v7 = vmax.f32 %v2040_v34, 0.0  ;;  %v2436_v34 = vld [vmem:[%s9321_s9 + $0x528] sm:$0xff] }
 0x7d1   : > { %6273 = vmatpush3.msra.mxu0 %v2343_v16  ;;  %6308 = vmatpush3.msra.mxu1 %v2375_v17  ;;  %v2446_v8 = vld [vmem:[%s9321_s9 + $0x578] sm:$0xff]  ;;  %v2266_v16 = vmax.f32 %v2111_v0, 0.0  ;;  %v2429_v17 = vld [vmem:[%s9321_s9 + $0x4f0] sm:$0xff]  ;;  %v2403_v0 = vld [vmem:[%s9321_s9 + $0x420] sm:$0xff] }
 0x7d2   : > { %6274 = vmatprep.subr.mxu0 %v2358_v18  ;;  %6309 = vmatprep.subr.mxu1 %v2390_v19  ;;  %v2461_v18 = vld [vmem:[%s9321_s9 + $0x5f0] sm:$0xff] }
 0x7d3   : > { %6275 = vmatpush3.msra.mxu0 %v2342_v22  ;;  %6310 = vmatpush3.msra.mxu1 %v2374_v23  ;;  %v2413_v19 = vld [vmem:[%s9321_s9 + $0x470] sm:$0xff]  ;;  %v2428_v23 = vld [vmem:[%s9321_s9 + $0x4e8] sm:$0xff] }
 0x7d4   : > { %6276 = vmatprep.subr.mxu0 %v2357_v24  ;;  %6311 = vmatprep.subr.mxu1 %v2389_v25  ;;  %v2445_v22 = vld [vmem:[%s9321_s9 + $0x570] sm:$0xff]  ;;  %v2460_v24 = vld [vmem:[%s9321_s9 + $0x5e8] sm:$0xff] }
 0x7d5   : > { %6277 = vmatpush3.msra.mxu0 %v2341_v26  ;;  %6312 = vmatpush3.msra.mxu1 %v2373_v27  ;;  %v2412_v25 = vld [vmem:[%s9321_s9 + $0x468] sm:$0xff]  ;;  %v2427_v27 = vld [vmem:[%s9321_s9 + $0x4e0] sm:$0xff] }
 0x7d6   : > { %6278 = vmatprep.subr.mxu0 %v2356_v28  ;;  %6313 = vmatprep.subr.mxu1 %v2388_v29  ;;  %v2444_v26 = vld [vmem:[%s9321_s9 + $0x568] sm:$0xff]  ;;  %v2459_v28 = vld [vmem:[%s9321_s9 + $0x5e0] sm:$0xff] }
 0x7d7   : > { %6279 = vmatpush3.msra.mxu0 %v2340_v35  ;;  %6314 = vmatpush3.msra.mxu1 %v2372_v36  ;;  %v2411_v29 = vld [vmem:[%s9321_s9 + $0x460] sm:$0xff]  ;;  %v2426_v36 = vld [vmem:[%s9321_s9 + $0x4d8] sm:$0xff] }
 0x7d8   : > { %6280 = vmatprep.subr.mxu0 %v2355_v37  ;;  %6315 = vmatprep.subr.mxu1 %v2387_v9  ;;  %v2443_v35 = vld [vmem:[%s9321_s9 + $0x560] sm:$0xff]  ;;  %v2458_v37 = vld [vmem:[%s9321_s9 + $0x5d8] sm:$0xff] }
 0x7d9   : > { %6281 = vmatpush3.msra.mxu0 %v2339_v38  ;;  %6316 = vmatpush3.msra.mxu1 %v2371_v2  ;;  %v2410_v9 = vld [vmem:[%s9321_s9 + $0x458] sm:$0xff]  ;;  %v2425_v2 = vld [vmem:[%s9321_s9 + $0x4d0] sm:$0xff] }
 0x7da   : > { %6282 = vmatprep.subr.mxu0 %v2354_v40  ;;  %6317 = vmatprep.subr.mxu1 %v2386_v41  ;;  %v2442_v38 = vld [vmem:[%s9321_s9 + $0x558] sm:$0xff]  ;;  %v2457_v40 = vld [vmem:[%s9321_s9 + $0x5d0] sm:$0xff] }
 0x7db   : > { %6283 = vmatpush3.msra.mxu0 %v2338_v45  ;;  %6318 = vmatpush3.msra.mxu1 %v2370_v46  ;;  %v2409_v41 = vld [vmem:[%s9321_s9 + $0x450] sm:$0xff]  ;;  %v2456_v45 = vld [vmem:[%s9321_s9 + $0x5c8] sm:$0xff] }
 0x7dc   : > { %6284 = vmatprep.subr.mxu0 %v2353_v13  ;;  %6319 = vmatprep.subr.mxu1 %v2385_v48  ;;  %v2408_v46 = vld [vmem:[%s9321_s9 + $0x448] sm:$0xff]  ;;  %v2423_v48 = vld [vmem:[%s9321_s9 + $0x4c0] sm:$0xff] }
 0x7dd   : > { %6285 = vmatpush3.msra.mxu0 %v2337_v50  ;;  %6320 = vmatpush3.msra.mxu1 %v2369_v51  ;;  %v2440_v13 = vld [vmem:[%s9321_s9 + $0x548] sm:$0xff]  ;;  %v2407_v50 = vld [vmem:[%s9321_s9 + $0x440] sm:$0xff] }
 0x7de   : > { %6286 = vmatprep.subr.mxu0 %v2352_v54  ;;  %6321 = vmatprep.subr.mxu1 %v2384_v55  ;;  %v2439_v51 = vld [vmem:[%s9321_s9 + $0x540] sm:$0xff]  ;;  %v2406_v54 = vld [vmem:[%s9321_s9 + $0x438] sm:$0xff] }
 0x7df   : > { %6287 = vmatpush3.msra.mxu0 %v2336_v59  ;;  %6322 = vmatpush3.msra.mxu1 %v2368_v60  ;;  %v2438_v55 = vld [vmem:[%s9321_s9 + $0x538] sm:$0xff]  ;;  %v2437_v59 = vld [vmem:[%s9321_s9 + $0x530] sm:$0xff]  ;;  %v2420_v60 = vld [vmem:[%s9321_s9 + $0x4a8] sm:$0xff] }
 0x7e0   : > { %6288 = vmatprep.subr.mxu0 %v2351_v61  ;;  %6323 = vmatprep.subr.mxu1 %v2383_v33  ;;  %v2452_v61 = vld [vmem:[%s9321_s9 + $0x5a8] sm:$0xff] }
 0x7e1   : > { %6289 = vmatpush3.msra.mxu0 %v2335_v62  ;;  %6324 = vmatpush3.msra.mxu1 %v2367_v63  ;;  %v2404_v33 = vld [vmem:[%s9321_s9 + $0x428] sm:$0xff]  ;;  %v2419_v62 = vld [vmem:[%s9321_s9 + $0x4a0] sm:$0xff] }
 0x7e2   : > { %2732 = vmatmul.mubr.f32.vlgmr.msra.gmra.mxu0 %v2259_v1  ;;  %2802 = vmatmul.mubr.f32.vlgmr.msra.gmra.mxu1 %v2261_v3  ;;  %v2451_v63 = vld [vmem:[%s9321_s9 + $0x5a0] sm:$0xff]  ;;  %v7975_v3 = vpop.f32.mrf.mxu0 }
 0x7e3   : > { %6328 = vmatprep.subr.mxu0 %v2430_v4  ;;  %6363 = vmatprep.subr.mxu1 %v2462_v5  ;;  %v2435_v1 = vld [vmem:[%s9321_s9 + $0x520] sm:$0xff]  ;;  %v2418_v4 = vld [vmem:[%s9321_s9 + $0x498] sm:$0xff] }
 0x7e4   : > { %6329 = vmatpush3.msra.mxu0 %v2414_v6  ;;  %2871 = vmatprep.mubr.f32.mxu0 %v2264_v7  ;;  %v2450_v5 = vld [vmem:[%s9321_s9 + $0x598] sm:$0xff]  ;;  %v1639_v6 = vrot.slane %v7787_v47, %v7582_v10  ;;  %v1647_v7 = vrot.slane %v7787_v47, %v7585_v12 }
 0x7e5   : > { %6364 = vmatpush3.msra.mxu1 %v2446_v8  ;;  %2941 = vmatprep.mubr.f32.mxu1 %v2266_v16  ;;  %v7987_v8 = vpop.f32.mrf.mxu1  ;;  %v2402_v16 = vld [vmem:[%s9321_s9 + $0x418] sm:$0xff] }
 0x7e6   : > { %6330 = vmatprep.subr.mxu0 %v2429_v17  ;;  %6365 = vmatprep.subr.mxu1 %v2461_v18  ;;  %v2434_v17 = vld [vmem:[%s9321_s9 + $0x518] sm:$0xff]  ;;  %v2417_v18 = vld [vmem:[%s9321_s9 + $0x490] sm:$0xff] }
 0x7e7   : > { %6331 = vmatpush3.msra.mxu0 %v2413_v19  ;;  %6366 = vmatpush3.msra.mxu1 %v2445_v22  ;;  %v2449_v19 = vld [vmem:[%s9321_s9 + $0x590] sm:$0xff]  ;;  %v1659_v22 = vrot.slane %v7787_v47, %v7607_v20 }
 0x7e8   : > { %6332 = vmatprep.subr.mxu0 %v2428_v23  ;;  %6367 = vmatprep.subr.mxu1 %v2460_v24  ;;  %v2401_v23 = vld [vmem:[%s9321_s9 + $0x410] sm:$0xff] }
 0x7e9   : > { %6333 = vmatpush3.msra.mxu0 %v2412_v25  ;;  %6368 = vmatpush3.msra.mxu1 %v2444_v26  ;;  %v2433_v24 = vld [vmem:[%s9321_s9 + $0x510] sm:$0xff]  ;;  %v2181_v25 = vpop.f32.mrf.mxu0  ;;  %v1667_v26 = vrot.slane %v7787_v47, %v7610_v21 }
 0x7ea   : > { %6334 = vmatprep.subr.mxu0 %v2427_v27  ;;  %6369 = vmatprep.subr.mxu1 %v2459_v28  ;;  %v2416_v27 = vld [vmem:[%s9321_s9 + $0x488] sm:$0xff] }
 0x7eb   : > { %6335 = vmatpush3.msra.mxu0 %v2411_v29  ;;  %6370 = vmatpush3.msra.mxu1 %v2443_v35  ;;  %v2448_v28 = vld [vmem:[%s9321_s9 + $0x588] sm:$0xff]  ;;  %v2038_v29 = vadd.f32 %v7764_v39, %v1639_v6  ;;  %v2109_v35 = vadd.f32 %v7776_v44, %v1647_v7  ;;  %v2447_v39 = vld [vmem:[%s9321_s9 + $0x580] sm:$0xff]  ;;  %v2182_v44 = vadd.f32 %v2181_v25, %v1659_v22  ;;  %v2505_v6 = vld [vmem:[%s9321_s9 + $0x750] sm:$0xff] }
 0x7ec   : > { %6336 = vmatprep.subr.mxu0 %v2426_v36  ;;  %6371 = vmatprep.subr.mxu1 %v2458_v37  ;;  %v2252_v36 = vpop.f32.mrf.mxu1  ;;  %v2400_v37 = vld [vmem:[%s9321_s9 + $0x408] sm:$0xff]  ;;  %v2519_v22 = vld [vmem:[%s9321_s9 + $0x7c0] sm:$0xff]  ;;  %v2486_v25 = vld [vmem:[%s9321_s9 + $0x6b8] sm:$0xff] }
 0x7ed   : > { %6337 = vmatpush3.msra.mxu0 %v2410_v9  ;;  %6372 = vmatpush3.msra.mxu1 %v2442_v38  ;;  %v2432_v9 = vld [vmem:[%s9321_s9 + $0x508] sm:$0xff]  ;;  %v2415_v38 = vld [vmem:[%s9321_s9 + $0x480] sm:$0xff] }
 0x7ee   : > { %6338 = vmatprep.subr.mxu0 %v2425_v2  ;;  %6373 = vmatprep.subr.mxu1 %v2457_v40  ;;  %v2399_v2 = vld [vmem:[%s9321_s9 + $0x400] sm:$0xff]  ;;  %v2488_v7 = vld [vmem:[%s9321_s9 + $0x6c8] sm:$0xff] }
 0x7ef   : > { %6339 = vmatpush3.msra.mxu0 %v2409_v41  ;;  %6374 = vmatpush3.msra.mxu1 %v2441_v42  ;;  %v2431_v40 = vld [vmem:[%s9321_s9 + $0x500] sm:$0xff]  ;;  %v2253_v41 = vadd.f32 %v2252_v36, %v1667_v26  ;;  %v2263_v42 = vmax.f32 %v2038_v29, 0.0  ;;  %v2518_v26 = vld [vmem:[%s9321_s9 + $0x7b8] sm:$0xff]  ;;  %v2485_v29 = vld [vmem:[%s9321_s9 + $0x6b0] sm:$0xff] }
 0x7f0   : > { %6340 = vmatprep.subr.mxu0 %v2424_v43  ;;  %6375 = vmatprep.subr.mxu1 %v2456_v45  ;;  %v2265_v43 = vmax.f32 %v2109_v35, 0.0  ;;  %v2494_v45 = vld [vmem:[%s9321_s9 + $0x6f8] sm:$0xff]  ;;  %v2517_v35 = vld [vmem:[%s9321_s9 + $0x7b0] sm:$0xff] }
 0x7f1   : > { %6341 = vmatpush3.msra.mxu0 %v2408_v46  ;;  %6376 = vmatpush3.msra.mxu1 %v2440_v13  ;;  %v2526_v46 = vld [vmem:[%s9321_s9 + $0x7f8] sm:$0xff]  ;;  %v2469_v36 = vld [vmem:[%s9321_s9 + $0x630] sm:$0xff] }
 0x7f2   : > { %6342 = vmatprep.subr.mxu0 %v2423_v48  ;;  %6377 = vmatprep.subr.mxu1 %v2455_v49  ;;  %v2478_v13 = vld [vmem:[%s9321_s9 + $0x678] sm:$0xff]  ;;  %v2268_v48 = vmax.f32 %v2182_v44, 0.0  ;;  %v2500_v44 = vld [vmem:[%s9321_s9 + $0x728] sm:$0xff] }
 0x7f3   : > { %6343 = vmatpush3.msra.mxu0 %v2407_v50  ;;  %6378 = vmatpush3.msra.mxu1 %v2439_v51  ;;  %v2510_v49 = vld [vmem:[%s9321_s9 + $0x778] sm:$0xff]  ;;  %v2270_v50 = vmax.f32 %v2253_v41, 0.0  ;;  %v2493_v51 = vld [vmem:[%s9321_s9 + $0x6f0] sm:$0xff]  ;;  %v2467_v41 = vld [vmem:[%s9321_s9 + $0x620] sm:$0xff] }
 0x7f4   : > { %6344 = vmatprep.subr.mxu0 %v2422_v52  ;;  %6379 = vmatprep.subr.mxu1 %v2454_v53  ;;  %v2525_v52 = vld [vmem:[%s9321_s9 + $0x7f0] sm:$0xff] }
 0x7f5   : > { %6345 = vmatpush3.msra.mxu0 %v2406_v54  ;;  %6380 = vmatpush3.msra.mxu1 %v2438_v55  ;;  %v2477_v53 = vld [vmem:[%s9321_s9 + $0x670] sm:$0xff]  ;;  %v2492_v55 = vld [vmem:[%s9321_s9 + $0x6e8] sm:$0xff] }
 0x7f6   : > { %6346 = vmatprep.subr.mxu0 %v2421_v56  ;;  %6381 = vmatprep.subr.mxu1 %v2453_v57  ;;  %v2509_v54 = vld [vmem:[%s9321_s9 + $0x770] sm:$0xff]  ;;  %v2524_v56 = vld [vmem:[%s9321_s9 + $0x7e8] sm:$0xff] }
 0x7f7   : > { %6347 = vmatpush3.msra.mxu0 %v2405_v58  ;;  %6382 = vmatpush3.msra.mxu1 %v2437_v59  ;;  %v2476_v57 = vld [vmem:[%s9321_s9 + $0x668] sm:$0xff]  ;;  %v2491_v59 = vld [vmem:[%s9321_s9 + $0x6e0] sm:$0xff] }
 0x7f8   : > { %6348 = vmatprep.subr.mxu0 %v2420_v60  ;;  %6383 = vmatprep.subr.mxu1 %v2452_v61  ;;  %v2508_v58 = vld [vmem:[%s9321_s9 + $0x768] sm:$0xff]  ;;  %v2523_v60 = vld [vmem:[%s9321_s9 + $0x7e0] sm:$0xff] }
 0x7f9   : > { %6349 = vmatpush3.msra.mxu0 %v2404_v33  ;;  %6384 = vmatpush3.msra.mxu1 %v2436_v34  ;;  %v2475_v61 = vld [vmem:[%s9321_s9 + $0x660] sm:$0xff]  ;;  %v2490_v34 = vld [vmem:[%s9321_s9 + $0x6d8] sm:$0xff] }
 0x7fa   : > { %6350 = vmatprep.subr.mxu0 %v2419_v62  ;;  %6385 = vmatprep.subr.mxu1 %v2451_v63  ;;  %v2507_v33 = vld [vmem:[%s9321_s9 + $0x760] sm:$0xff]  ;;  %v2522_v62 = vld [vmem:[%s9321_s9 + $0x7d8] sm:$0xff] }
 0x7fb   : > { %6351 = vmatpush3.msra.mxu0 %v2403_v0  ;;  %6386 = vmatpush3.msra.mxu1 %v2435_v1  ;;  %v2474_v63 = vld [vmem:[%s9321_s9 + $0x658] sm:$0xff]  ;;  %v2489_v1 = vld [vmem:[%s9321_s9 + $0x6d0] sm:$0xff] }
 0x7fc   : > { %6352 = vmatprep.subr.mxu0 %v2418_v4  ;;  %6387 = vmatprep.subr.mxu1 %v2450_v5  ;;  %v2506_v0 = vld [vmem:[%s9321_s9 + $0x758] sm:$0xff]  ;;  %v2521_v4 = vld [vmem:[%s9321_s9 + $0x7d0] sm:$0xff] }
 0x7fd   : > { %6353 = vmatpush3.msra.mxu0 %v2402_v16  ;;  %6388 = vmatpush3.msra.mxu1 %v2434_v17  ;;  %v2473_v5 = vld [vmem:[%s9321_s9 + $0x650] sm:$0xff]  ;;  %v2520_v16 = vld [vmem:[%s9321_s9 + $0x7c8] sm:$0xff] }
 0x7fe   : > { %6354 = vmatprep.subr.mxu0 %v2417_v18  ;;  %6389 = vmatprep.subr.mxu1 %v2449_v19  ;;  %v2472_v17 = vld [vmem:[%s9321_s9 + $0x648] sm:$0xff]  ;;  %v2487_v19 = vld [vmem:[%s9321_s9 + $0x6c0] sm:$0xff] }
 0x7ff   : > { %6355 = vmatpush3.msra.mxu0 %v2401_v23  ;;  %6390 = vmatpush3.msra.mxu1 %v2433_v24  ;;  %v2504_v18 = vld [vmem:[%s9321_s9 + $0x748] sm:$0xff]  ;;  %v2471_v23 = vld [vmem:[%s9321_s9 + $0x640] sm:$0xff] }
 0x800   : > { %6356 = vmatprep.subr.mxu0 %v2416_v27  ;;  %6391 = vmatprep.subr.mxu1 %v2448_v28  ;;  %v2503_v24 = vld [vmem:[%s9321_s9 + $0x740] sm:$0xff]  ;;  %v2470_v27 = vld [vmem:[%s9321_s9 + $0x638] sm:$0xff] }
 0x801   : > { %6357 = vmatpush3.msra.mxu0 %v2400_v37  ;;  %6392 = vmatpush3.msra.mxu1 %v2432_v9  ;;  %v2502_v28 = vld [vmem:[%s9321_s9 + $0x738] sm:$0xff]  ;;  %v2501_v37 = vld [vmem:[%s9321_s9 + $0x730] sm:$0xff]  ;;  %v2484_v9 = vld [vmem:[%s9321_s9 + $0x6a8] sm:$0xff] }
 0x802   : > { %6358 = vmatprep.subr.mxu0 %v2415_v38  ;;  %6393 = vmatprep.subr.mxu1 %v2447_v39  ;;  %v2516_v38 = vld [vmem:[%s9321_s9 + $0x7a8] sm:$0xff] }
 0x803   : > { %6359 = vmatpush3.msra.mxu0 %v2399_v2  ;;  %6394 = vmatpush3.msra.mxu1 %v2431_v40  ;;  %v2468_v39 = vld [vmem:[%s9321_s9 + $0x628] sm:$0xff]  ;;  %v2483_v2 = vld [vmem:[%s9321_s9 + $0x6a0] sm:$0xff] }
 0x804   : > { %2872 = vmatmul.mubr.f32.vlgmr.msra.gmra.mxu0 %v2263_v42  ;;  %2942 = vmatmul.mubr.f32.vlgmr.msra.gmra.mxu1 %v2265_v43  ;;  %v2515_v40 = vld [vmem:[%s9321_s9 + $0x7a0] sm:$0xff]  ;;  %v2482_v43 = vld [vmem:[%s9321_s9 + $0x698] sm:$0xff] }
 0x805   : > { %6398 = vmatprep.subr.mxu0 %v2494_v45  ;;  %6433 = vmatprep.subr.mxu1 %v2526_v46  ;;  %v2499_v42 = vld [vmem:[%s9321_s9 + $0x720] sm:$0xff]  ;;  %v2514_v45 = vld [vmem:[%s9321_s9 + $0x798] sm:$0xff]  ;;  %v1655_v46 = vrot.slane %v7787_v47, %v7741_v30 }
 0x806   : > { %6399 = vmatpush3.msra.mxu0 %v2478_v13  ;;  %3011 = vmatprep.mubr.f32.mxu0 %v2268_v48  ;;  %v1663_v13 = vrot.slane %v7787_v47, %v7744_v32  ;;  %v2466_v48 = vld [vmem:[%s9321_s9 + $0x618] sm:$0xff]  ;;  %v2513_v47 = vld [vmem:[%s9321_s9 + $0x790] sm:$0xff] }
 0x807   : > { %6434 = vmatpush3.msra.mxu1 %v2510_v49  ;;  %3081 = vmatprep.mubr.f32.mxu1 %v2270_v50  ;;  %v2498_v49 = vld [vmem:[%s9321_s9 + $0x718] sm:$0xff]  ;;  %v2481_v50 = vld [vmem:[%s9321_s9 + $0x690] sm:$0xff] }
 0x808   : > { %6400 = vmatprep.subr.mxu0 %v2493_v51  ;;  %6435 = vmatprep.subr.mxu1 %v2525_v52  ;;  %v2465_v51 = vld [vmem:[%s9321_s9 + $0x610] sm:$0xff] }
 0x809   : > { %6401 = vmatpush3.msra.mxu0 %v2477_v53  ;;  %6436 = vmatpush3.msra.mxu1 %v2509_v54  ;;  %v2497_v52 = vld [vmem:[%s9321_s9 + $0x710] sm:$0xff]  ;;  %v2480_v53 = vld [vmem:[%s9321_s9 + $0x688] sm:$0xff] }
 0x80a   : > { %6402 = vmatprep.subr.mxu0 %v2492_v55  ;;  %6437 = vmatprep.subr.mxu1 %v2524_v56  ;;  %v2512_v54 = vld [vmem:[%s9321_s9 + $0x788] sm:$0xff]  ;;  %v2180_v55 = vadd.f32 %v7975_v3, %v1655_v46  ;;  %v2251_v56 = vadd.f32 %v7987_v8, %v1663_v13  ;;  %v2511_v3 = vld [vmem:[%s9321_s9 + $0x780] sm:$0xff] }
 0x80b   : > { %6403 = vmatpush3.msra.mxu0 %v2476_v57  ;;  %6438 = vmatpush3.msra.mxu1 %v2508_v58  ;;  %v2464_v57 = vld [vmem:[%s9321_s9 + $0x608] sm:$0xff]  ;;  %v2463_v8 = vld [vmem:[%s9321_s9 + $0x600] sm:$0xff] }
 0x80c   : > { %6404 = vmatprep.subr.mxu0 %v2491_v59  ;;  %6439 = vmatprep.subr.mxu1 %v2523_v60  ;;  %v2496_v58 = vld [vmem:[%s9321_s9 + $0x708] sm:$0xff]  ;;  %v2479_v59 = vld [vmem:[%s9321_s9 + $0x680] sm:$0xff] }
 0x80d   : > { %6405 = vmatpush3.msra.mxu0 %v2475_v61  ;;  %6440 = vmatpush3.msra.mxu1 %v2507_v33  ;;  %v2495_v60 = vld [vmem:[%s9321_s9 + $0x700] sm:$0xff]  ;;  %v2267_v61 = vmax.f32 %v2180_v55, 0.0  ;;  %v2269_v33 = vmax.f32 %v2251_v56, 0.0 }
 0x80e   : > { %6406 = vmatprep.subr.mxu0 %v2490_v34  ;;  %6441 = vmatprep.subr.mxu1 %v2522_v62 }
 0x80f   : > { %6407 = vmatpush3.msra.mxu0 %v2474_v63  ;;  %6442 = vmatpush3.msra.mxu1 %v2506_v0 }
 0x810   : > { %6408 = vmatprep.subr.mxu0 %v2489_v1  ;;  %6443 = vmatprep.subr.mxu1 %v2521_v4 }
 0x811   : > { %6409 = vmatpush3.msra.mxu0 %v2473_v5  ;;  %6444 = vmatpush3.msra.mxu1 %v2505_v6 }
 0x812   : > { %6410 = vmatprep.subr.mxu0 %v2488_v7  ;;  %6445 = vmatprep.subr.mxu1 %v2520_v16 }
 0x813   : > { %6411 = vmatpush3.msra.mxu0 %v2472_v17  ;;  %6446 = vmatpush3.msra.mxu1 %v2504_v18 }
 0x814   : > { %6412 = vmatprep.subr.mxu0 %v2487_v19  ;;  %6447 = vmatprep.subr.mxu1 %v2519_v22 }
 0x815   : > { %6413 = vmatpush3.msra.mxu0 %v2471_v23  ;;  %6448 = vmatpush3.msra.mxu1 %v2503_v24 }
 0x816   : > { %6414 = vmatprep.subr.mxu0 %v2486_v25  ;;  %6449 = vmatprep.subr.mxu1 %v2518_v26 }
 0x817   : > { %6415 = vmatpush3.msra.mxu0 %v2470_v27  ;;  %6450 = vmatpush3.msra.mxu1 %v2502_v28 }
 0x818   : > { %6416 = vmatprep.subr.mxu0 %v2485_v29  ;;  %6451 = vmatprep.subr.mxu1 %v2517_v35 }
 0x819   : > { %6417 = vmatpush3.msra.mxu0 %v2469_v36  ;;  %6452 = vmatpush3.msra.mxu1 %v2501_v37 }
 0x81a   : > { %6418 = vmatprep.subr.mxu0 %v2484_v9  ;;  %6453 = vmatprep.subr.mxu1 %v2516_v38 }
 0x81b   : > { %6419 = vmatpush3.msra.mxu0 %v2468_v39  ;;  %6454 = vmatpush3.msra.mxu1 %v2500_v44 }
 0x81c   : > { %6420 = vmatprep.subr.mxu0 %v2483_v2  ;;  %6455 = vmatprep.subr.mxu1 %v2515_v40 }
 0x81d   : > { %6421 = vmatpush3.msra.mxu0 %v2467_v41  ;;  %6456 = vmatpush3.msra.mxu1 %v2499_v42  ;;  %v5825_v42 = vld [vmem:[%s9322_s10] ss:$0 sm:$0xff] }
 0x81e   : > { %6422 = vmatprep.subr.mxu0 %v2482_v43  ;;  %6457 = vmatprep.subr.mxu1 %v2514_v45 }
 0x81f   : > { %6423 = vmatpush3.msra.mxu0 %v2466_v48  ;;  %6458 = vmatpush3.msra.mxu1 %v2498_v49 }
 0x820   : > { %6424 = vmatprep.subr.mxu0 %v2481_v50  ;;  %6459 = vmatprep.subr.mxu1 %v2513_v47 }
 0x821   : > { %6425 = vmatpush3.msra.mxu0 %v2465_v51  ;;  %6460 = vmatpush3.msra.mxu1 %v2497_v52  ;;  %v5830_v51 = vld [vmem:[%s9344_s3 + $0x30] sm:$0xff] }
 0x822   : > { %6426 = vmatprep.subr.mxu0 %v2480_v53  ;;  %6461 = vmatprep.subr.mxu1 %v2512_v54 }
 0x823   : > { %6427 = vmatpush3.msra.mxu0 %v2464_v57  ;;  %6462 = vmatpush3.msra.mxu1 %v2496_v58 }
 0x824   : > { %6428 = vmatprep.subr.mxu0 %v2479_v59  ;;  %6463 = vmatprep.subr.mxu1 %v2511_v3  ;;  %v5828_v3 = vld [vmem:[%s9345_s27 + $0x1] ss:$0 sm:$0xff] }
 0x825   : > { %6429 = vmatpush3.msra.mxu0 %v2463_v8  ;;  %6464 = vmatpush3.msra.mxu1 %v2495_v60 }
 0x826   : > { %3012 = vmatmul.mubr.f32.vlgmr.msra.gmra.mxu0 %v2267_v61  ;;  %3082 = vmatmul.mubr.f32.vlgmr.msra.gmra.mxu1 %v2269_v33  ;;  %v5829_v61 = vld [vmem:[%s9346_s2 + $0x1] ss:$0 sm:$0xff]  ;;  %s7039_s2 = smov [#allocation4]  }
 0x827   : > { %6832 = vmatprep.subr.mxu0 %v7036_v11  ;;  %6837 = vmatprep.subr.mxu1 %v7036_v11 }
 0x828   : > { %6834 = vmatprep.mubr.msk.f32.mxu0 %vm7037_vm1, %v7036_v11  ;;  %6839 = vmatprep.mubr.msk.f32.mxu1 %vm7037_vm1, %v7036_v11 }
 0x829   : > { %6833 = vmatpush3.msra.mxu0 %v5830_v51 }
 0x82a   : > { %6842 = vmatprep.subr.mxu0 %v7036_v11 }
 0x881   : > { %v6220_v34 = vpop.f32.mrf.mxu0  ;;  %v6255_v62 = vpop.f32.mrf.mxu1 }
 0x883   : > { %v6221_v63 = vpop.f32.mrf.mxu0  ;;  %v6256_v1 = vpop.f32.mrf.mxu1 }
 0x884   : > { %v6222_v5 = vadd.f32 %v6221_v63, %v6220_v34  ;;  %v6257_v6 = vadd.f32 %v6256_v1, %v6255_v62  ;;  %v5832_v62 = vld [vmem:[%s9344_s3 + $0x40] sm:$0xff]  ;;  %v5833_v63 = vld [vmem:[%s9344_s3 + $0x48] sm:$0xff]  ;;  %v5835_v1 = vld [vmem:[%s9344_s3 + $0x58] sm:$0xff] }
 0x886   : > { %v2664_v18 = vadd.f32 %v6257_v6, %v6222_v5 }
 0x8a2   : > { %v6290_v0 = vpop.f32.mrf.mxu0  ;;  %v6325_v7 = vpop.f32.mrf.mxu1 }
 0x8a4   : > { %v6291_v4 = vpop.f32.mrf.mxu0  ;;  %v6326_v19 = vpop.f32.mrf.mxu1 }
 0x8a5   : > { %v6292_v17 = vadd.f32 %v6291_v4, %v6290_v0  ;;  %v6327_v25 = vadd.f32 %v6326_v19, %v6325_v7  ;;  %v5834_v0 = vld [vmem:[%s9344_s3 + $0x50] sm:$0xff] }
 0x8a7   : > { %v2734_v23 = vadd.f32 %v6292_v17, %v2664_v18  ;;  %v5845_v17 = vld [vmem:[%s9316_s4 + $0x9] ss:$0 sm:$0xff] }
 0x8a9   : > { %v2804_v27 = vadd.f32 %v6327_v25, %v2734_v23  ;;  %v5843_v23 = vld [vmem:[%s9316_s4 + $0x7] ss:$0 sm:$0xff] }
 0x8c4   : > { %v6360_v16 = vpop.f32.mrf.mxu0  ;;  %v6395_v24 = vpop.f32.mrf.mxu1 }
 0x8c6   : > { %v6361_v22 = vpop.f32.mrf.mxu0  ;;  %v6396_v28 = vpop.f32.mrf.mxu1 }
 0x8c7   : > { %v6362_v26 = vadd.f32 %v6361_v22, %v6360_v16  ;;  %v6397_v37 = vadd.f32 %v6396_v28, %v6395_v24  ;;  %v5844_v16 = vld [vmem:[%s9316_s4 + $0x8] ss:$0 sm:$0xff]  ;;  %v5842_v22 = vld [vmem:[%s9316_s4 + $0x6] ss:$0 sm:$0xff]  ;;  %v5846_v28 = vld [vmem:[%s9316_s4 + $0xa] ss:$0 sm:$0xff] }
 0x8c9   : > { %v2874_v29 = vadd.f32 %v6362_v26, %v2804_v27 }
 0x8cb   : > { %v2944_v39 = vadd.f32 %v6397_v37, %v2874_v29  ;;  %v5847_v29 = vld [vmem:[%s9316_s4 + $0xb] ss:$0 sm:$0xff] }
 0x8e6   : > { %v6430_v35 = vpop.f32.mrf.mxu0  ;;  %v6465_v36 = vpop.f32.mrf.mxu1 }
 0x8e8   : > { %v6431_v9 = vpop.f32.mrf.mxu0  ;;  %v6466_v38 = vpop.f32.mrf.mxu1 }
 0x8e9   : > { %v6432_v44 = vadd.f32 %v6431_v9, %v6430_v35  ;;  %v6467_v40 = vadd.f32 %v6466_v38, %v6465_v36 }
 0x8eb   : > { %v3014_v2 = vadd.f32 %v6432_v44, %v2944_v39 }
 0x8ed   : > { %v3084_v41 = vadd.f32 %v6467_v40, %v3014_v2 }
 0x8ef   : > { %v3087_v43 = vadd.f32 %v3084_v41, %v7307_v31  ;;  %v5831_v31 = vld [vmem:[%s9344_s3 + $0x38] sm:$0xff]  ;;  %s6978_s3 = sshll.u32 %s7039_s2, 4  ;;  %s6979_s3 = int_to_ptr.vmem [resolvable:$false] %s6978_s3 }
 0x8f0   : > { %6838 = vmatpush3.msra.mxu1 %v5831_v31  ;;  %s6980_s15 = scalar_lea.vmem %s6979_s3, 256  ;;  %p6981_p0 = scmp.lt.s32.totalorder %s5726_s23, %s6979_s3 }
 0x8f1   : > { %v8245_v45 = vadd.f32 %v5825_v42, %v3087_v43  ;;  %6847 = vmatprep.subr.mxu1 %v7036_v11  ;;  %p6982_p1 = scmp.lt.s32.totalorder %s6980_s15, %s6974_s26 }
 0x8f3   : > { %v3100_v46 = vsel %vm551_vm0, %v8245_v45, 0.0  ;;  %p6983_p2 = por %p6982_p1, %p6981_p0 }
 0x8f4   : > { %3101 = vadd.xlane.f32.xlu0 %v3100_v46 }
 0x8f5   : > { %p6984_p3 = pnand %p6983_p2, %p6977_p13 }
 0x97d   : > { %v3102_v13 = vpop.xlane.xlu0 %3101 }
 0x97e   : > { %v3103_v48 = vmul.f32 0.125, %v3102_v13 }
 0x980   : > { %v3104_v49 = vsub.f32 %v8245_v45, %v3103_v48 }
 0x982   : > { %v3105_v50 = vmul.f32 %v3104_v49, %v3104_v49  ;;  %v3125_v8 = vmul.f32 %v5828_v3, %v3104_v49 }
 0x984   : > { %v3106_v47 = vsel %vm551_vm0, %v3105_v50, 0.0 }
 0x985   : > { %3107 = vadd.xlane.f32.xlu1 %v3106_v47 }
 0xa0e   : > { %v3108_v52 = vpop.xlane.xlu1 %3107 }
 0xa0f   : > { %v3109_v53 = vmul.f32 0.14285715, %v3108_v52 }
 0xa11   : > { %6952 = vrsqrt.f32 %v3109_v53  ;;  %vm3112_vm8 = vcmp.eq.f32.partialorder %v3109_v53, inf  ;;  %v3115_v56 = vand.u32 2147483648, %v3109_v53  ;;  %vm3114_vm9 = vcmp.eq.f32.partialorder %v3109_v53, 0.0 }
 0xa1e   : > { %v6953_v54 = vpop.eup %6952 }
 0xa1f   : > { %v3111_v55 = vmul.f32 %v6953_v54, %v3109_v53 }
 0xa21   : > { %v3113_v57 = vsel %vm3112_vm8, %v3109_v53, %v3111_v55 }
 0xa22   : > { %v3116_v58 = vsel %vm3114_vm9, %v3115_v56, %v3113_v57 }
 0xa23   : > { %v3117_v59 = vadd.f32 1e-06, %v3116_v58 }
 0xa25   : > { %6954 = vrcp.f32 %v3117_v59 }
 0xa32   : > { %v6955_v60 = vpop.eup %6954 }
 0xa33   : > { %v3126_v33 = vmul.f32 %v6955_v60, %v3125_v8 }
 0xa35   : > { %v3133_v34 = vadd.f32 %v5829_v61, %v3126_v33  ;;  %v5861_v61 = vld [vmem:[%s9317_s5 + $0xc] sm:$0xf] }
 0xa37   : > { %6835 = vmatmul.mubr.msk.f32.vlgmr.msra.gmra.mxu0 %vm551_vm0, %v3133_v34  ;;  %6840 = vmatmul.mubr.msk.f32.vlgmr.msra.gmra.mxu1 %vm551_vm0, %v3133_v34 }
 0xa38   : > { %6843 = vmatpush3.msra.mxu0 %v5832_v62  ;;  %6848 = vmatpush3.msra.mxu1 %v5833_v63 }
 0xa39   : > { %6844 = vmatprep.mubr.msk.f32.mxu0 %vm7037_vm1, %v7036_v11  ;;  %6849 = vmatprep.mubr.msk.f32.mxu1 %vm7037_vm1, %v7036_v11 }
 0xa3a   : > { %6852 = vmatprep.subr.mxu0 %v7036_v11  ;;  %6857 = vmatprep.subr.mxu1 %v7036_v11 }
 0xa3b   : > { %6845 = vmatmul.mubr.msk.f32.vlgmr.msra.gmra.mxu0 %vm551_vm0, %v3133_v34  ;;  %6850 = vmatmul.mubr.msk.f32.vlgmr.msra.gmra.mxu1 %vm551_vm0, %v3133_v34 }
 0xa3c   : > { %6853 = vmatpush3.msra.mxu0 %v5834_v0  ;;  %6854 = vmatprep.mubr.msk.f32.mxu0 %vm7037_vm1, %v7036_v11 }
 0xa3d   : > { %6858 = vmatpush3.msra.mxu1 %v5835_v1  ;;  %6859 = vmatprep.mubr.msk.f32.mxu1 %vm7037_vm1, %v7036_v11 }
 0xa3e   : > { %6862 = vmatprep.subr.mxu0 %v7036_v11  ;;  %6867 = vmatprep.subr.mxu1 %v7036_v11 }
 0xa3f   : > { %6855 = vmatmul.mubr.msk.f32.vlgmr.msra.gmra.mxu0 %vm551_vm0, %v3133_v34  ;;  %6860 = vmatmul.mubr.msk.f32.vlgmr.msra.gmra.mxu1 %vm551_vm0, %v3133_v34  ;;  %v5860_v34 = vld [vmem:[%s9317_s5 + $0x8] sm:$0xf] }
 0xa40   : > { %6864 = vmatprep.mubr.msk.f32.mxu0 %vm7037_vm1, %v7036_v11  ;;  %6869 = vmatprep.mubr.msk.f32.mxu1 %vm7037_vm1, %v7036_v11 }
 0xaf7   : > { %v3253_v4 = vpop.f32.mrf.mxu0  ;;  %v3323_v5 = vpop.f32.mrf.mxu1 }
 0xaf8   : > { %v3254_v35 = vadd.f32 %v5842_v22, %v3253_v4  ;;  %v3324_v36 = vadd.f32 %v5843_v23, %v3323_v5 }
 0xaf9   : > { %v6836_v6 = vpop.f32.mrf.mxu0  ;;  %v6841_v7 = vpop.f32.mrf.mxu1 }
 0xafb   : > { %v3393_v18 = vpop.f32.mrf.mxu0  ;;  %v3463_v19 = vpop.f32.mrf.mxu1 }
 0xafc   : > { %v3394_v24 = vadd.f32 %v5844_v16, %v3393_v18  ;;  %v3464_v25 = vadd.f32 %v5845_v17, %v3463_v19  ;;  %v5867_v19 = vld [vmem:[%s9318_s6 + $0x1] ss:$0 sm:$0xff] }
 0xafd   : > { %v6846_v26 = vpop.f32.mrf.mxu0  ;;  %v6851_v27 = vpop.f32.mrf.mxu1 }
 0xafe   : > { %6863 = vmatpush3.xpose.msk.msra.mxu0 %vm1058_vm4, %v3394_v24  ;;  %6868 = vmatpush3.xpose.msk.msra.mxu1 %vm1058_vm4, %v3464_v25 }
 0xaff   : > { %v3533_v37 = vpop.f32.mrf.mxu0  ;;  %v3603_v9 = vpop.f32.mrf.mxu1  ;;  %6872 = vmatprep.subr.mxu0 %v7036_v11  ;;  %6877 = vmatprep.subr.mxu1 %v7036_v11 }
 0xb00   : > { %v3534_v38 = vadd.f32 %v5846_v28, %v3533_v37  ;;  %v3604_v39 = vadd.f32 %v5847_v29, %v3603_v9  ;;  %v5874_v37 = vld [vmem:[%s9319_s7 + $0x90] sm:$0xff]  ;;  %v5877_v9 = vld [vmem:[%s9319_s7 + $0xa8] sm:$0xff] }
 0xb01   : > { %v6856_v44 = vpop.f32.mrf.mxu0  ;;  %v6861_v2 = vpop.f32.mrf.mxu1  ;;  %6865 = vmatmul.mubr.msk.f32.vlgmr.msra.gmra.mxu0 %vm1058_vm4, %v3254_v35  ;;  %6870 = vmatmul.mubr.msk.f32.vlgmr.msra.gmra.mxu1 %vm1058_vm4, %v3324_v36  ;;  %v5873_v35 = vld [vmem:[%s9319_s7 + $0x88] sm:$0xff]  ;;  %v5875_v36 = vld [vmem:[%s9319_s7 + $0x98] sm:$0xff] }
 0xb02   : > { %6873 = vmatpush3.msra.mxu0 %v3534_v38  ;;  %6878 = vmatpush3.msra.mxu1 %v3604_v39  ;;  %v5879_v38 = vld [vmem:[%s9319_s7 + $0xb8] sm:$0xff] }
 0xb03   : > { %6874 = vmatprep.mubr.msk.f32.mxu0 %vm7037_vm1, %v7036_v11  ;;  %6879 = vmatprep.mubr.msk.f32.mxu1 %vm7037_vm1, %v7036_v11 }
 0xb04   : > { %6882 = vmatprep.subr.mxu0 %v7036_v11  ;;  %6887 = vmatprep.subr.mxu1 %v7036_v11 }
 0xbc1   : > { %v3679_v40 = vpop.f32.mrf.mxu0  ;;  %v3755_v41 = vpop.f32.mrf.mxu1 }
 0xbc2   : > { %v3759_v42 = vmul.f32 0.5, %v3679_v40  ;;  %v3760_v43 = vmul.f32 0.5, %v3755_v41 }
 0xbc3   : > { %v6866_v46 = vpop.f32.mrf.mxu0  ;;  %v6871_v13 = vpop.f32.mrf.mxu1 }
 0xbc4   : > { %v3764_v48 = vsel %vm551_vm0, %v3760_v43, -inf  ;;  %v3761_v49 = vsel %vm551_vm0, %v3759_v42, -inf  ;;  %v5870_v13 = vld [vmem:[%s9323_s11 + $0x1] ss:$0 sm:$0xff] }
 0xbc5   : > { %3765 = vmax.xlane.f32.xlu1 %v3764_v48  ;;  %3762 = vmax.xlane.f32.xlu0 %v3761_v49 }
 0xc4e   : > { %v3766_v50 = vpop.xlane.xlu1 %3765  ;;  %v3763_v47 = vpop.xlane.xlu0 %3762 }
 0xc4f   : > { %v3768_v51 = vsub.f32 %v3760_v43, %v3766_v50  ;;  %v3767_v31 = vsub.f32 %v3759_v42, %v3763_v47  ;;  %v5871_v50 = vld [vmem:[%s9324_s12 + $0x1] ss:$0 sm:$0xff] }
 0xc51   : > { %v3771_v52 = vmul.f32 1.442695, %v3768_v51  ;;  %v3769_v53 = vmul.f32 1.442695, %v3767_v31  ;;  %v5876_v31 = vld [vmem:[%s9319_s7 + $0xa0] sm:$0xff] }
 0xc53   : > { %6956 = vpow2.f32 %v3771_v52  ;;  %v5878_v52 = vld [vmem:[%s9319_s7 + $0xb0] sm:$0xff] }
 0xc54   : > { %6958 = vpow2.f32 %v3769_v53  ;;  %v5881_v53 = vld [vmem:[%s9319_s7 + $0xc8] sm:$0xff] }
 0xc60   : > { %v6957_v54 = vpop.eup %6956 }
 0xc61   : > { %v6959_v55 = vpop.eup %6958  ;;  %v3776_v56 = vsel %vm551_vm0, %v6957_v54, 0.0 }
 0xc62   : > { %3777 = vadd.xlane.f32.xlu1 %v3776_v56  ;;  %v3773_v57 = vsel %vm551_vm0, %v6959_v55, 0.0  ;;  %v5882_v56 = vld [vmem:[%s9319_s7 + $0xd0] sm:$0xff] }
 0xc63   : > { %3774 = vadd.xlane.f32.xlu0 %v3773_v57  ;;  %v5885_v57 = vld [vmem:[%s9319_s7 + $0xe8] sm:$0xff] }
 0xceb   : > { %v3778_v58 = vpop.xlane.xlu1 %3777 }
 0xcec   : > { %6960 = vrcp.f32 %v3778_v58  ;;  %v3775_v59 = vpop.xlane.xlu0 %3774  ;;  %v5887_v58 = vld [vmem:[%s9319_s7 + $0xf8] sm:$0xff] }
 0xced   : > { %6962 = vrcp.f32 %v3775_v59  ;;  %v5884_v59 = vld [vmem:[%s9319_s7 + $0xe0] sm:$0xff] }
 0xcf9   : > { %v6961_v3 = vpop.eup %6960 }
 0xcfa   : > { %v6963_v8 = vpop.eup %6962  ;;  %v3782_v60 = vmul.f32 %v6961_v3, %v6957_v54  ;;  %v5883_v54 = vld [vmem:[%s9319_s7 + $0xd8] sm:$0xff]  ;;  %v5886_v3 = vld [vmem:[%s9319_s7 + $0xf0] sm:$0xff] }
 0xcfb   : > { %v3781_v33 = vmul.f32 %v6963_v8, %v6959_v55  ;;  %v5880_v55 = vld [vmem:[%s9319_s7 + $0xc0] sm:$0xff]  ;;  %v5929_v8 = vld [vmem:[%s9321_s9 + $0x8f8] sm:$0xff] }
 0xcfc   : > { %6880 = vmatmul.mubr.msk.f32.vlgmr.msra.gmra.mxu1 %vm551_vm0, %v3782_v60  ;;  %v5961_v60 = vld [vmem:[%s9321_s9 + $0x9f8] sm:$0xff] }
 0xcfd   : > { %6875 = vmatmul.mubr.msk.f32.vlgmr.msra.gmra.mxu0 %vm551_vm0, %v3781_v33  ;;  %6888 = vmatpush3.msk.msra.mxu1 %vm1386_vm5, %v5861_v61  ;;  %v5913_v61 = vld [vmem:[%s9321_s9 + $0x878] sm:$0xff] }
 0xcfe   : > { %6883 = vmatpush3.msk.msra.mxu0 %vm1386_vm5, %v5860_v34  ;;  %6884 = vmatprep.mubr.msk.f32.mxu0 %vm7037_vm1, %v7036_v11  ;;  %v5945_v33 = vld [vmem:[%s9321_s9 + $0x978] sm:$0xff]  ;;  %v5928_v34 = vld [vmem:[%s9321_s9 + $0x8f0] sm:$0xff] }
 0xcff   : > { %6889 = vmatprep.mubr.msk.f32.mxu1 %vm7037_vm1, %v7036_v11  ;;  %4270 = vmatprep.subr.mxu0 %v5873_v35  ;;  %v5955_v35 = vld [vmem:[%s9321_s9 + $0x9c8] sm:$0xff] }
 0xd00   : > { %4341 = vmatprep.subr.mxu1 %v5875_v36  ;;  %v5939_v36 = vld [vmem:[%s9321_s9 + $0x948] sm:$0xff] }
 0xdbc   : > { %v3925_v62 = vpop.f32.mrf.mxu1 }
 0xdbd   : > { %v3852_v63 = vpop.f32.mrf.mxu0  ;;  %6890 = vmatmul.mubr.msk.f32.vlgmr.msra.gmra.mxu1 %vm1058_vm4, %v3925_v62  ;;  %v5960_v62 = vld [vmem:[%s9321_s9 + $0x9f0] sm:$0xff] }
 0xdbe   : > { %6885 = vmatmul.mubr.msk.f32.vlgmr.msra.gmra.mxu0 %vm1058_vm4, %v3852_v63  ;;  %v6881_v0 = vpop.f32.mrf.mxu1  ;;  %4375 = vmatprep.mubr.f32.mxu1 %v7036_v11  ;;  %v5944_v63 = vld [vmem:[%s9321_s9 + $0x970] sm:$0xff] }
 0xdbf   : > { %v6876_v1 = vpop.f32.mrf.mxu0  ;;  %4304 = vmatprep.mubr.f32.mxu0 %v7036_v11  ;;  %4342 = vmatpush1.msra.mxu1 %v5874_v37  ;;  %v5927_v0 = vld [vmem:[%s9321_s9 + $0x8e8] sm:$0xff]  ;;  %v5922_v37 = vld [vmem:[%s9321_s9 + $0x8c0] sm:$0xff] }
 0xdc0   : > { %4483 = vmatprep.subr.mxu1 %v5879_v38  ;;  %v5959_v1 = vld [vmem:[%s9321_s9 + $0x9e8] sm:$0xff]  ;;  %v5906_v38 = vld [vmem:[%s9321_s9 + $0x840] sm:$0xff] }
 0xe7d   : > { %v4080_v4 = vpop.f32.mrf.mxu1 }
 0xe7e   : > { %v4004_v5 = vpop.f32.mrf.mxu0  ;;  %v4085_v6 = vsel %vm551_vm0, %v4080_v4, 0.0  ;;  %v5911_v4 = vld [vmem:[%s9321_s9 + $0x868] sm:$0xff] }
 0xe7f   : > { %v4084_v7 = vsel %vm551_vm0, %v4004_v5, 0.0  ;;  %v6891_v16 = vpop.f32.mrf.mxu1  ;;  %v5943_v5 = vld [vmem:[%s9321_s9 + $0x968] sm:$0xff] }
 0xe80   : > { %v4086_v17 = vadd.f32 %v4085_v6, %v4084_v7  ;;  %v6886_v18 = vpop.f32.mrf.mxu0  ;;  %v5926_v6 = vld [vmem:[%s9321_s9 + $0x8e0] sm:$0xff] }
 0xe81   : > { %v5958_v7 = vld [vmem:[%s9321_s9 + $0x9e0] sm:$0xff]  ;;  %v5925_v18 = vld [vmem:[%s9321_s9 + $0x8d8] sm:$0xff] }
 0xe82   : > { %v4087_v22 = vadd.f32 %v4086_v17, %v8245_v45  ;;  %v5872_v45 = vld [vmem:[%s9319_s7 + $0x80] sm:$0xff] }
 0xe83   : > { %4271 = vmatpush1.msra.mxu0 %v5872_v45  ;;  %v5910_v16 = vld [vmem:[%s9321_s9 + $0x860] sm:$0xff]  ;;  %v5907_v45 = vld [vmem:[%s9321_s9 + $0x848] sm:$0xff] }
 0xe84   : > { %v8357_v23 = vadd.f32 %v5867_v19, %v4087_v22  ;;  %4412 = vmatprep.subr.mxu0 %v5877_v9  ;;  %v5942_v17 = vld [vmem:[%s9321_s9 + $0x960] sm:$0xff]  ;;  %v5957_v19 = vld [vmem:[%s9321_s9 + $0x9d8] sm:$0xff] }
 0xe85   : > { %v5909_v22 = vld [vmem:[%s9321_s9 + $0x858] sm:$0xff]  ;;  %v5954_v9 = vld [vmem:[%s9321_s9 + $0x9c0] sm:$0xff] }
 0xe86   : > { %v4101_v24 = vsel %vm551_vm0, %v8357_v23, 0.0 }
 0xe87   : > { %4102 = vadd.xlane.f32.xlu0 %v4101_v24  ;;  %v5941_v24 = vld [vmem:[%s9321_s9 + $0x958] sm:$0xff] }
 0xf10   : > { %v4103_v25 = vpop.xlane.xlu0 %4102 }
 0xf11   : > { %v4104_v26 = vmul.f32 0.125, %v4103_v25  ;;  %v5924_v25 = vld [vmem:[%s9321_s9 + $0x8d0] sm:$0xff] }
 0xf13   : > { %v4105_v27 = vsub.f32 %v8357_v23, %v4104_v26  ;;  %v5956_v26 = vld [vmem:[%s9321_s9 + $0x9d0] sm:$0xff] }
 0xf15   : > { %v4106_v28 = vmul.f32 %v4105_v27, %v4105_v27  ;;  %v4126_v48 = vmul.f32 %v5870_v13, %v4105_v27  ;;  %v5908_v27 = vld [vmem:[%s9321_s9 + $0x850] sm:$0xff] }
 0xf16   : > { %v5936_v13 = vld [vmem:[%s9321_s9 + $0x930] sm:$0xff] }
 0xf17   : > { %v4107_v29 = vsel %vm551_vm0, %v4106_v28, 0.0  ;;  %v5940_v28 = vld [vmem:[%s9321_s9 + $0x950] sm:$0xff] }
 0xf18   : > { %4108 = vadd.xlane.f32.xlu1 %v4107_v29  ;;  %v5923_v29 = vld [vmem:[%s9321_s9 + $0x8c8] sm:$0xff] }
 0xfa1   : > { %v4109_v39 = vpop.xlane.xlu1 %4108 }
 0xfa2   : > { %v4110_v44 = vmul.f32 0.14285715, %v4109_v39  ;;  %v5938_v39 = vld [vmem:[%s9321_s9 + $0x940] sm:$0xff] }
 0xfa4   : > { %6964 = vrsqrt.f32 %v4110_v44  ;;  %vm4113_vm10 = vcmp.eq.f32.partialorder %v4110_v44, inf  ;;  %v4116_v41 = vand.u32 2147483648, %v4110_v44  ;;  %vm4115_vm11 = vcmp.eq.f32.partialorder %v4110_v44, 0.0 }
 0xfb1   : > { %v6965_v2 = vpop.eup %6964 }
 0xfb2   : > { %v4112_v40 = vmul.f32 %v6965_v2, %v4110_v44  ;;  %v5953_v2 = vld [vmem:[%s9321_s9 + $0x9b8] sm:$0xff] }
 0xfb4   : > { %v4114_v42 = vsel %vm4113_vm10, %v4110_v44, %v4112_v40  ;;  %v5921_v44 = vld [vmem:[%s9321_s9 + $0x8b8] sm:$0xff] }
 0xfb5   : > { %v4117_v43 = vsel %vm4115_vm11, %v4116_v41, %v4114_v42  ;;  %v5905_v40 = vld [vmem:[%s9321_s9 + $0x838] sm:$0xff]  ;;  %v5920_v42 = vld [vmem:[%s9321_s9 + $0x8b0] sm:$0xff] }
 0xfb6   : > { %v4118_v46 = vadd.f32 1e-06, %v4117_v43  ;;  %v5937_v41 = vld [vmem:[%s9321_s9 + $0x938] sm:$0xff]  ;;  %v5952_v43 = vld [vmem:[%s9321_s9 + $0x9b0] sm:$0xff] }
 0xfb8   : > { %6966 = vrcp.f32 %v4118_v46  ;;  %v5904_v46 = vld [vmem:[%s9321_s9 + $0x830] sm:$0xff] }
 0xfc5   : > { %v6967_v49 = vpop.eup %6966 }
 0xfc6   : > { %v4127_v47 = vmul.f32 %v6967_v49, %v4126_v48  ;;  %v5919_v48 = vld [vmem:[%s9321_s9 + $0x8a8] sm:$0xff] }
 0xfc7   : > { %v5951_v49 = vld [vmem:[%s9321_s9 + $0x9a8] sm:$0xff] }
 0xfc8   : > { %v4134_v51 = vadd.f32 %v5871_v50, %v4127_v47  ;;  %v5903_v50 = vld [vmem:[%s9321_s9 + $0x828] sm:$0xff] }
 0xfc9   : > { %v5935_v47 = vld [vmem:[%s9321_s9 + $0x928] sm:$0xff] }
 0xfca   : > { %5890 = vmatmul.mubr.msk.f32.vlgmr.msra.gmra.mxu0 %vm551_vm0, %v4134_v51  ;;  %5891 = vmatmul.mubr.msk.f32.vlgmr.msra.gmra.mxu1 %vm551_vm0, %v4134_v51 }
 0xfcb   : > { %4413 = vmatpush1.msra.mxu0 %v5876_v31  ;;  %4446 = vmatprep.mubr.f32.mxu0 %v7036_v11  ;;  %v5950_v31 = vld [vmem:[%s9321_s9 + $0x9a0] sm:$0xff] }
 0xfcc   : > { %4484 = vmatpush1.msra.mxu1 %v5878_v52  ;;  %4517 = vmatprep.mubr.f32.mxu1 %v7036_v11  ;;  %v5902_v52 = vld [vmem:[%s9321_s9 + $0x820] sm:$0xff] }
 0xfcd   : > { %4554 = vmatprep.subr.mxu0 %v5881_v53  ;;  %4625 = vmatprep.subr.mxu1 %v5883_v54  ;;  %v5934_v53 = vld [vmem:[%s9321_s9 + $0x920] sm:$0xff]  ;;  %v5917_v54 = vld [vmem:[%s9321_s9 + $0x898] sm:$0xff] }
 0xfce   : > { %5892 = vmatmul.mubr.msk.f32.vlgmr.msra.gmra.mxu0 %vm551_vm0, %v4134_v51  ;;  %5893 = vmatmul.mubr.msk.f32.vlgmr.msra.gmra.mxu1 %vm551_vm0, %v4134_v51 }
 0xfcf   : > { %4555 = vmatpush1.msra.mxu0 %v5880_v55  ;;  %4588 = vmatprep.mubr.f32.mxu0 %v7036_v11  ;;  %v5949_v55 = vld [vmem:[%s9321_s9 + $0x998] sm:$0xff] }
 0xfd0   : > { %4626 = vmatpush1.msra.mxu1 %v5882_v56  ;;  %4659 = vmatprep.mubr.f32.mxu1 %v7036_v11  ;;  %v5901_v56 = vld [vmem:[%s9321_s9 + $0x818] sm:$0xff] }
 0xfd1   : > { %4696 = vmatprep.subr.mxu0 %v5885_v57  ;;  %4767 = vmatprep.subr.mxu1 %v5887_v58  ;;  %v5933_v57 = vld [vmem:[%s9321_s9 + $0x918] sm:$0xff]  ;;  %v5916_v58 = vld [vmem:[%s9321_s9 + $0x890] sm:$0xff] }
 0xfd2   : > { %5894 = vmatmul.mubr.msk.f32.vlgmr.msra.gmra.mxu0 %vm551_vm0, %v4134_v51  ;;  %5895 = vmatmul.mubr.msk.f32.vlgmr.msra.gmra.mxu1 %vm551_vm0, %v4134_v51 }
 0xfd3   : > { %4697 = vmatpush1.msra.mxu0 %v5884_v59  ;;  %4730 = vmatprep.mubr.f32.mxu0 %v7036_v11  ;;  %v5948_v59 = vld [vmem:[%s9321_s9 + $0x990] sm:$0xff] }
 0xfd4   : > { %4768 = vmatpush1.msra.mxu1 %v5886_v3  ;;  %4801 = vmatprep.mubr.f32.mxu1 %v7036_v11  ;;  %v5912_v11 = vld [vmem:[%s9321_s9 + $0x870] sm:$0xff] }
 0xfd5   : > { %6492 = vmatprep.subr.mxu0 %v5929_v8  ;;  %6527 = vmatprep.subr.mxu1 %v5961_v60  ;;  %v5900_v3 = vld [vmem:[%s9321_s9 + $0x810] sm:$0xff]  ;;  %v5915_v60 = vld [vmem:[%s9321_s9 + $0x888] sm:$0xff] }
 0xfd6   : > { %5896 = vmatmul.mubr.msk.f32.vlgmr.msra.gmra.mxu0 %vm551_vm0, %v4134_v51  ;;  %5897 = vmatmul.mubr.msk.f32.vlgmr.msra.gmra.mxu1 %vm551_vm0, %v4134_v51  ;;  %v5918_v51 = vld [vmem:[%s9321_s9 + $0x8a0] sm:$0xff]  ;;  %v5932_v8 = vld [vmem:[%s9321_s9 + $0x910] sm:$0xff] }
 0xfd7   : > { %6493 = vmatpush3.msra.mxu0 %v5913_v61  ;;  %6528 = vmatpush3.msra.mxu1 %v5945_v33  ;;  %v5947_v61 = vld [vmem:[%s9321_s9 + $0x988] sm:$0xff] }
 0xfd8   : > { %6494 = vmatprep.subr.mxu0 %v5928_v34  ;;  %6529 = vmatprep.subr.mxu1 %v5960_v62  ;;  %v5899_v33 = vld [vmem:[%s9321_s9 + $0x808] sm:$0xff]  ;;  %v5914_v62 = vld [vmem:[%s9321_s9 + $0x880] sm:$0xff] }
 0xfd9   : > { %6495 = vmatpush3.msra.mxu0 %v5912_v11  ;;  %6530 = vmatpush3.msra.mxu1 %v5944_v63  ;;  %v5931_v34 = vld [vmem:[%s9321_s9 + $0x908] sm:$0xff]  ;;  %v5946_v11 = vld [vmem:[%s9321_s9 + $0x980] sm:$0xff] }
 0xfda   : > { %6496 = vmatprep.subr.mxu0 %v5927_v0  ;;  %6531 = vmatprep.subr.mxu1 %v5959_v1  ;;  %v5898_v63 = vld [vmem:[%s9321_s9 + $0x800] sm:$0xff]  ;;  %v5993_v1 = vld [vmem:[%s9321_s9 + $0xaf8] sm:$0xff] }
 0xfdb   : > { %6497 = vmatpush3.msra.mxu0 %v5911_v4  ;;  %6532 = vmatpush3.msra.mxu1 %v5943_v5  ;;  %v5930_v0 = vld [vmem:[%s9321_s9 + $0x900] sm:$0xff]  ;;  %v6025_v4 = vld [vmem:[%s9321_s9 + $0xbf8] sm:$0xff]  ;;  %v8632_v5 = vld [vmem:[%s9320_s8 + $0x10] sm:$0xff] }
 0xfdc   : > { %6498 = vmatprep.subr.mxu0 %v5926_v6  ;;  %6533 = vmatprep.subr.mxu1 %v5958_v7  ;;  %v4160_v6 = vrot.slane %v8632_v5, %v7582_v10  ;;  %v4168_v7 = vrot.slane %v8632_v5, %v7585_v12 }
 0xfdd   : > { %6499 = vmatpush3.msra.mxu0 %v5910_v16  ;;  %6534 = vmatpush3.msra.mxu1 %v5942_v17  ;;  %v4164_v16 = vrot.slane %v8632_v5, %v7593_v14  ;;  %v4172_v17 = vrot.slane %v8632_v5, %v7596_v15 }
 0xfde   : > { %6500 = vmatprep.subr.mxu0 %v5925_v18  ;;  %6535 = vmatprep.subr.mxu1 %v5957_v19 }
 0xfdf   : > { %6501 = vmatpush3.msra.mxu0 %v5909_v22  ;;  %6536 = vmatpush3.msra.mxu1 %v5941_v24 }
 0xfe0   : > { %6502 = vmatprep.subr.mxu0 %v5924_v25  ;;  %6537 = vmatprep.subr.mxu1 %v5956_v26 }
 0xfe1   : > { %6503 = vmatpush3.msra.mxu0 %v5908_v27  ;;  %6538 = vmatpush3.msra.mxu1 %v5940_v28 }
 0xfe2   : > { %6504 = vmatprep.subr.mxu0 %v5923_v29  ;;  %6539 = vmatprep.subr.mxu1 %v5955_v35  ;;  %v4180_v29 = vrot.slane %v8632_v5, %v7607_v20  ;;  %v4188_v35 = vrot.slane %v8632_v5, %v7610_v21 }
 0xfe3   : > { %6505 = vmatpush3.msra.mxu0 %v5907_v45  ;;  %6540 = vmatpush3.msra.mxu1 %v5939_v36 }
 0xfe4   : > { %6506 = vmatprep.subr.mxu0 %v5922_v37  ;;  %6541 = vmatprep.subr.mxu1 %v5954_v9 }
 0xfe5   : > { %6507 = vmatpush3.msra.mxu0 %v5906_v38  ;;  %6542 = vmatpush3.msra.mxu1 %v5938_v39 }
 0xfe6   : > { %6508 = vmatprep.subr.mxu0 %v5921_v44  ;;  %6543 = vmatprep.subr.mxu1 %v5953_v2 }
 0xfe7   : > { %6509 = vmatpush3.msra.mxu0 %v5905_v40  ;;  %6544 = vmatpush3.msra.mxu1 %v5937_v41  ;;  %v5977_v40 = vld [vmem:[%s9321_s9 + $0xa78] sm:$0xff] }
 0xfe8   : > { %6510 = vmatprep.subr.mxu0 %v5920_v42  ;;  %6545 = vmatprep.subr.mxu1 %v5952_v43  ;;  %v6009_v41 = vld [vmem:[%s9321_s9 + $0xb78] sm:$0xff] }
 0xfe9   : > { %6511 = vmatpush3.msra.mxu0 %v5904_v46  ;;  %6546 = vmatpush3.msra.mxu1 %v5936_v13  ;;  %v5992_v46 = vld [vmem:[%s9321_s9 + $0xaf0] sm:$0xff] }
 0xfea   : > { %6512 = vmatprep.subr.mxu0 %v5919_v48  ;;  %6547 = vmatprep.subr.mxu1 %v5951_v49  ;;  %v6024_v13 = vld [vmem:[%s9321_s9 + $0xbf0] sm:$0xff] }
 0xfeb   : > { %6513 = vmatpush3.msra.mxu0 %v5903_v50  ;;  %6548 = vmatpush3.msra.mxu1 %v5935_v47  ;;  %v5976_v48 = vld [vmem:[%s9321_s9 + $0xa70] sm:$0xff] }
 0xfec   : > { %6514 = vmatprep.subr.mxu0 %v5918_v51  ;;  %6549 = vmatprep.subr.mxu1 %v5950_v31  ;;  %v6008_v49 = vld [vmem:[%s9321_s9 + $0xb70] sm:$0xff]  ;;  %v5991_v51 = vld [vmem:[%s9321_s9 + $0xae8] sm:$0xff] }
 0xfed   : > { %6515 = vmatpush3.msra.mxu0 %v5902_v52  ;;  %6550 = vmatpush3.msra.mxu1 %v5934_v53  ;;  %v6023_v31 = vld [vmem:[%s9321_s9 + $0xbe8] sm:$0xff] }
 0xfee   : > { %6516 = vmatprep.subr.mxu0 %v5917_v54  ;;  %6551 = vmatprep.subr.mxu1 %v5949_v55  ;;  %v5975_v52 = vld [vmem:[%s9321_s9 + $0xa68] sm:$0xff]  ;;  %v5990_v54 = vld [vmem:[%s9321_s9 + $0xae0] sm:$0xff] }
 0xfef   : > { %6517 = vmatpush3.msra.mxu0 %v5901_v56  ;;  %6552 = vmatpush3.msra.mxu1 %v5933_v57  ;;  %v6007_v53 = vld [vmem:[%s9321_s9 + $0xb68] sm:$0xff]  ;;  %v6022_v55 = vld [vmem:[%s9321_s9 + $0xbe0] sm:$0xff] }
 0xff0   : > { %6518 = vmatprep.subr.mxu0 %v5916_v58  ;;  %6553 = vmatprep.subr.mxu1 %v5948_v59  ;;  %v5974_v56 = vld [vmem:[%s9321_s9 + $0xa60] sm:$0xff]  ;;  %v5989_v58 = vld [vmem:[%s9321_s9 + $0xad8] sm:$0xff] }
 0xff1   : > { %6519 = vmatpush3.msra.mxu0 %v5900_v3  ;;  %6554 = vmatpush3.msra.mxu1 %v5932_v8  ;;  %v6006_v57 = vld [vmem:[%s9321_s9 + $0xb60] sm:$0xff]  ;;  %v6021_v59 = vld [vmem:[%s9321_s9 + $0xbd8] sm:$0xff] }
 0xff2   : > { %6520 = vmatprep.subr.mxu0 %v5915_v60  ;;  %6555 = vmatprep.subr.mxu1 %v5947_v61  ;;  %v5973_v3 = vld [vmem:[%s9321_s9 + $0xa58] sm:$0xff]  ;;  %v5988_v60 = vld [vmem:[%s9321_s9 + $0xad0] sm:$0xff] }
 0xff3   : > { %6521 = vmatpush3.msra.mxu0 %v5899_v33  ;;  %6556 = vmatpush3.msra.mxu1 %v5931_v34  ;;  %v6005_v8 = vld [vmem:[%s9321_s9 + $0xb58] sm:$0xff]  ;;  %v6020_v61 = vld [vmem:[%s9321_s9 + $0xbd0] sm:$0xff] }
 0xff4   : > { %6522 = vmatprep.subr.mxu0 %v5914_v62  ;;  %6557 = vmatprep.subr.mxu1 %v5946_v11  ;;  %v5972_v33 = vld [vmem:[%s9321_s9 + $0xa50] sm:$0xff]  ;;  %v5987_v62 = vld [vmem:[%s9321_s9 + $0xac8] sm:$0xff] }
 0xff5   : > { %6523 = vmatpush3.msra.mxu0 %v5898_v63  ;;  %6558 = vmatpush3.msra.mxu1 %v5930_v0  ;;  %v6004_v34 = vld [vmem:[%s9321_s9 + $0xb50] sm:$0xff]  ;;  %v6019_v11 = vld [vmem:[%s9321_s9 + $0xbc8] sm:$0xff] }
 0xff6   : > { %6562 = vmatprep.subr.mxu0 %v5993_v1  ;;  %6597 = vmatprep.subr.mxu1 %v6025_v4  ;;  %v5971_v63 = vld [vmem:[%s9321_s9 + $0xa48] sm:$0xff]  ;;  %v5986_v1 = vld [vmem:[%s9321_s9 + $0xac0] sm:$0xff] }
 0xff7   : > { %v6003_v0 = vld [vmem:[%s9321_s9 + $0xb48] sm:$0xff]  ;;  %v6018_v4 = vld [vmem:[%s9321_s9 + $0xbc0] sm:$0xff] }
0x108a   : > { %v4306_v18 = vpop.f32.mrf.mxu0  ;;  %v4377_v19 = vpop.f32.mrf.mxu1 }
0x108b   : > { %v4307_v22 = vadd.f32 %v4306_v18, %v4160_v6  ;;  %v4378_v24 = vadd.f32 %v4377_v19, %v4168_v7  ;;  %v5970_v6 = vld [vmem:[%s9321_s9 + $0xa40] sm:$0xff]  ;;  %v5969_v18 = vld [vmem:[%s9321_s9 + $0xa38] sm:$0xff] }
0x108c   : > { %v4308_v25 = vpop.f32.mrf.mxu0  ;;  %v4379_v26 = vpop.f32.mrf.mxu1  ;;  %v6002_v7 = vld [vmem:[%s9321_s9 + $0xb40] sm:$0xff]  ;;  %v6001_v19 = vld [vmem:[%s9321_s9 + $0xb38] sm:$0xff] }
0x108d   : > { %v4309_v27 = vadd.f32 %v4308_v25, %v4164_v16  ;;  %v4380_v28 = vadd.f32 %v4379_v26, %v4172_v17  ;;  %v4808_v38 = vmax.f32 %v4307_v22, 0.0  ;;  %v4810_v39 = vmax.f32 %v4378_v24, 0.0  ;;  %v5985_v16 = vld [vmem:[%s9321_s9 + $0xab8] sm:$0xff]  ;;  %v5984_v22 = vld [vmem:[%s9321_s9 + $0xab0] sm:$0xff] }
0x108e   : > { %v8646_v45 = vpop.f32.mrf.mxu0  ;;  %v8648_v36 = vpop.f32.mrf.mxu1  ;;  %v6017_v17 = vld [vmem:[%s9321_s9 + $0xbb8] sm:$0xff]  ;;  %v6016_v24 = vld [vmem:[%s9321_s9 + $0xbb0] sm:$0xff] }
0x108f   : > { %v4809_v37 = vmax.f32 %v4309_v27, 0.0  ;;  %v4811_v9 = vmax.f32 %v4380_v28, 0.0  ;;  %v5968_v25 = vld [vmem:[%s9321_s9 + $0xa30] sm:$0xff]  ;;  %v5983_v27 = vld [vmem:[%s9321_s9 + $0xaa8] sm:$0xff] }
0x1090   : > { %v4450_v44 = vpop.f32.mrf.mxu0  ;;  %v4521_v2 = vpop.f32.mrf.mxu1  ;;  %v6000_v26 = vld [vmem:[%s9321_s9 + $0xb30] sm:$0xff]  ;;  %v6015_v28 = vld [vmem:[%s9321_s9 + $0xba8] sm:$0xff] }
0x1091   : > { %v4451_v42 = vadd.f32 %v4450_v44, %v4180_v29  ;;  %v4522_v43 = vadd.f32 %v4521_v2, %v4188_v35  ;;  %5145 = vmatprep.mubr.f32.mxu0 %v4809_v37  ;;  %5215 = vmatprep.mubr.f32.mxu1 %v4811_v9  ;;  %v5967_v29 = vld [vmem:[%s9321_s9 + $0xa28] sm:$0xff]  ;;  %v5982_v37 = vld [vmem:[%s9321_s9 + $0xaa0] sm:$0xff]  ;;  %v5981_v2 = vld [vmem:[%s9321_s9 + $0xa98] sm:$0xff] }
0x1092   : > { %5146 = vmatmul.mubr.f32.vlgmr.msra.gmra.mxu0 %v4808_v38  ;;  %5216 = vmatmul.mubr.f32.vlgmr.msra.gmra.mxu1 %v4810_v39  ;;  %v5999_v35 = vld [vmem:[%s9321_s9 + $0xb28] sm:$0xff]  ;;  %v6014_v9 = vld [vmem:[%s9321_s9 + $0xba0] sm:$0xff]  ;;  %v8788_v44 = vpop.f32.mrf.mxu0 }
0x1093   : > { %v4813_v50 = vmax.f32 %v4451_v42, 0.0  ;;  %v4815_v47 = vmax.f32 %v4522_v43, 0.0  ;;  %6563 = vmatpush3.msra.mxu0 %v5977_v40  ;;  %6598 = vmatpush3.msra.mxu1 %v6009_v41  ;;  %v5966_v38 = vld [vmem:[%s9321_s9 + $0xa20] sm:$0xff]  ;;  %v6013_v40 = vld [vmem:[%s9321_s9 + $0xb98] sm:$0xff]  ;;  %v4176_v41 = vrot.slane %v8632_v5, %v7741_v30  ;;  %v4184_v42 = vrot.slane %v8632_v5, %v7744_v32  ;;  %v8800_v43 = vpop.f32.mrf.mxu1  ;;  %v5980_v5 = vld [vmem:[%s9321_s9 + $0xa90] sm:$0xff] }
0x1094   : > { %6564 = vmatprep.subr.mxu0 %v5992_v46  ;;  %6599 = vmatprep.subr.mxu1 %v6024_v13  ;;  %v5998_v39 = vld [vmem:[%s9321_s9 + $0xb20] sm:$0xff]  ;;  %v5965_v46 = vld [vmem:[%s9321_s9 + $0xa18] sm:$0xff] }
0x1095   : > { %6565 = vmatpush3.msra.mxu0 %v5976_v48  ;;  %6600 = vmatpush3.msra.mxu1 %v6008_v49  ;;  %v5997_v13 = vld [vmem:[%s9321_s9 + $0xb18] sm:$0xff]  ;;  %v6012_v49 = vld [vmem:[%s9321_s9 + $0xb90] sm:$0xff] }
0x1096   : > { %6566 = vmatprep.subr.mxu0 %v5991_v51  ;;  %5285 = vmatprep.mubr.f32.mxu0 %v4813_v50  ;;  %v8811_v48 = vld [vmem:[%s9320_s8 + $0x18] sm:$0xff]  ;;  %v5996_v51 = vld [vmem:[%s9321_s9 + $0xb10] sm:$0xff] }
0x1097   : > { %6601 = vmatprep.subr.mxu1 %v6023_v31  ;;  %5355 = vmatprep.mubr.f32.mxu1 %v4815_v47  ;;  %v4196_v50 = vrot.slane %v8811_v48, %v7593_v14  ;;  %v5964_v47 = vld [vmem:[%s9321_s9 + $0xa10] sm:$0xff]  ;;  %v4592_v31 = vpop.f32.mrf.mxu0  ;;  %v5979_v14 = vld [vmem:[%s9321_s9 + $0xa88] sm:$0xff] }
0x1098   : > { %6567 = vmatpush3.msra.mxu0 %v5975_v52  ;;  %6602 = vmatpush3.msra.mxu1 %v6007_v53  ;;  %v4204_v52 = vrot.slane %v8811_v48, %v7596_v15  ;;  %v6011_v53 = vld [vmem:[%s9321_s9 + $0xb88] sm:$0xff] }
0x1099   : > { %6568 = vmatprep.subr.mxu0 %v5990_v54  ;;  %6603 = vmatprep.subr.mxu1 %v6022_v55  ;;  %v4449_v54 = vadd.f32 %v8646_v45, %v4176_v41  ;;  %v4520_v55 = vadd.f32 %v8648_v36, %v4184_v42  ;;  %v5963_v15 = vld [vmem:[%s9321_s9 + $0xa08] sm:$0xff]  ;;  %v6010_v45 = vld [vmem:[%s9321_s9 + $0xb80] sm:$0xff]  ;;  %v4593_v36 = vadd.f32 %v4592_v31, %v4196_v50  ;;  %v6049_v50 = vld [vmem:[%s9321_s9 + $0xcb8] sm:$0xff] }
0x109a   : > { %6569 = vmatpush3.msra.mxu0 %v5974_v56  ;;  %6604 = vmatpush3.msra.mxu1 %v6006_v57  ;;  %v4663_v56 = vpop.f32.mrf.mxu1  ;;  %v5995_v57 = vld [vmem:[%s9321_s9 + $0xb08] sm:$0xff]  ;;  %v6065_v31 = vld [vmem:[%s9321_s9 + $0xd38] sm:$0xff] }
0x109b   : > { %6570 = vmatprep.subr.mxu0 %v5989_v58  ;;  %6605 = vmatprep.subr.mxu1 %v6021_v59  ;;  %v5978_v58 = vld [vmem:[%s9321_s9 + $0xa80] sm:$0xff]  ;;  %v6035_v41 = vld [vmem:[%s9321_s9 + $0xc48] sm:$0xff] }
0x109c   : > { %6571 = vmatpush3.msra.mxu0 %v5973_v3  ;;  %6606 = vmatpush3.msra.mxu1 %v6005_v8  ;;  %v5962_v59 = vld [vmem:[%s9321_s9 + $0xa00] sm:$0xff]  ;;  %v4664_v8 = vadd.f32 %v4663_v56, %v4204_v52  ;;  %v6067_v42 = vld [vmem:[%s9321_s9 + $0xd48] sm:$0xff]  ;;  %v6048_v52 = vld [vmem:[%s9321_s9 + $0xcb0] sm:$0xff] }
0x109d   : > { %6572 = vmatprep.subr.mxu0 %v5988_v60  ;;  %6607 = vmatprep.subr.mxu1 %v6020_v61  ;;  %v5994_v3 = vld [vmem:[%s9321_s9 + $0xb00] sm:$0xff]  ;;  %v4812_v60 = vmax.f32 %v4449_v54, 0.0  ;;  %v4814_v61 = vmax.f32 %v4520_v55, 0.0  ;;  %v6064_v54 = vld [vmem:[%s9321_s9 + $0xd30] sm:$0xff]  ;;  %v6047_v55 = vld [vmem:[%s9321_s9 + $0xca8] sm:$0xff] }
0x109e   : > { %6573 = vmatpush3.msra.mxu0 %v5972_v33  ;;  %6608 = vmatpush3.msra.mxu1 %v6004_v34  ;;  %v6057_v33 = vld [vmem:[%s9321_s9 + $0xcf8] sm:$0xff]  ;;  %v6079_v56 = vld [vmem:[%s9321_s9 + $0xda8] sm:$0xff] }
0x109f   : > { %6574 = vmatprep.subr.mxu0 %v5987_v62  ;;  %6609 = vmatprep.subr.mxu1 %v6019_v11  ;;  %v6089_v34 = vld [vmem:[%s9321_s9 + $0xdf8] sm:$0xff]  ;;  %v4817_v11 = vmax.f32 %v4593_v36, 0.0  ;;  %v6030_v36 = vld [vmem:[%s9321_s9 + $0xc20] sm:$0xff] }
0x10a0   : > { %6575 = vmatpush3.msra.mxu0 %v5971_v63  ;;  %6610 = vmatpush3.msra.mxu1 %v6003_v0  ;;  %v6041_v62 = vld [vmem:[%s9321_s9 + $0xc78] sm:$0xff]  ;;  %v4819_v0 = vmax.f32 %v4664_v8, 0.0 }
0x10a1   : > { %6576 = vmatprep.subr.mxu0 %v5986_v1  ;;  %6611 = vmatprep.subr.mxu1 %v6018_v4  ;;  %v6073_v63 = vld [vmem:[%s9321_s9 + $0xd78] sm:$0xff]  ;;  %v6056_v1 = vld [vmem:[%s9321_s9 + $0xcf0] sm:$0xff] }
0x10a2   : > { %6577 = vmatpush3.msra.mxu0 %v5970_v6  ;;  %6612 = vmatpush3.msra.mxu1 %v6002_v7  ;;  %v6088_v4 = vld [vmem:[%s9321_s9 + $0xdf0] sm:$0xff]  ;;  %v6045_v8 = vld [vmem:[%s9321_s9 + $0xc98] sm:$0xff] }
0x10a3   : > { %6578 = vmatprep.subr.mxu0 %v5985_v16  ;;  %6613 = vmatprep.subr.mxu1 %v6017_v17  ;;  %v6040_v6 = vld [vmem:[%s9321_s9 + $0xc70] sm:$0xff]  ;;  %v6055_v16 = vld [vmem:[%s9321_s9 + $0xce8] sm:$0xff] }
0x10a4   : > { %6579 = vmatpush3.msra.mxu0 %v5969_v18  ;;  %6614 = vmatpush3.msra.mxu1 %v6001_v19  ;;  %v6072_v7 = vld [vmem:[%s9321_s9 + $0xd70] sm:$0xff]  ;;  %v6087_v17 = vld [vmem:[%s9321_s9 + $0xde8] sm:$0xff] }
0x10a5   : > { %6580 = vmatprep.subr.mxu0 %v5984_v22  ;;  %6615 = vmatprep.subr.mxu1 %v6016_v24  ;;  %v6039_v18 = vld [vmem:[%s9321_s9 + $0xc68] sm:$0xff]  ;;  %v6054_v22 = vld [vmem:[%s9321_s9 + $0xce0] sm:$0xff] }
0x10a6   : > { %6581 = vmatpush3.msra.mxu0 %v5968_v25  ;;  %6616 = vmatpush3.msra.mxu1 %v6000_v26  ;;  %v6071_v19 = vld [vmem:[%s9321_s9 + $0xd68] sm:$0xff]  ;;  %v6086_v24 = vld [vmem:[%s9321_s9 + $0xde0] sm:$0xff] }
0x10a7   : > { %6582 = vmatprep.subr.mxu0 %v5983_v27  ;;  %6617 = vmatprep.subr.mxu1 %v6015_v28  ;;  %v6038_v25 = vld [vmem:[%s9321_s9 + $0xc60] sm:$0xff]  ;;  %v6053_v27 = vld [vmem:[%s9321_s9 + $0xcd8] sm:$0xff] }
0x10a8   : > { %6583 = vmatpush3.msra.mxu0 %v5967_v29  ;;  %6618 = vmatpush3.msra.mxu1 %v5999_v35  ;;  %v6070_v26 = vld [vmem:[%s9321_s9 + $0xd60] sm:$0xff]  ;;  %v6085_v28 = vld [vmem:[%s9321_s9 + $0xdd8] sm:$0xff] }
0x10a9   : > { %6584 = vmatprep.subr.mxu0 %v5982_v37  ;;  %6619 = vmatprep.subr.mxu1 %v6014_v9  ;;  %v6037_v29 = vld [vmem:[%s9321_s9 + $0xc58] sm:$0xff]  ;;  %v6052_v37 = vld [vmem:[%s9321_s9 + $0xcd0] sm:$0xff] }
0x10aa   : > { %6585 = vmatpush3.msra.mxu0 %v5966_v38  ;;  %6620 = vmatpush3.msra.mxu1 %v5998_v39  ;;  %v6069_v35 = vld [vmem:[%s9321_s9 + $0xd58] sm:$0xff]  ;;  %v6084_v9 = vld [vmem:[%s9321_s9 + $0xdd0] sm:$0xff] }
0x10ab   : > { %6586 = vmatprep.subr.mxu0 %v5981_v2  ;;  %6621 = vmatprep.subr.mxu1 %v6013_v40  ;;  %v6036_v38 = vld [vmem:[%s9321_s9 + $0xc50] sm:$0xff]  ;;  %v6051_v2 = vld [vmem:[%s9321_s9 + $0xcc8] sm:$0xff] }
0x10ac   : > { %6587 = vmatpush3.msra.mxu0 %v5965_v46  ;;  %6622 = vmatpush3.msra.mxu1 %v5997_v13  ;;  %v6068_v39 = vld [vmem:[%s9321_s9 + $0xd50] sm:$0xff]  ;;  %v6083_v40 = vld [vmem:[%s9321_s9 + $0xdc8] sm:$0xff]  ;;  %v6050_v46 = vld [vmem:[%s9321_s9 + $0xcc0] sm:$0xff] }
0x10ad   : > { %6588 = vmatprep.subr.mxu0 %v5980_v5  ;;  %6623 = vmatprep.subr.mxu1 %v6012_v49  ;;  %v6082_v13 = vld [vmem:[%s9321_s9 + $0xdc0] sm:$0xff] }
0x10ae   : > { %6589 = vmatpush3.msra.mxu0 %v5964_v47  ;;  %6624 = vmatpush3.msra.mxu1 %v5996_v51  ;;  %v6034_v5 = vld [vmem:[%s9321_s9 + $0xc40] sm:$0xff]  ;;  %v6081_v47 = vld [vmem:[%s9321_s9 + $0xdb8] sm:$0xff] }
0x10af   : > { %6590 = vmatprep.subr.mxu0 %v5979_v14  ;;  %6625 = vmatprep.subr.mxu1 %v6011_v53  ;;  %v6066_v49 = vld [vmem:[%s9321_s9 + $0xd40] sm:$0xff]  ;;  %v6033_v51 = vld [vmem:[%s9321_s9 + $0xc38] sm:$0xff]  ;;  %v6080_v14 = vld [vmem:[%s9321_s9 + $0xdb0] sm:$0xff] }
0x10b0   : > { %6591 = vmatpush3.msra.mxu0 %v5963_v15  ;;  %6626 = vmatpush3.msra.mxu1 %v5995_v57  ;;  %v6032_v53 = vld [vmem:[%s9321_s9 + $0xc30] sm:$0xff]  ;;  %v6031_v15 = vld [vmem:[%s9321_s9 + $0xc28] sm:$0xff] }
0x10b1   : > { %6592 = vmatprep.subr.mxu0 %v5978_v58  ;;  %6627 = vmatprep.subr.mxu1 %v6010_v45  ;;  %v6063_v57 = vld [vmem:[%s9321_s9 + $0xd28] sm:$0xff]  ;;  %v6046_v58 = vld [vmem:[%s9321_s9 + $0xca0] sm:$0xff] }
0x10b2   : > { %6593 = vmatpush3.msra.mxu0 %v5962_v59  ;;  %6628 = vmatpush3.msra.mxu1 %v5994_v3  ;;  %v6078_v45 = vld [vmem:[%s9321_s9 + $0xda0] sm:$0xff]  ;;  %v8999_v3 = vpop.f32.mrf.mxu0 }
0x10b3   : > { %5286 = vmatmul.mubr.f32.vlgmr.msra.gmra.mxu0 %v4812_v60  ;;  %5356 = vmatmul.mubr.f32.vlgmr.msra.gmra.mxu1 %v4814_v61  ;;  %v6062_v59 = vld [vmem:[%s9321_s9 + $0xd20] sm:$0xff]  ;;  %v6077_v60 = vld [vmem:[%s9321_s9 + $0xd98] sm:$0xff]  ;;  %v4192_v61 = vrot.slane %v8811_v48, %v7582_v10  ;;  %v6044_v10 = vld [vmem:[%s9321_s9 + $0xc90] sm:$0xff] }
0x10b4   : > { %6632 = vmatprep.subr.mxu0 %v6057_v33  ;;  %6667 = vmatprep.subr.mxu1 %v6089_v34  ;;  %v4200_v33 = vrot.slane %v8811_v48, %v7585_v12  ;;  %v9011_v34 = vpop.f32.mrf.mxu1  ;;  %v6076_v12 = vld [vmem:[%s9321_s9 + $0xd90] sm:$0xff] }
0x10b5   : > { %6633 = vmatpush3.msra.mxu0 %v6041_v62  ;;  %5425 = vmatprep.mubr.f32.mxu0 %v4817_v11  ;;  %v6029_v62 = vld [vmem:[%s9321_s9 + $0xc18] sm:$0xff] }
0x10b6   : > { %6668 = vmatpush3.msra.mxu1 %v6073_v63  ;;  %5495 = vmatprep.mubr.f32.mxu1 %v4819_v0  ;;  %v6061_v11 = vld [vmem:[%s9321_s9 + $0xd18] sm:$0xff]  ;;  %v4212_v63 = vrot.slane %v8811_v48, %v7607_v20  ;;  %v6028_v0 = vld [vmem:[%s9321_s9 + $0xc10] sm:$0xff]  ;;  %v6043_v20 = vld [vmem:[%s9321_s9 + $0xc88] sm:$0xff] }
0x10b7   : > { %6634 = vmatprep.subr.mxu0 %v6056_v1  ;;  %6669 = vmatprep.subr.mxu1 %v6088_v4  ;;  %v6060_v1 = vld [vmem:[%s9321_s9 + $0xd10] sm:$0xff]  ;;  %v4734_v4 = vpop.f32.mrf.mxu0 }
0x10b8   : > { %6635 = vmatpush3.msra.mxu0 %v6040_v6  ;;  %6670 = vmatpush3.msra.mxu1 %v6072_v7  ;;  %v4220_v6 = vrot.slane %v8811_v48, %v7610_v21  ;;  %v6075_v7 = vld [vmem:[%s9321_s9 + $0xd88] sm:$0xff] }
0x10b9   : > { %6636 = vmatprep.subr.mxu0 %v6055_v16  ;;  %6671 = vmatprep.subr.mxu1 %v6087_v17  ;;  %v4591_v16 = vadd.f32 %v8788_v44, %v4192_v61  ;;  %v4662_v17 = vadd.f32 %v8800_v43, %v4200_v33  ;;  %v6027_v21 = vld [vmem:[%s9321_s9 + $0xc08] sm:$0xff]  ;;  %v6074_v44 = vld [vmem:[%s9321_s9 + $0xd80] sm:$0xff]  ;;  %v4735_v43 = vadd.f32 %v4734_v4, %v4212_v63  ;;  %v6112_v63 = vld [vmem:[%s9321_s9 + $0xeb0] sm:$0xff] }
0x10ba   : > { %6637 = vmatpush3.msra.mxu0 %v6039_v18  ;;  %6672 = vmatpush3.msra.mxu1 %v6071_v19  ;;  %v4805_v18 = vpop.f32.mrf.mxu1  ;;  %v6059_v19 = vld [vmem:[%s9321_s9 + $0xd08] sm:$0xff]  ;;  %v6098_v61 = vld [vmem:[%s9321_s9 + $0xe40] sm:$0xff]  ;;  %v6128_v4 = vld [vmem:[%s9321_s9 + $0xf30] sm:$0xff] }
0x10bb   : > { %6638 = vmatprep.subr.mxu0 %v6054_v22  ;;  %6673 = vmatprep.subr.mxu1 %v6086_v24  ;;  %v6042_v22 = vld [vmem:[%s9321_s9 + $0xc80] sm:$0xff] }
0x10bc   : > { %6639 = vmatpush3.msra.mxu0 %v6038_v25  ;;  %6674 = vmatpush3.msra.mxu1 %v6070_v26  ;;  %v6026_v24 = vld [vmem:[%s9321_s9 + $0xc00] sm:$0xff]  ;;  %v4806_v26 = vadd.f32 %v4805_v18, %v4220_v6  ;;  %v6111_v6 = vld [vmem:[%s9321_s9 + $0xea8] sm:$0xff] }
0x10bd   : > { %6640 = vmatprep.subr.mxu0 %v6053_v27  ;;  %6675 = vmatprep.subr.mxu1 %v6085_v28  ;;  %v6058_v25 = vld [vmem:[%s9321_s9 + $0xd00] sm:$0xff]  ;;  %v4816_v27 = vmax.f32 %v4591_v16, 0.0  ;;  %v4818_v28 = vmax.f32 %v4662_v17, 0.0  ;;  %v6127_v16 = vld [vmem:[%s9321_s9 + $0xf28] sm:$0xff] }
0x10be   : > { %6641 = vmatpush3.msra.mxu0 %v6037_v29  ;;  %6676 = vmatpush3.msra.mxu1 %v6069_v35  ;;  %v6121_v29 = vld [vmem:[%s9321_s9 + $0xef8] sm:$0xff]  ;;  %v6130_v33 = vld [vmem:[%s9321_s9 + $0xf40] sm:$0xff] }
0x10bf   : > { %6642 = vmatprep.subr.mxu0 %v6052_v37  ;;  %6677 = vmatprep.subr.mxu1 %v6084_v9  ;;  %v6153_v35 = vld [vmem:[%s9321_s9 + $0xff8] sm:$0xff]  ;;  %v4821_v9 = vmax.f32 %v4735_v43, 0.0  ;;  %v6110_v17 = vld [vmem:[%s9321_s9 + $0xea0] sm:$0xff]  ;;  %v4208_v43 = vrot.slane %v8811_v48, %v7741_v30  ;;  %v6140_v30 = vld [vmem:[%s9321_s9 + $0xf90] sm:$0xff] }
0x10c0   : > { %6643 = vmatpush3.msra.mxu0 %v6036_v38  ;;  %6678 = vmatpush3.msra.mxu1 %v6068_v39  ;;  %v6105_v37 = vld [vmem:[%s9321_s9 + $0xe78] sm:$0xff]  ;;  %v4823_v39 = vmax.f32 %v4806_v26, 0.0  ;;  %v6142_v18 = vld [vmem:[%s9321_s9 + $0xfa0] sm:$0xff] }
0x10c1   : > { %6644 = vmatprep.subr.mxu0 %v6051_v2  ;;  %6679 = vmatprep.subr.mxu1 %v6083_v40  ;;  %v6137_v38 = vld [vmem:[%s9321_s9 + $0xf78] sm:$0xff]  ;;  %v6120_v2 = vld [vmem:[%s9321_s9 + $0xef0] sm:$0xff] }
0x10c2   : > { %6645 = vmatpush3.msra.mxu0 %v6035_v41  ;;  %6680 = vmatpush3.msra.mxu1 %v6067_v42  ;;  %v6152_v40 = vld [vmem:[%s9321_s9 + $0xff0] sm:$0xff]  ;;  %v6125_v26 = vld [vmem:[%s9321_s9 + $0xf18] sm:$0xff] }
0x10c3   : > { %6646 = vmatprep.subr.mxu0 %v6050_v46  ;;  %6681 = vmatprep.subr.mxu1 %v6082_v13  ;;  %v6104_v41 = vld [vmem:[%s9321_s9 + $0xe70] sm:$0xff]  ;;  %v6119_v46 = vld [vmem:[%s9321_s9 + $0xee8] sm:$0xff] }
0x10c4   : > { %6647 = vmatpush3.msra.mxu0 %v6034_v5  ;;  %6682 = vmatpush3.msra.mxu1 %v6066_v49  ;;  %v6136_v42 = vld [vmem:[%s9321_s9 + $0xf70] sm:$0xff]  ;;  %v6151_v13 = vld [vmem:[%s9321_s9 + $0xfe8] sm:$0xff] }
0x10c5   : > { %6648 = vmatprep.subr.mxu0 %v6049_v50  ;;  %6683 = vmatprep.subr.mxu1 %v6081_v47  ;;  %v6103_v5 = vld [vmem:[%s9321_s9 + $0xe68] sm:$0xff]  ;;  %v6118_v50 = vld [vmem:[%s9321_s9 + $0xee0] sm:$0xff] }
0x10c6   : > { %6649 = vmatpush3.msra.mxu0 %v6033_v51  ;;  %6684 = vmatpush3.msra.mxu1 %v6065_v31  ;;  %v6135_v49 = vld [vmem:[%s9321_s9 + $0xf68] sm:$0xff]  ;;  %v6150_v47 = vld [vmem:[%s9321_s9 + $0xfe0] sm:$0xff] }
0x10c7   : > { %6650 = vmatprep.subr.mxu0 %v6048_v52  ;;  %6685 = vmatprep.subr.mxu1 %v6080_v14  ;;  %v6102_v51 = vld [vmem:[%s9321_s9 + $0xe60] sm:$0xff]  ;;  %v6117_v52 = vld [vmem:[%s9321_s9 + $0xed8] sm:$0xff] }
0x10c8   : > { %6651 = vmatpush3.msra.mxu0 %v6032_v53  ;;  %6686 = vmatpush3.msra.mxu1 %v6064_v54  ;;  %v6134_v31 = vld [vmem:[%s9321_s9 + $0xf60] sm:$0xff]  ;;  %v6149_v14 = vld [vmem:[%s9321_s9 + $0xfd8] sm:$0xff] }
0x10c9   : > { %6652 = vmatprep.subr.mxu0 %v6047_v55  ;;  %6687 = vmatprep.subr.mxu1 %v6079_v56  ;;  %v6101_v53 = vld [vmem:[%s9321_s9 + $0xe58] sm:$0xff]  ;;  %v6116_v55 = vld [vmem:[%s9321_s9 + $0xed0] sm:$0xff] }
0x10ca   : > { %6653 = vmatpush3.msra.mxu0 %v6031_v15  ;;  %6688 = vmatpush3.msra.mxu1 %v6063_v57  ;;  %v6133_v54 = vld [vmem:[%s9321_s9 + $0xf58] sm:$0xff]  ;;  %v6148_v56 = vld [vmem:[%s9321_s9 + $0xfd0] sm:$0xff] }
0x10cb   : > { %6654 = vmatprep.subr.mxu0 %v6046_v58  ;;  %6689 = vmatprep.subr.mxu1 %v6078_v45  ;;  %v6100_v15 = vld [vmem:[%s9321_s9 + $0xe50] sm:$0xff]  ;;  %v6115_v58 = vld [vmem:[%s9321_s9 + $0xec8] sm:$0xff] }
0x10cc   : > { %6655 = vmatpush3.msra.mxu0 %v6030_v36  ;;  %6690 = vmatpush3.msra.mxu1 %v6062_v59  ;;  %v6132_v57 = vld [vmem:[%s9321_s9 + $0xf50] sm:$0xff]  ;;  %v6147_v45 = vld [vmem:[%s9321_s9 + $0xfc8] sm:$0xff] }
0x10cd   : > { %6656 = vmatprep.subr.mxu0 %v6045_v8  ;;  %6691 = vmatprep.subr.mxu1 %v6077_v60  ;;  %v6099_v36 = vld [vmem:[%s9321_s9 + $0xe48] sm:$0xff]  ;;  %v6114_v8 = vld [vmem:[%s9321_s9 + $0xec0] sm:$0xff] }
0x10ce   : > { %6657 = vmatpush3.msra.mxu0 %v6029_v62  ;;  %6692 = vmatpush3.msra.mxu1 %v6061_v11  ;;  %v6131_v59 = vld [vmem:[%s9321_s9 + $0xf48] sm:$0xff]  ;;  %v6146_v60 = vld [vmem:[%s9321_s9 + $0xfc0] sm:$0xff]  ;;  %v6113_v62 = vld [vmem:[%s9321_s9 + $0xeb8] sm:$0xff] }
0x10cf   : > { %6658 = vmatprep.subr.mxu0 %v6044_v10  ;;  %6693 = vmatprep.subr.mxu1 %v6076_v12  ;;  %v6145_v11 = vld [vmem:[%s9321_s9 + $0xfb8] sm:$0xff] }
0x10d0   : > { %6659 = vmatpush3.msra.mxu0 %v6028_v0  ;;  %6694 = vmatpush3.msra.mxu1 %v6060_v1  ;;  %v6097_v10 = vld [vmem:[%s9321_s9 + $0xe38] sm:$0xff]  ;;  %v6144_v0 = vld [vmem:[%s9321_s9 + $0xfb0] sm:$0xff] }
0x10d1   : > { %6660 = vmatprep.subr.mxu0 %v6043_v20  ;;  %6695 = vmatprep.subr.mxu1 %v6075_v7  ;;  %v6129_v12 = vld [vmem:[%s9321_s9 + $0xf38] sm:$0xff]  ;;  %v6096_v1 = vld [vmem:[%s9321_s9 + $0xe30] sm:$0xff]  ;;  %v6143_v20 = vld [vmem:[%s9321_s9 + $0xfa8] sm:$0xff] }
0x10d2   : > { %6661 = vmatpush3.msra.mxu0 %v6027_v21  ;;  %6696 = vmatpush3.msra.mxu1 %v6059_v19  ;;  %v6095_v7 = vld [vmem:[%s9321_s9 + $0xe28] sm:$0xff]  ;;  %v6094_v21 = vld [vmem:[%s9321_s9 + $0xe20] sm:$0xff] }
0x10d3   : > { %6662 = vmatprep.subr.mxu0 %v6042_v22  ;;  %6697 = vmatprep.subr.mxu1 %v6074_v44  ;;  %v6126_v19 = vld [vmem:[%s9321_s9 + $0xf20] sm:$0xff]  ;;  %v6109_v22 = vld [vmem:[%s9321_s9 + $0xe98] sm:$0xff] }
0x10d4   : > { %6663 = vmatpush3.msra.mxu0 %v6026_v24  ;;  %6698 = vmatpush3.msra.mxu1 %v6058_v25  ;;  %v6141_v44 = vld [vmem:[%s9321_s9 + $0xf98] sm:$0xff]  ;;  %v4216_v24 = vrot.slane %v8811_v48, %v7744_v32  ;;  %v6092_v32 = vld [vmem:[%s9321_s9 + $0xe10] sm:$0xff] }
0x10d5   : > { %5426 = vmatmul.mubr.f32.vlgmr.msra.gmra.mxu0 %v4816_v27  ;;  %5496 = vmatmul.mubr.f32.vlgmr.msra.gmra.mxu1 %v4818_v28  ;;  %v6093_v25 = vld [vmem:[%s9321_s9 + $0xe18] sm:$0xff]  ;;  %v6108_v27 = vld [vmem:[%s9321_s9 + $0xe90] sm:$0xff]  ;;  %v6107_v28 = vld [vmem:[%s9321_s9 + $0xe88] sm:$0xff] }
0x10d6   : > { %6702 = vmatprep.subr.mxu0 %v6121_v29  ;;  %6737 = vmatprep.subr.mxu1 %v6153_v35  ;;  %v6124_v48 = vld [vmem:[%s9321_s9 + $0xf10] sm:$0xff]  ;;  %v6139_v29 = vld [vmem:[%s9321_s9 + $0xf88] sm:$0xff]  ;;  %v4733_v35 = vadd.f32 %v8999_v3, %v4208_v43  ;;  %v6138_v3 = vld [vmem:[%s9321_s9 + $0xf80] sm:$0xff] }
0x10d7   : > { %6703 = vmatpush3.msra.mxu0 %v6105_v37  ;;  %5565 = vmatprep.mubr.f32.mxu0 %v4821_v9  ;;  %v4804_v37 = vadd.f32 %v9011_v34, %v4216_v24  ;;  %v6091_v9 = vld [vmem:[%s9321_s9 + $0xe08] sm:$0xff]  ;;  %v6090_v34 = vld [vmem:[%s9321_s9 + $0xe00] sm:$0xff] }
0x10d8   : > { %6738 = vmatpush3.msra.mxu1 %v6137_v38  ;;  %5635 = vmatprep.mubr.f32.mxu1 %v4823_v39  ;;  %v6123_v38 = vld [vmem:[%s9321_s9 + $0xf08] sm:$0xff]  ;;  %v6106_v39 = vld [vmem:[%s9321_s9 + $0xe80] sm:$0xff] }
0x10d9   : > { %6704 = vmatprep.subr.mxu0 %v6120_v2  ;;  %6739 = vmatprep.subr.mxu1 %v6152_v40  ;;  %v6122_v2 = vld [vmem:[%s9321_s9 + $0xf00] sm:$0xff]  ;;  %v4820_v40 = vmax.f32 %v4733_v35, 0.0 }
0x10da   : > { %6705 = vmatpush3.msra.mxu0 %v6104_v41  ;;  %6740 = vmatpush3.msra.mxu1 %v6136_v42  ;;  %v4822_v41 = vmax.f32 %v4804_v37, 0.0  ;;  %v6157_v35 = vld [vmem:[%s9326_s14] ss:$0 sm:$0xff] }
0x10db   : > { %6706 = vmatprep.subr.mxu0 %v6119_v46  ;;  %6741 = vmatprep.subr.mxu1 %v6151_v13 }
0x10dc   : > { %6707 = vmatpush3.msra.mxu0 %v6103_v5  ;;  %6742 = vmatpush3.msra.mxu1 %v6135_v49 }
0x10dd   : > { %6708 = vmatprep.subr.mxu0 %v6118_v50  ;;  %6743 = vmatprep.subr.mxu1 %v6150_v47 }
0x10de   : > { %6709 = vmatpush3.msra.mxu0 %v6102_v51  ;;  %6744 = vmatpush3.msra.mxu1 %v6134_v31 }
0x10df   : > { %6710 = vmatprep.subr.mxu0 %v6117_v52  ;;  %6745 = vmatprep.subr.mxu1 %v6149_v14 }
0x10e0   : > { %6711 = vmatpush3.msra.mxu0 %v6101_v53  ;;  %6746 = vmatpush3.msra.mxu1 %v6133_v54 }
0x10e1   : > { %6712 = vmatprep.subr.mxu0 %v6116_v55  ;;  %6747 = vmatprep.subr.mxu1 %v6148_v56 }
0x10e2   : > { %6713 = vmatpush3.msra.mxu0 %v6100_v15  ;;  %6748 = vmatpush3.msra.mxu1 %v6132_v57 }
0x10e3   : > { %6714 = vmatprep.subr.mxu0 %v6115_v58  ;;  %6749 = vmatprep.subr.mxu1 %v6147_v45 }
0x10e4   : > { %6715 = vmatpush3.msra.mxu0 %v6099_v36  ;;  %6750 = vmatpush3.msra.mxu1 %v6131_v59 }
0x10e5   : > { %6716 = vmatprep.subr.mxu0 %v6114_v8  ;;  %6751 = vmatprep.subr.mxu1 %v6146_v60 }
0x10e6   : > { %6717 = vmatpush3.msra.mxu0 %v6098_v61  ;;  %6752 = vmatpush3.msra.mxu1 %v6130_v33 }
0x10e7   : > { %6718 = vmatprep.subr.mxu0 %v6113_v62  ;;  %6753 = vmatprep.subr.mxu1 %v6145_v11 }
0x10e8   : > { %6719 = vmatpush3.msra.mxu0 %v6097_v10  ;;  %6754 = vmatpush3.msra.mxu1 %v6129_v12 }
0x10e9   : > { %6720 = vmatprep.subr.mxu0 %v6112_v63  ;;  %6755 = vmatprep.subr.mxu1 %v6144_v0 }
0x10ea   : > { %6721 = vmatpush3.msra.mxu0 %v6096_v1  ;;  %6756 = vmatpush3.msra.mxu1 %v6128_v4  ;;  %v6155_v1 = vld [vmem:[%s9322_s10 + $0x1] ss:$0 sm:$0xff] }
0x10eb   : > { %6722 = vmatprep.subr.mxu0 %v6111_v6  ;;  %6757 = vmatprep.subr.mxu1 %v6143_v20 }
0x10ec   : > { %6723 = vmatpush3.msra.mxu0 %v6095_v7  ;;  %6758 = vmatpush3.msra.mxu1 %v6127_v16  ;;  %v7038_v7 = vmov 0   ;;  %v6158_v16 = vld [vmem:[#allocation2] ss:$0 sm:$0xff] }
0x10ed   : > { %6724 = vmatprep.subr.mxu0 %v6110_v17  ;;  %6759 = vmatprep.subr.mxu1 %v6142_v18 }
0x10ee   : > { %6725 = vmatpush3.msra.mxu0 %v6094_v21  ;;  %6760 = vmatpush3.msra.mxu1 %v6126_v19 }
0x10ef   : > { %6726 = vmatprep.subr.mxu0 %v6109_v22  ;;  %6761 = vmatprep.subr.mxu1 %v6141_v44  ;;  %v6159_v44 = vld [vmem:[#allocation3] ss:$0 sm:$0xff] }
0x10f0   : > { %6727 = vmatpush3.msra.mxu0 %v6093_v25  ;;  %6762 = vmatpush3.msra.mxu1 %v6125_v26 }
0x10f1   : > { %6728 = vmatprep.subr.mxu0 %v6108_v27  ;;  %6763 = vmatprep.subr.mxu1 %v6140_v30 }
0x10f2   : > { %6729 = vmatpush3.msra.mxu0 %v6092_v32  ;;  %6764 = vmatpush3.msra.mxu1 %v6124_v48  ;;  %v6156_v48 = vld [vmem:[%s9325_s13] ss:$0 sm:$0xff] }
0x10f3   : > { %6730 = vmatprep.subr.mxu0 %v6107_v28  ;;  %6765 = vmatprep.subr.mxu1 %v6139_v29 }
0x10f4   : > { %6731 = vmatpush3.msra.mxu0 %v6091_v9  ;;  %6766 = vmatpush3.msra.mxu1 %v6123_v38 }
0x10f5   : > { %6732 = vmatprep.subr.mxu0 %v6106_v39  ;;  %6767 = vmatprep.subr.mxu1 %v6138_v3 }
0x10f6   : > { %6733 = vmatpush3.msra.mxu0 %v6090_v34  ;;  %6768 = vmatpush3.msra.mxu1 %v6122_v2 }
0x10f7   : > { %5566 = vmatmul.mubr.f32.vlgmr.msra.gmra.mxu0 %v4820_v40  ;;  %5636 = vmatmul.mubr.f32.vlgmr.msra.gmra.mxu1 %v4822_v41 }
0x10f8   : > { %6934 = vset.pattern.permute.xlu0 %v7038_v7  ;;  %6935 = vset.pattern.permute.xlu1 %v7038_v7 }
0x1152   : > { %v6524_v42 = vpop.f32.mrf.mxu0  ;;  %v6559_v46 = vpop.f32.mrf.mxu1 }
0x1154   : > { %v6525_v13 = vpop.f32.mrf.mxu0  ;;  %v6560_v49 = vpop.f32.mrf.mxu1 }
0x1155   : > { %v6526_v47 = vadd.f32 %v6525_v13, %v6524_v42  ;;  %v6561_v51 = vadd.f32 %v6560_v49, %v6559_v46 }
0x1157   : > { %v5218_v53 = vadd.f32 %v6561_v51, %v6526_v47 }
0x1173   : > { %v6594_v5 = vpop.f32.mrf.mxu0  ;;  %v6629_v31 = vpop.f32.mrf.mxu1 }
0x1175   : > { %v6595_v50 = vpop.f32.mrf.mxu0  ;;  %v6630_v54 = vpop.f32.mrf.mxu1 }
0x1176   : > { %v6596_v14 = vadd.f32 %v6595_v50, %v6594_v5  ;;  %v6631_v57 = vadd.f32 %v6630_v54, %v6629_v31 }
0x1178   : > { %v5288_v56 = vadd.f32 %v6596_v14, %v5218_v53 }
0x117a   : > { %v5358_v45 = vadd.f32 %v6631_v57, %v5288_v56 }
0x1195   : > { %v6664_v52 = vpop.f32.mrf.mxu0  ;;  %v6699_v15 = vpop.f32.mrf.mxu1 }
0x1197   : > { %v6665_v55 = vpop.f32.mrf.mxu0  ;;  %v6700_v36 = vpop.f32.mrf.mxu1 }
0x1198   : > { %v6666_v58 = vadd.f32 %v6665_v55, %v6664_v52  ;;  %v6701_v61 = vadd.f32 %v6700_v36, %v6699_v15 }
0x119a   : > { %v5428_v59 = vadd.f32 %v6666_v58, %v5358_v45 }
0x119c   : > { %v5498_v11 = vadd.f32 %v6701_v61, %v5428_v59 }
0x11b7   : > { %v6734_v8 = vpop.f32.mrf.mxu0  ;;  %v6769_v60 = vpop.f32.mrf.mxu1 }
0x11b9   : > { %v6735_v33 = vpop.f32.mrf.mxu0  ;;  %v6770_v62 = vpop.f32.mrf.mxu1 }
0x11ba   : > { %v6736_v10 = vadd.f32 %v6735_v33, %v6734_v8  ;;  %v6771_v63 = vadd.f32 %v6770_v62, %v6769_v60 }
0x11bc   : > { %v5568_v12 = vadd.f32 %v6736_v10, %v5498_v11 }
0x11be   : > { %v5638_v0 = vadd.f32 %v6771_v63, %v5568_v12 }
0x11c0   : > { %v5641_v4 = vadd.f32 %v5638_v0, %v8357_v23 }
0x11c2   : > { %v5650_v6 = vadd.f32 %v6155_v1, %v5641_v4 }
0x11c4   : > { %v5653_v20 = vsel %vm551_vm0, %v5650_v6, 0.0 }
0x11c5   : > { %5654 = vadd.xlane.f32.xlu0 %v5653_v20 }
0x11db   : > { %5694 = vperm.xlu0 %6934, %v6158_v16  }
0x124e   : > { %v5655_v17 = vpop.xlane.xlu0 %5654 }
0x124f   : > { %v5656_v18 = vmul.f32 0.125, %v5655_v17 }
0x1251   : > { %v5657_v21 = vsub.f32 %v5650_v6, %v5656_v18 }
0x1253   : > { %v5658_v19 = vmul.f32 %v5657_v21, %v5657_v21  ;;  %v5678_v28 = vmul.f32 %v6156_v48, %v5657_v21 }
0x1255   : > { %v5659_v22 = vsel %vm551_vm0, %v5658_v19, 0.0 }
0x1256   : > { %5660 = vadd.xlane.f32.xlu1 %v5659_v22  ;;  %v5695_v9 = vpop.permute.xlu0 %5694 }
0x1267   : > { %5705 = vperm.xlu1 %6935, %v6159_v44  }
0x12df   : > { %v5661_v43 = vpop.xlane.xlu1 %5660 }
0x12e0   : > { %v5662_v23 = vmul.f32 0.14285715, %v5661_v43 }
0x12e2   : > { %6968 = vrsqrt.f32 %v5662_v23  ;;  %vm5665_vm12 = vcmp.eq.f32.partialorder %v5662_v23, inf  ;;  %v5668_v26 = vand.u32 2147483648, %v5662_v23  ;;  %vm5667_vm13 = vcmp.eq.f32.partialorder %v5662_v23, 0.0 }
0x12e3   : > { %v5706_v39 = vpop.permute.xlu1 %5705 }
0x12ef   : > { %v6969_v24 = vpop.eup %6968 }
0x12f0   : > { %v5664_v25 = vmul.f32 %v6969_v24, %v5662_v23 }
0x12f2   : > { %v5666_v27 = vsel %vm5665_vm12, %v5662_v23, %v5664_v25 }
0x12f3   : > { %v5669_v30 = vsel %vm5667_vm13, %v5668_v26, %v5666_v27 }
0x12f4   : > { %v5670_v32 = vadd.f32 1e-06, %v5669_v30 }
0x12f6   : > { %6970 = vrcp.f32 %v5670_v32 }
0x1303   : > { %v6971_v29 = vpop.eup %6970 }
0x1304   : > { %v5679_v37 = vmul.f32 %v6971_v29, %v5678_v28 }
0x1306   : > { %v5686_v38 = vadd.f32 %v6157_v35, %v5679_v37 }
0x1308   : > { %v5697_v3 = vmul.f32 %v5695_v9, %v5686_v38 }
0x130a   : > { %v5708_v34 = vadd.f32 %v5706_v39, %v5697_v3 }
0x130c   : > { %6972 = vtanh.f32 %v5708_v34 }
0x1319   : > { %v6973_v2 = vpop.eup %6972 }
0x131a   : > { %5710 = vst.msk [vmem:[%s543_s1] sm:$0xff] %vm551_vm0, %v6973_v2 }
0x131b   : > { %6987 = shalt.err (!%p6984_p3)
}
0x131c   : > { %s6988_s16 = scalar_lea.hbm %s9276_s18, 128  ;;  %s6992_s2 = scalar_lea.hbm %s9328_s17, 256 }
0x131d   : > { %p6989_p4 = scmp.ne.s32.totalorder %s9276_s18, %s6988_s16  ;;  %p6993_p9 = scmp.lt.s32.totalorder %s9276_s18, %s9328_s17 }
0x131e   : > { %p6994_p10 = scmp.lt.s32.totalorder %s6992_s2, %s6988_s16 }
0x131f   : > { %p6990_p7 = pnand %p6989_p4, %p7174_p5 }
0x1320   : > { %p6995_p11 = por %p6994_p10, %p6993_p9 }
0x1321   : > { %p6991_p8 = pneg %p6990_p7 }
0x1323   : > { %p6996_p12 = pnand %p6995_p11, %p6991_p8 }
0x1325   : > { %6999 = shalt.err (!%p6996_p12)
}
0x1326   : > { %6892 = dma.vmem_to_hbm [thread:$0]  (%p7174_p5), %s5726_s23, 128, %s9276_s18, %s5712_s25  }
0x1327 PF: > { %p6898_p13 = scmp.ge.s32.totalorder %s7034_s30, 2  ;;  %s5737_s3 = sand.u32 1, %s7022_s28  }
0x1328   : > { %s5738_s0 = scalar_lea.sflag [#allocation5], %s5737_s3 }
0x1329   : > { %p6895_p0 = pnand %p6898_p13, %p7178_p6 }
0x132b   : > { %p6896_p1 = pneg %p6895_p0 }
0x132d   : > { %7017 = dma.done.wait (%p6896_p1), %s5738_s0, 128  }
0x132e   : > { %7019 = vsyncadd (%p6896_p1), %s5738_s0, 4294967168  ;;  %s9347_s30 = sld [smem:[#allocation8_spill]]  ;;  %s9350_s28 = smov %s7026_s29 }
0x132f   : > { %s9348_s26 = sld [smem:[#allocation7_spill]] }
0x1330   : > { %s9349_s0 = sld [smem:[#allocation9_spill]] }
0x1334   : > { %p31_p2 = scmp.ge.s32.totalorder %s9347_s30, 4  }
0x1335   : > { %s9351_s29 = smov %s9348_s26 }
0x1336   :  { %33 = sbr.rel (!%p31_p2) target bundleno = 8 (0x8), region = 135 }
0x133b   :  { %5743 = vsyncpa [#allocation5], 1 }
0x133c   :  { %5745 = vsyncpa [#allocation5 + $0x1], 1 }

</bundles_post_ra>
